<compile_context>
chip_gen: v7x
topology: tpu7x:2x2x1
jax: 0.10.0
libtpu: 0.0.40
codegen_flags: <defaults>
</compile_context>

<pallas_src>
import functools
import math

import jax
import jax.numpy as jnp
from jax import lax
from jax.experimental import pallas as pl
from jax.experimental.pallas import tpu as pltpu

EPS = 1e-5


def _round_up(x, m):
    return (x + m - 1) // m * m


def _detect_vmem_budget():
    """Per-generation scoped-VMEM budget: ~96 MiB on 128-MiB parts (v5e/v6e),
    ~48 MiB on 64-MiB parts (v7x)."""
    cap = 64 * 1024 * 1024
    try:
        cap = int(pltpu.get_tpu_info().vmem_capacity_bytes)
    except Exception:
        pass
    return max(32 * 1024 * 1024, min(100 * 1024 * 1024, (cap * 3) // 4))


VMEM_BUDGET = _detect_vmem_budget()


def _pick_rows(total, quantum, row_bytes, budget):
    """Largest divisor d of `total` with d*row_bytes <= budget and
    (d % quantum == 0 or d == total).  Guarded fallback — never silently
    returns an arbitrarily oversized tile."""
    cap = max(1, budget // max(1, row_bytes))
    best = 0
    for d in range(1, total + 1):
        if total % d == 0 and d <= cap and (d % quantum == 0 or d == total):
            best = d
    if best:
        return best
    if total * row_bytes <= 2 * budget:      # full extent still (just) fits
        return total
    raise ValueError(
        f"no legal row tile: total={total} quantum={quantum} "
        f"row_bytes={row_bytes} budget={budget}")


def _conv_stats_kernel(x_ref, w_ref, y_ref, stats_ref, *, taps, th, wo, kc):
    """One (sample, cout-group, row-tile) grid step.

    x_ref:     (P, TH, WIN, Kc)  bf16  folded activation row slab (P col-phases)
    w_ref:     (ntaps, Kc, LW)   bf16  per-tap weight matrices (one cout group)
    y_ref:     (TH*Wo, LW)       bf16  raw conv output tile (lane-dense)
    stats_ref: (2, LW)           f32   running [sum; sum_sq] over HW (revisited)
    """
    acc = None
    for idx, (ph, off) in enumerate(taps):
        xs = x_ref[ph, :, pl.ds(off, wo), :]             # (TH, Wo, Kc) bf16
        xs = xs.reshape(th * wo, kc)
        part = jnp.dot(xs, w_ref[idx], preferred_element_type=jnp.float32)
        acc = part if acc is None else acc + part

    # Single lane-dense store of the tile (no scratch accumulator / copy).
    y_ref[...] = acc.astype(y_ref.dtype)

    # One-pass InstanceNorm statistics accumulated across HW tiles (f32).
    @pl.when(pl.program_id(2) == 0)
    def _():
        stats_ref[...] = jnp.zeros_like(stats_ref)

    stats_ref[...] += jnp.concatenate(
        [jnp.sum(acc, axis=0, keepdims=True),
         jnp.sum(acc * acc, axis=0, keepdims=True)], axis=0)


def _norm_relu_kernel(y_ref, stats_ref, o_ref, *, inv_hw):
    """Normalize (biased variance, eps=1e-5) + ReLU; math in f32."""
    y = y_ref[...].astype(jnp.float32)                   # (TB, Cp)
    s = stats_ref[...]                                   # (2,  Cp)
    mean = s[0:1, :] * inv_hw
    var = jnp.maximum(s[1:2, :] * inv_hw - mean * mean, 0.0)
    inv_std = lax.rsqrt(var + EPS)
    o_ref[...] = jnp.maximum((y - mean) * inv_std, 0.0).astype(o_ref.dtype)


def conv_in_relu(x_nhwc, w_oihw, *, stride, pad, out_dtype):
    """ReflectionPad -> Conv2d(bias=False) -> InstanceNorm2d -> ReLU.

    NHWC in / NHWC out; output channels zero-padded to a multiple of 128
    (padded channels stay exactly 0 through IN+ReLU and the next conv)."""
    N, H, W, cin_in = x_nhwc.shape
    cout, cin_true, kh, kw = w_oihw.shape
    assert cin_in >= cin_true
    cout_p = _round_up(cout, 128)
    lw = 256 if cout_p % 256 == 0 else 128               # wide lanes on v6e/v7x
    G = cout_p // lw

    Ho = (H + 2 * pad - kh) // stride + 1
    Wo = (W + 2 * pad - kw) // stride + 1
    HW = Ho * Wo

    xp = jnp.pad(x_nhwc, ((0, 0), (pad, pad), (pad, pad), (0, 0)),
                 mode="reflect").astype(jnp.bfloat16)

    if stride == 1:
        # Layer 1: full im2col (cheap — cin is tiny). K = kh*kw*cin, one matmul.
        patches = [xp[:, i:i + Ho, j:j + Wo, :]
                   for i in range(kh) for j in range(kw)]
        xk = jnp.concatenate(patches, axis=-1)[:, None]  # (N, 1, Ho, Wo, K)
        kc = kh * kw * cin_in
        win = Wo
        taps = ((0, 0),)
        wm = jnp.transpose(w_oihw, (2, 3, 1, 0))         # (kh, kw, cin, cout)
        wm = jnp.pad(wm, ((0, 0), (0, 0), (0, cin_in - cin_true),
                          (0, cout_p - cout)))
        wm = wm.reshape(1, kc, cout_p).astype(jnp.bfloat16)
    else:
        s = stride
        kc = kh * cin_in
        off_max = (kw - 1) // s
        win = Wo + off_max
        # Fold kh into channels: xf[n, ho, wp, i*C + c] = xp[n, s*ho + i, wp, c]
        xf = jnp.concatenate(
            [xp[:, i:i + s * (Ho - 1) + 1:s, :, :] for i in range(kh)], axis=-1)
        pad_w = max(0, s * win - xf.shape[2])
        if pad_w:
            xf = jnp.pad(xf, ((0, 0), (0, 0), (0, pad_w), (0, 0)))
        # Column-phase decomposition: every tap becomes a static near-aligned
        # slice of a contiguous TH-row slab (only tap j=2 has a +1 col offset).
        xk = jnp.stack([xf[:, :, q::s, :][:, :, :win, :] for q in range(s)],
                       axis=1)                           # (N, s, Ho, Wo+1, K)
        taps = tuple((j % s, j // s) for j in range(kw))
        wm = jnp.transpose(w_oihw, (3, 2, 1, 0))         # (kw, kh, cin, cout)
        wm = jnp.pad(wm, ((0, 0), (0, 0), (0, cin_in - cin_true),
                          (0, cout_p - cout)))
        wm = wm.reshape(kw, kc, cout_p).astype(jnp.bfloat16)

    P = xk.shape[1]

    # Row-tile pick from a per-step VMEM byte model (double-buffered blocks).
    row_bytes = (2 * P * win * kc * 2        # x slab, bf16, 2 buffers
                 + 2 * Wo * lw * 2           # y tile,  bf16, 2 buffers
                 + 2 * Wo * lw * 4)          # f32 accumulation temporaries
    fixed = 2 * len(taps) * kc * lw * 2 + 4 * 2 * lw * 4
    conv_budget = max(row_bytes, int(VMEM_BUDGET * 0.6) - fixed)
    th_quant = 8 // math.gcd(Wo, 8)          # ensures (TH*Wo) % 8 == 0
    TH = _pick_rows(Ho, th_quant, row_bytes, conv_budget)
    TB = TH * Wo
    nt = Ho // TH

    conv_kernel = functools.partial(_conv_stats_kernel,
                                    taps=taps, th=TH, wo=Wo, kc=kc)
    conv_flops = 2 * N * HW * (len(taps) * kc) * cout_p
    conv_bytes = (xk.size * 2 * G + wm.size * 2
                  + N * HW * cout_p * 2 + N * 2 * cout_p * 4)

    y, stats = pl.pallas_call(
        conv_kernel,
        out_shape=(jax.ShapeDtypeStruct((N, HW, cout_p), jnp.bfloat16),
                   jax.ShapeDtypeStruct((N, 2, cout_p), jnp.float32)),
        grid_spec=pltpu.PrefetchScalarGridSpec(
            num_scalar_prefetch=0,
            grid=(N, G, nt),                              # n, cout-group, row tile
            in_specs=[
                # Only a TH-row slab of the folded activation per step.
                pl.BlockSpec((None, P, TH, win, kc),
                             lambda n, g, t: (n, 0, t, 0, 0)),
                # Per-group weight, resident across the t axis.
                pl.BlockSpec((len(taps), kc, lw), lambda n, g, t: (0, 0, g)),
            ],
            out_specs=(
                pl.BlockSpec((None, TB, lw), lambda n, g, t: (n, t, g)),
                pl.BlockSpec((None, 2, lw), lambda n, g, t: (n, 0, g)),
            ),
        ),
        compiler_params=pltpu.CompilerParams(
            dimension_semantics=("parallel", "parallel", "arbitrary"),
            vmem_limit_bytes=VMEM_BUDGET),
        cost_estimate=pl.CostEstimate(flops=int(conv_flops), transcendentals=0,
                                      bytes_accessed=int(conv_bytes)),
    )(xk, wm)

    # Second (memory-bound) pass: normalize + ReLU, full-cout_p lane blocks.
    out_isz = jnp.dtype(out_dtype).itemsize
    nrow_bytes = 2 * cout_p * (2 + out_isz) + 2 * cout_p * 4
    TBn = _pick_rows(HW, 8, nrow_bytes, int(VMEM_BUDGET * 0.6))
    ntn = HW // TBn
    norm_kernel = functools.partial(_norm_relu_kernel, inv_hw=1.0 / HW)
    norm_bytes = N * HW * cout_p * (2 + out_isz) + N * 2 * cout_p * 4

    out = pl.pallas_call(
        norm_kernel,
        out_shape=jax.ShapeDtypeStruct((N, HW, cout_p), out_dtype),
        grid_spec=pltpu.PrefetchScalarGridSpec(
            num_scalar_prefetch=0,
            grid=(N, ntn),
            in_specs=[
                pl.BlockSpec((None, TBn, cout_p), lambda n, t: (n, t, 0)),
                pl.BlockSpec((None, 2, cout_p), lambda n, t: (n, 0, 0)),
            ],
            out_specs=pl.BlockSpec((None, TBn, cout_p), lambda n, t: (n, t, 0)),
        ),
        compiler_params=pltpu.CompilerParams(
            dimension_semantics=("parallel", "parallel"),
            vmem_limit_bytes=VMEM_BUDGET),
        cost_estimate=pl.CostEstimate(flops=int(6 * N * HW * cout_p),
                                      transcendentals=int(N * cout_p),
                                      bytes_accessed=int(norm_bytes)),
    )(y, stats)

    return out.reshape(N, Ho, Wo, cout_p)


def init_downsample_params(key, channels):
    """Conv weights ~ N(0, 1), matching self.conv.weight.data.normal_(0.0, 1.0)."""
    k1, k2, k3 = jax.random.split(key, 3)
    w1 = jax.random.normal(k1, (channels, 3, 7, 7), jnp.float32)
    w2 = jax.random.normal(k2, (channels * 2, channels, 3, 3), jnp.float32)
    w3 = jax.random.normal(k3, (channels * 4, channels * 2, 3, 3), jnp.float32)
    return w1, w2, w3


@jax.jit
def downsample_block(x_nchw, w1, w2, w3):
    # NCHW only at the module boundary; NHWC (128-padded channels) inside.
    x = jnp.transpose(x_nchw, (0, 2, 3, 1))                       # NHWC
    x = conv_in_relu(x, w1, stride=1, pad=3, out_dtype=jnp.bfloat16)
    x = conv_in_relu(x, w2, stride=2, pad=1, out_dtype=jnp.bfloat16)
    x = conv_in_relu(x, w3, stride=2, pad=1, out_dtype=jnp.float32)
    x = x[..., : w3.shape[0]]                                     # drop channel pad
    return jnp.transpose(x, (0, 3, 1, 2))                         # back to NCHW


def _reference(x_nchw, w1, w2, w3, compute_dtype):
    """Pure-JAX reference (lax.conv).  compute_dtype=bfloat16 mirrors the
    kernel's bf16-input / f32-accumulation matmuls for a tight check."""
    def layer(x, w, stride, pad):
        xp = jnp.pad(x, ((0, 0), (0, 0), (pad, pad), (pad, pad)), mode="reflect")
        y = lax.conv_general_dilated(
            xp.astype(compute_dtype), w.astype(compute_dtype),
            window_strides=(stride, stride), padding="VALID",
            dimension_numbers=("NCHW", "OIHW", "NCHW"),
            preferred_element_type=jnp.float32)
        mean = jnp.mean(y, axis=(2, 3), keepdims=True)
        var = jnp.mean((y - mean) ** 2, axis=(2, 3), keepdims=True)
        return jnp.maximum((y - mean) * lax.rsqrt(var + EPS), 0.0)

    x = layer(x_nchw, w1, 1, 3)
    x = layer(x, w2, 2, 1)
    x = layer(x, w3, 2, 1)
    return x


if __name__ == "__main__":
    channels = 4
    key = jax.random.PRNGKey(0)
    kx, kw = jax.random.split(key)
    x = jax.random.normal(kx, (2, 3, 16, 16), jnp.float32)   # NCHW, like PyTorch
    w1, w2, w3 = init_downsample_params(kw, channels)

    out = jax.block_until_ready(downsample_block(x, w1, w2, w3))
    assert out.shape == (2, channels * 4, 4, 4), out.shape

    # Tight check vs. a reference using the same bf16-input / f32-accum matmuls.
    ref_bf16 = jax.block_until_ready(_reference(x, w1, w2, w3, jnp.bfloat16))
    err_b = float(jnp.max(jnp.abs(out - ref_bf16)))
    assert jnp.allclose(out, ref_bf16, rtol=5e-2, atol=5e-2), err_b

    # Loose sanity check vs. the full-f32 reference (bf16 rounding only).
    ref_f32 = jax.block_until_ready(_reference(x, w1, w2, w3, jnp.float32))
    err_f = float(jnp.max(jnp.abs(out - ref_f32)))
    assert jnp.allclose(out, ref_f32, rtol=1.5e-1, atol=1.5e-1), err_f

    print("KERNEL_OK")
</pallas_src>

<mosaic_0001>
module attributes {stable_mosaic.version = 11 : i64} {
  func.func @_conv_stats_kernel(%arg0: i32, %arg1: i32, %arg2: i32, %arg3: memref<1x1x16x16x147xbf16, #tpu.memory_space<vmem>>, %arg4: memref<1x147x128xbf16, #tpu.memory_space<vmem>>, %arg5: memref<1x256x128xbf16, #tpu.memory_space<vmem>>, %arg6: memref<1x2x128xf32, #tpu.memory_space<vmem>>) attributes {dimension_semantics = [#tpu.dimension_semantics<parallel>, #tpu.dimension_semantics<parallel>, #tpu.dimension_semantics<arbitrary>], iteration_bounds = array<i64: 2, 1, 1>, scalar_prefetch = 0 : i64, scratch_operands = 0 : i64, tpu.core_type = #tpu.core_type<tc>, window_params = [{transform_indices = @transform_0, window_bounds = array<i64: 1, 1, 16, 16, 147>}, {transform_indices = @transform_1, window_bounds = array<i64: 1, 147, 128>}, {transform_indices = @transform_2, window_bounds = array<i64: 1, 256, 128>}, {transform_indices = @transform_3, window_bounds = array<i64: 1, 2, 128>}]} {
    %c0 = arith.constant 0 : index
    %c0_0 = arith.constant 0 : index
    %c0_1 = arith.constant 0 : index
    %c0_2 = arith.constant 0 : index
    %c0_3 = arith.constant 0 : index
    %0 = vector.load %arg3[%c0, %c0_0, %c0_1, %c0_2, %c0_3] : memref<1x1x16x16x147xbf16, #tpu.memory_space<vmem>>, vector<1x1x16x16x147xbf16>
    %1 = vector.shape_cast %0 : vector<1x1x16x16x147xbf16> to vector<16x16x147xbf16>
    %2 = vector.shape_cast %1 : vector<16x16x147xbf16> to vector<256x147xbf16>
    %c0_4 = arith.constant 0 : index
    %c0_5 = arith.constant 0 : index
    %c0_6 = arith.constant 0 : index
    %3 = vector.load %arg4[%c0_4, %c0_5, %c0_6] : memref<1x147x128xbf16, #tpu.memory_space<vmem>>, vector<1x147x128xbf16>
    %4 = vector.shape_cast %3 : vector<1x147x128xbf16> to vector<147x128xbf16>
    %cst = arith.constant dense<0.000000e+00> : vector<256x128xf32>
    %5 = tpu.matmul %2, %4, %cst {dimension_numbers = #tpu.dot_dimension_numbers<[1], [0], [0], [1], [0, 0, 1, 1], [], []>} : vector<256x147xbf16>, vector<147x128xbf16>, vector<256x128xf32> -> vector<256x128xf32>
    %6 = arith.truncf %5 : vector<256x128xf32> to vector<256x128xbf16>
    %c0_7 = arith.constant 0 : index
    %c0_8 = arith.constant 0 : index
    %c0_9 = arith.constant 0 : index
    %7 = vector.load %arg5[%c0_7, %c0_8, %c0_9] : memref<1x256x128xbf16, #tpu.memory_space<vmem>>, vector<1x256x128xbf16>
    %8 = vector.shape_cast %7 : vector<1x256x128xbf16> to vector<256x128xbf16>
    %9 = vector.shape_cast %6 : vector<256x128xbf16> to vector<1x256x128xbf16>
    tpu.vector_store %arg5[%c0_7, %c0_8, %c0_9], %9 {strides = array<i32>} : memref<1x256x128xbf16, #tpu.memory_space<vmem>>, vector<1x256x128xbf16>,
    %c0_i32 = arith.constant 0 : i32
    %10 = arith.cmpi eq, %arg2, %c0_i32 : i32
    %11 = arith.extui %10 : i1 to i32
    %c0_i32_10 = arith.constant 0 : i32
    %12 = arith.cmpi ne, %11, %c0_i32_10 : i32
    scf.if %12 {
      %cst_19 = arith.constant 0.000000e+00 : f32
      %25 = vector.broadcast %cst_19 : f32 to vector<2x128xf32>
      %c0_20 = arith.constant 0 : index
      %c0_21 = arith.constant 0 : index
      %c0_22 = arith.constant 0 : index
      %26 = vector.load %arg6[%c0_20, %c0_21, %c0_22] : memref<1x2x128xf32, #tpu.memory_space<vmem>>, vector<1x2x128xf32>
      %27 = vector.shape_cast %26 : vector<1x2x128xf32> to vector<2x128xf32>
      %28 = vector.shape_cast %25 : vector<2x128xf32> to vector<1x2x128xf32>
      tpu.vector_store %arg6[%c0_20, %c0_21, %c0_22], %28 {strides = array<i32>} : memref<1x2x128xf32, #tpu.memory_space<vmem>>, vector<1x2x128xf32>,
    } else {
    }
    %c0_11 = arith.constant 0 : index
    %c0_12 = arith.constant 0 : index
    %c0_13 = arith.constant 0 : index
    %13 = vector.load %arg6[%c0_11, %c0_12, %c0_13] : memref<1x2x128xf32, #tpu.memory_space<vmem>>, vector<1x2x128xf32>
    %14 = vector.shape_cast %13 : vector<1x2x128xf32> to vector<2x128xf32>
    %cst_14 = arith.constant dense<0.000000e+00> : vector<128xf32>
    %15 = vector.multi_reduction <add>, %5, %cst_14 [0] : vector<256x128xf32> to vector<128xf32>
    %16 = vector.shape_cast %15 : vector<128xf32> to vector<1x128xf32>
    %17 = arith.mulf %5, %5 : vector<256x128xf32>
    %cst_15 = arith.constant dense<0.000000e+00> : vector<128xf32>
    %18 = vector.multi_reduction <add>, %17, %cst_15 [0] : vector<256x128xf32> to vector<128xf32>
    %19 = vector.shape_cast %18 : vector<128xf32> to vector<1x128xf32>
    %20 = tpu.concatenate %16, %19 in 0 : vector<1x128xf32>, vector<1x128xf32> -> vector<2x128xf32>
    %21 = arith.addf %14, %20 : vector<2x128xf32>
    %c0_16 = arith.constant 0 : index
    %c0_17 = arith.constant 0 : index
    %c0_18 = arith.constant 0 : index
    %22 = vector.load %arg6[%c0_16, %c0_17, %c0_18] : memref<1x2x128xf32, #tpu.memory_space<vmem>>, vector<1x2x128xf32>
    %23 = vector.shape_cast %22 : vector<1x2x128xf32> to vector<2x128xf32>
    %24 = vector.shape_cast %21 : vector<2x128xf32> to vector<1x2x128xf32>
    tpu.vector_store %arg6[%c0_16, %c0_17, %c0_18], %24 {strides = array<i32>} : memref<1x2x128xf32, #tpu.memory_space<vmem>>, vector<1x2x128xf32>,
    return
  }
  func.func @transform_0(%arg0: i32, %arg1: i32, %arg2: i32) -> (i32, i32, i32, i32, i32) {
    %c0_i32 = arith.constant 0 : i32
    %c0_i32_0 = arith.constant 0 : i32
    %c0_i32_1 = arith.constant 0 : i32
    %c0_i32_2 = arith.constant 0 : i32
    return %arg0, %c0_i32, %arg2, %c0_i32_0, %c0_i32_1 : i32, i32, i32, i32, i32
  }
  func.func @transform_1(%arg0: i32, %arg1: i32, %arg2: i32) -> (i32, i32, i32) {
    %c0_i32 = arith.constant 0 : i32
    %c0_i32_0 = arith.constant 0 : i32
    %c0_i32_1 = arith.constant 0 : i32
    return %c0_i32, %c0_i32_0, %arg1 : i32, i32, i32
  }
  func.func @transform_2(%arg0: i32, %arg1: i32, %arg2: i32) -> (i32, i32, i32) {
    %c0_i32 = arith.constant 0 : i32
    return %arg0, %arg2, %arg1 : i32, i32, i32
  }
  func.func @transform_3(%arg0: i32, %arg1: i32, %arg2: i32) -> (i32, i32, i32) {
    %c0_i32 = arith.constant 0 : i32
    %c0_i32_0 = arith.constant 0 : i32
    return %arg0, %c0_i32, %arg1 : i32, i32, i32
  }
}

module attributes {stable_mosaic.version = 11 : i64} {
  func.func @_norm_relu_kernel(%arg0: i32, %arg1: i32, %arg2: memref<1x256x128xbf16, #tpu.memory_space<vmem>>, %arg3: memref<1x2x128xf32, #tpu.memory_space<vmem>>, %arg4: memref<1x256x128xbf16, #tpu.memory_space<vmem>>) attributes {dimension_semantics = [#tpu.dimension_semantics<parallel>, #tpu.dimension_semantics<parallel>], iteration_bounds = array<i64: 2, 1>, scalar_prefetch = 0 : i64, scratch_operands = 0 : i64, tpu.core_type = #tpu.core_type<tc>, window_params = [{transform_indices = @transform_0, window_bounds = array<i64: 1, 256, 128>}, {transform_indices = @transform_1, window_bounds = array<i64: 1, 2, 128>}, {transform_indices = @transform_2, window_bounds = array<i64: 1, 256, 128>}]} {
    %c0 = arith.constant 0 : index
    %c0_0 = arith.constant 0 : index
    %c0_1 = arith.constant 0 : index
    %0 = vector.load %arg2[%c0, %c0_0, %c0_1] : memref<1x256x128xbf16, #tpu.memory_space<vmem>>, vector<1x256x128xbf16>
    %1 = vector.shape_cast %0 : vector<1x256x128xbf16> to vector<256x128xbf16>
    %2 = arith.extf %1 : vector<256x128xbf16> to vector<256x128xf32>
    %c0_2 = arith.constant 0 : index
    %c0_3 = arith.constant 0 : index
    %c0_4 = arith.constant 0 : index
    %3 = vector.load %arg3[%c0_2, %c0_3, %c0_4] : memref<1x2x128xf32, #tpu.memory_space<vmem>>, vector<1x2x128xf32>
    %4 = vector.shape_cast %3 : vector<1x2x128xf32> to vector<2x128xf32>
    %5 = vector.extract_strided_slice %4 {offsets = [0, 0], sizes = [1, 128], strides = [1, 1]} : vector<2x128xf32> to vector<1x128xf32>
    %cst = arith.constant 3.906250e-03 : f32
    %6 = vector.broadcast %cst : f32 to vector<1x128xf32>
    %7 = arith.mulf %5, %6 : vector<1x128xf32>
    %8 = vector.extract_strided_slice %4 {offsets = [1, 0], sizes = [1, 128], strides = [1, 1]} : vector<2x128xf32> to vector<1x128xf32>
    %cst_5 = arith.constant 3.906250e-03 : f32
    %9 = vector.broadcast %cst_5 : f32 to vector<1x128xf32>
    %10 = arith.mulf %8, %9 : vector<1x128xf32>
    %11 = arith.mulf %7, %7 : vector<1x128xf32>
    %12 = arith.subf %10, %11 : vector<1x128xf32>
    %cst_6 = arith.constant 0.000000e+00 : f32
    %13 = vector.broadcast %cst_6 : f32 to vector<1x128xf32>
    %14 = arith.maximumf %12, %13 : vector<1x128xf32>
    %cst_7 = arith.constant 9.99999974E-6 : f32
    %15 = vector.broadcast %cst_7 : f32 to vector<1x128xf32>
    %16 = arith.addf %14, %15 : vector<1x128xf32>
    %17 = math.rsqrt %16 : vector<1x128xf32>
    %18 = vector.broadcast %7 : vector<1x128xf32> to vector<256x128xf32>
    %19 = arith.subf %2, %18 : vector<256x128xf32>
    %20 = vector.broadcast %17 : vector<1x128xf32> to vector<256x128xf32>
    %21 = arith.mulf %19, %20 : vector<256x128xf32>
    %cst_8 = arith.constant 0.000000e+00 : f32
    %22 = vector.broadcast %cst_8 : f32 to vector<256x128xf32>
    %23 = arith.maximumf %21, %22 : vector<256x128xf32>
    %24 = arith.truncf %23 : vector<256x128xf32> to vector<256x128xbf16>
    %c0_9 = arith.constant 0 : index
    %c0_10 = arith.constant 0 : index
    %c0_11 = arith.constant 0 : index
    %25 = vector.load %arg4[%c0_9, %c0_10, %c0_11] : memref<1x256x128xbf16, #tpu.memory_space<vmem>>, vector<1x256x128xbf16>
    %26 = vector.shape_cast %25 : vector<1x256x128xbf16> to vector<256x128xbf16>
    %27 = vector.shape_cast %24 : vector<256x128xbf16> to vector<1x256x128xbf16>
    tpu.vector_store %arg4[%c0_9, %c0_10, %c0_11], %27 {strides = array<i32>} : memref<1x256x128xbf16, #tpu.memory_space<vmem>>, vector<1x256x128xbf16>,
    return
  }
  func.func @transform_0(%arg0: i32, %arg1: i32) -> (i32, i32, i32) {
    %c0_i32 = arith.constant 0 : i32
    %c0_i32_0 = arith.constant 0 : i32
    return %arg0, %arg1, %c0_i32 : i32, i32, i32
  }
  func.func @transform_1(%arg0: i32, %arg1: i32) -> (i32, i32, i32) {
    %c0_i32 = arith.constant 0 : i32
    %c0_i32_0 = arith.constant 0 : i32
    %c0_i32_1 = arith.constant 0 : i32
    return %arg0, %c0_i32, %c0_i32_0 : i32, i32, i32
  }
  func.func @transform_2(%arg0: i32, %arg1: i32) -> (i32, i32, i32) {
    %c0_i32 = arith.constant 0 : i32
    %c0_i32_0 = arith.constant 0 : i32
    return %arg0, %arg1, %c0_i32 : i32, i32, i32
  }
}

module attributes {stable_mosaic.version = 11 : i64} {
  func.func @_conv_stats_kernel(%arg0: i32, %arg1: i32, %arg2: i32, %arg3: memref<1x2x8x9x384xbf16, #tpu.memory_space<vmem>>, %arg4: memref<3x384x128xbf16, #tpu.memory_space<vmem>>, %arg5: memref<1x64x128xbf16, #tpu.memory_space<vmem>>, %arg6: memref<1x2x128xf32, #tpu.memory_space<vmem>>) attributes {dimension_semantics = [#tpu.dimension_semantics<parallel>, #tpu.dimension_semantics<parallel>, #tpu.dimension_semantics<arbitrary>], iteration_bounds = array<i64: 2, 1, 1>, scalar_prefetch = 0 : i64, scratch_operands = 0 : i64, tpu.core_type = #tpu.core_type<tc>, window_params = [{transform_indices = @transform_0, window_bounds = array<i64: 1, 2, 8, 9, 384>}, {transform_indices = @transform_1, window_bounds = array<i64: 3, 384, 128>}, {transform_indices = @transform_2, window_bounds = array<i64: 1, 64, 128>}, {transform_indices = @transform_3, window_bounds = array<i64: 1, 2, 128>}]} {
    %c0 = arith.constant 0 : index
    %c0_0 = arith.constant 0 : index
    %c0_1 = arith.constant 0 : index
    %c0_2 = arith.constant 0 : index
    %c0_3 = arith.constant 0 : index
    %0 = vector.load %arg3[%c0, %c0_0, %c0_1, %c0_2, %c0_3] : memref<1x2x8x9x384xbf16, #tpu.memory_space<vmem>>, vector<1x1x8x8x384xbf16>
    %1 = vector.shape_cast %0 : vector<1x1x8x8x384xbf16> to vector<8x8x384xbf16>
    %2 = vector.shape_cast %1 : vector<8x8x384xbf16> to vector<64x384xbf16>
    %c0_4 = arith.constant 0 : index
    %c0_5 = arith.constant 0 : index
    %c0_6 = arith.constant 0 : index
    %3 = vector.load %arg4[%c0_4, %c0_5, %c0_6] : memref<3x384x128xbf16, #tpu.memory_space<vmem>>, vector<1x384x128xbf16>
    %4 = vector.shape_cast %3 : vector<1x384x128xbf16> to vector<384x128xbf16>
    %cst = arith.constant dense<0.000000e+00> : vector<64x128xf32>
    %5 = tpu.matmul %2, %4, %cst {dimension_numbers = #tpu.dot_dimension_numbers<[1], [0], [0], [1], [0, 0, 1, 1], [], []>} : vector<64x384xbf16>, vector<384x128xbf16>, vector<64x128xf32> -> vector<64x128xf32>
    %c0_7 = arith.constant 0 : index
    %c1 = arith.constant 1 : index
    %c0_8 = arith.constant 0 : index
    %c0_9 = arith.constant 0 : index
    %c0_10 = arith.constant 0 : index
    %6 = vector.load %arg3[%c0_7, %c1, %c0_8, %c0_9, %c0_10] : memref<1x2x8x9x384xbf16, #tpu.memory_space<vmem>>, vector<1x1x8x8x384xbf16>
    %7 = vector.shape_cast %6 : vector<1x1x8x8x384xbf16> to vector<8x8x384xbf16>
    %8 = vector.shape_cast %7 : vector<8x8x384xbf16> to vector<64x384xbf16>
    %c1_11 = arith.constant 1 : index
    %c0_12 = arith.constant 0 : index
    %c0_13 = arith.constant 0 : index
    %9 = vector.load %arg4[%c1_11, %c0_12, %c0_13] : memref<3x384x128xbf16, #tpu.memory_space<vmem>>, vector<1x384x128xbf16>
    %10 = vector.shape_cast %9 : vector<1x384x128xbf16> to vector<384x128xbf16>
    %cst_14 = arith.constant dense<0.000000e+00> : vector<64x128xf32>
    %11 = tpu.matmul %8, %10, %cst_14 {dimension_numbers = #tpu.dot_dimension_numbers<[1], [0], [0], [1], [0, 0, 1, 1], [], []>} : vector<64x384xbf16>, vector<384x128xbf16>, vector<64x128xf32> -> vector<64x128xf32>
    %12 = arith.addf %5, %11 : vector<64x128xf32>
    %c0_15 = arith.constant 0 : index
    %c0_16 = arith.constant 0 : index
    %c0_17 = arith.constant 0 : index
    %c1_18 = arith.constant 1 : index
    %c0_19 = arith.constant 0 : index
    %13 = vector.load %arg3[%c0_15, %c0_16, %c0_17, %c1_18, %c0_19] : memref<1x2x8x9x384xbf16, #tpu.memory_space<vmem>>, vector<1x1x8x8x384xbf16>
    %14 = vector.shape_cast %13 : vector<1x1x8x8x384xbf16> to vector<8x8x384xbf16>
    %15 = vector.shape_cast %14 : vector<8x8x384xbf16> to vector<64x384xbf16>
    %c2 = arith.constant 2 : index
    %c0_20 = arith.constant 0 : index
    %c0_21 = arith.constant 0 : index
    %16 = vector.load %arg4[%c2, %c0_20, %c0_21] : memref<3x384x128xbf16, #tpu.memory_space<vmem>>, vector<1x384x128xbf16>
    %17 = vector.shape_cast %16 : vector<1x384x128xbf16> to vector<384x128xbf16>
    %cst_22 = arith.constant dense<0.000000e+00> : vector<64x128xf32>
    %18 = tpu.matmul %15, %17, %cst_22 {dimension_numbers = #tpu.dot_dimension_numbers<[1], [0], [0], [1], [0, 0, 1, 1], [], []>} : vector<64x384xbf16>, vector<384x128xbf16>, vector<64x128xf32> -> vector<64x128xf32>
    %19 = arith.addf %12, %18 : vector<64x128xf32>
    %20 = arith.truncf %19 : vector<64x128xf32> to vector<64x128xbf16>
    %c0_23 = arith.constant 0 : index
    %c0_24 = arith.constant 0 : index
    %c0_25 = arith.constant 0 : index
    %21 = vector.load %arg5[%c0_23, %c0_24, %c0_25] : memref<1x64x128xbf16, #tpu.memory_space<vmem>>, vector<1x64x128xbf16>
    %22 = vector.shape_cast %21 : vector<1x64x128xbf16> to vector<64x128xbf16>
    %23 = vector.shape_cast %20 : vector<64x128xbf16> to vector<1x64x128xbf16>
    tpu.vector_store %arg5[%c0_23, %c0_24, %c0_25], %23 {strides = array<i32>} : memref<1x64x128xbf16, #tpu.memory_space<vmem>>, vector<1x64x128xbf16>,
    %c0_i32 = arith.constant 0 : i32
    %24 = arith.cmpi eq, %arg2, %c0_i32 : i32
    %25 = arith.extui %24 : i1 to i32
    %c0_i32_26 = arith.constant 0 : i32
    %26 = arith.cmpi ne, %25, %c0_i32_26 : i32
    scf.if %26 {
      %cst_35 = arith.constant 0.000000e+00 : f32
      %39 = vector.broadcast %cst_35 : f32 to vector<2x128xf32>
      %c0_36 = arith.constant 0 : index
      %c0_37 = arith.constant 0 : index
      %c0_38 = arith.constant 0 : index
      %40 = vector.load %arg6[%c0_36, %c0_37, %c0_38] : memref<1x2x128xf32, #tpu.memory_space<vmem>>, vector<1x2x128xf32>
      %41 = vector.shape_cast %40 : vector<1x2x128xf32> to vector<2x128xf32>
      %42 = vector.shape_cast %39 : vector<2x128xf32> to vector<1x2x128xf32>
      tpu.vector_store %arg6[%c0_36, %c0_37, %c0_38], %42 {strides = array<i32>} : memref<1x2x128xf32, #tpu.memory_space<vmem>>, vector<1x2x128xf32>,
    } else {
    }
    %c0_27 = arith.constant 0 : index
    %c0_28 = arith.constant 0 : index
    %c0_29 = arith.constant 0 : index
    %27 = vector.load %arg6[%c0_27, %c0_28, %c0_29] : memref<1x2x128xf32, #tpu.memory_space<vmem>>, vector<1x2x128xf32>
    %28 = vector.shape_cast %27 : vector<1x2x128xf32> to vector<2x128xf32>
    %cst_30 = arith.constant dense<0.000000e+00> : vector<128xf32>
    %29 = vector.multi_reduction <add>, %19, %cst_30 [0] : vector<64x128xf32> to vector<128xf32>
    %30 = vector.shape_cast %29 : vector<128xf32> to vector<1x128xf32>
    %31 = arith.mulf %19, %19 : vector<64x128xf32>
    %cst_31 = arith.constant dense<0.000000e+00> : vector<128xf32>
    %32 = vector.multi_reduction <add>, %31, %cst_31 [0] : vector<64x128xf32> to vector<128xf32>
    %33 = vector.shape_cast %32 : vector<128xf32> to vector<1x128xf32>
    %34 = tpu.concatenate %30, %33 in 0 : vector<1x128xf32>, vector<1x128xf32> -> vector<2x128xf32>
    %35 = arith.addf %28, %34 : vector<2x128xf32>
    %c0_32 = arith.constant 0 : index
    %c0_33 = arith.constant 0 : index
    %c0_34 = arith.constant 0 : index
    %36 = vector.load %arg6[%c0_32, %c0_33, %c0_34] : memref<1x2x128xf32, #tpu.memory_space<vmem>>, vector<1x2x128xf32>
    %37 = vector.shape_cast %36 : vector<1x2x128xf32> to vector<2x128xf32>
    %38 = vector.shape_cast %35 : vector<2x128xf32> to vector<1x2x128xf32>
    tpu.vector_store %arg6[%c0_32, %c0_33, %c0_34], %38 {strides = array<i32>} : memref<1x2x128xf32, #tpu.memory_space<vmem>>, vector<1x2x128xf32>,
    return
  }
  func.func @transform_0(%arg0: i32, %arg1: i32, %arg2: i32) -> (i32, i32, i32, i32, i32) {
    %c0_i32 = arith.constant 0 : i32
    %c0_i32_0 = arith.constant 0 : i32
    %c0_i32_1 = arith.constant 0 : i32
    %c0_i32_2 = arith.constant 0 : i32
    return %arg0, %c0_i32, %arg2, %c0_i32_0, %c0_i32_1 : i32, i32, i32, i32, i32
  }
  func.func @transform_1(%arg0: i32, %arg1: i32, %arg2: i32) -> (i32, i32, i32) {
    %c0_i32 = arith.constant 0 : i32
    %c0_i32_0 = arith.constant 0 : i32
    %c0_i32_1 = arith.constant 0 : i32
    return %c0_i32, %c0_i32_0, %arg1 : i32, i32, i32
  }
  func.func @transform_2(%arg0: i32, %arg1: i32, %arg2: i32) -> (i32, i32, i32) {
    %c0_i32 = arith.constant 0 : i32
    return %arg0, %arg2, %arg1 : i32, i32, i32
  }
  func.func @transform_3(%arg0: i32, %arg1: i32, %arg2: i32) -> (i32, i32, i32) {
    %c0_i32 = arith.constant 0 : i32
    %c0_i32_0 = arith.constant 0 : i32
    return %arg0, %c0_i32, %arg1 : i32, i32, i32
  }
}

module attributes {stable_mosaic.version = 11 : i64} {
  func.func @_norm_relu_kernel(%arg0: i32, %arg1: i32, %arg2: memref<1x64x128xbf16, #tpu.memory_space<vmem>>, %arg3: memref<1x2x128xf32, #tpu.memory_space<vmem>>, %arg4: memref<1x64x128xbf16, #tpu.memory_space<vmem>>) attributes {dimension_semantics = [#tpu.dimension_semantics<parallel>, #tpu.dimension_semantics<parallel>], iteration_bounds = array<i64: 2, 1>, scalar_prefetch = 0 : i64, scratch_operands = 0 : i64, tpu.core_type = #tpu.core_type<tc>, window_params = [{transform_indices = @transform_0, window_bounds = array<i64: 1, 64, 128>}, {transform_indices = @transform_1, window_bounds = array<i64: 1, 2, 128>}, {transform_indices = @transform_2, window_bounds = array<i64: 1, 64, 128>}]} {
    %c0 = arith.constant 0 : index
    %c0_0 = arith.constant 0 : index
    %c0_1 = arith.constant 0 : index
    %0 = vector.load %arg2[%c0, %c0_0, %c0_1] : memref<1x64x128xbf16, #tpu.memory_space<vmem>>, vector<1x64x128xbf16>
    %1 = vector.shape_cast %0 : vector<1x64x128xbf16> to vector<64x128xbf16>
    %2 = arith.extf %1 : vector<64x128xbf16> to vector<64x128xf32>
    %c0_2 = arith.constant 0 : index
    %c0_3 = arith.constant 0 : index
    %c0_4 = arith.constant 0 : index
    %3 = vector.load %arg3[%c0_2, %c0_3, %c0_4] : memref<1x2x128xf32, #tpu.memory_space<vmem>>, vector<1x2x128xf32>
    %4 = vector.shape_cast %3 : vector<1x2x128xf32> to vector<2x128xf32>
    %5 = vector.extract_strided_slice %4 {offsets = [0, 0], sizes = [1, 128], strides = [1, 1]} : vector<2x128xf32> to vector<1x128xf32>
    %cst = arith.constant 1.562500e-02 : f32
    %6 = vector.broadcast %cst : f32 to vector<1x128xf32>
    %7 = arith.mulf %5, %6 : vector<1x128xf32>
    %8 = vector.extract_strided_slice %4 {offsets = [1, 0], sizes = [1, 128], strides = [1, 1]} : vector<2x128xf32> to vector<1x128xf32>
    %cst_5 = arith.constant 1.562500e-02 : f32
    %9 = vector.broadcast %cst_5 : f32 to vector<1x128xf32>
    %10 = arith.mulf %8, %9 : vector<1x128xf32>
    %11 = arith.mulf %7, %7 : vector<1x128xf32>
    %12 = arith.subf %10, %11 : vector<1x128xf32>
    %cst_6 = arith.constant 0.000000e+00 : f32
    %13 = vector.broadcast %cst_6 : f32 to vector<1x128xf32>
    %14 = arith.maximumf %12, %13 : vector<1x128xf32>
    %cst_7 = arith.constant 9.99999974E-6 : f32
    %15 = vector.broadcast %cst_7 : f32 to vector<1x128xf32>
    %16 = arith.addf %14, %15 : vector<1x128xf32>
    %17 = math.rsqrt %16 : vector<1x128xf32>
    %18 = vector.broadcast %7 : vector<1x128xf32> to vector<64x128xf32>
    %19 = arith.subf %2, %18 : vector<64x128xf32>
    %20 = vector.broadcast %17 : vector<1x128xf32> to vector<64x128xf32>
    %21 = arith.mulf %19, %20 : vector<64x128xf32>
    %cst_8 = arith.constant 0.000000e+00 : f32
    %22 = vector.broadcast %cst_8 : f32 to vector<64x128xf32>
    %23 = arith.maximumf %21, %22 : vector<64x128xf32>
    %24 = arith.truncf %23 : vector<64x128xf32> to vector<64x128xbf16>
    %c0_9 = arith.constant 0 : index
    %c0_10 = arith.constant 0 : index
    %c0_11 = arith.constant 0 : index
    %25 = vector.load %arg4[%c0_9, %c0_10, %c0_11] : memref<1x64x128xbf16, #tpu.memory_space<vmem>>, vector<1x64x128xbf16>
    %26 = vector.shape_cast %25 : vector<1x64x128xbf16> to vector<64x128xbf16>
    %27 = vector.shape_cast %24 : vector<64x128xbf16> to vector<1x64x128xbf16>
    tpu.vector_store %arg4[%c0_9, %c0_10, %c0_11], %27 {strides = array<i32>} : memref<1x64x128xbf16, #tpu.memory_space<vmem>>, vector<1x64x128xbf16>,
    return
  }
  func.func @transform_0(%arg0: i32, %arg1: i32) -> (i32, i32, i32) {
    %c0_i32 = arith.constant 0 : i32
    %c0_i32_0 = arith.constant 0 : i32
    return %arg0, %arg1, %c0_i32 : i32, i32, i32
  }
  func.func @transform_1(%arg0: i32, %arg1: i32) -> (i32, i32, i32) {
    %c0_i32 = arith.constant 0 : i32
    %c0_i32_0 = arith.constant 0 : i32
    %c0_i32_1 = arith.constant 0 : i32
    return %arg0, %c0_i32, %c0_i32_0 : i32, i32, i32
  }
  func.func @transform_2(%arg0: i32, %arg1: i32) -> (i32, i32, i32) {
    %c0_i32 = arith.constant 0 : i32
    %c0_i32_0 = arith.constant 0 : i32
    return %arg0, %arg1, %c0_i32 : i32, i32, i32
  }
}

module attributes {stable_mosaic.version = 11 : i64} {
  func.func @_conv_stats_kernel(%arg0: i32, %arg1: i32, %arg2: i32, %arg3: memref<1x2x4x5x384xbf16, #tpu.memory_space<vmem>>, %arg4: memref<3x384x128xbf16, #tpu.memory_space<vmem>>, %arg5: memref<1x16x128xbf16, #tpu.memory_space<vmem>>, %arg6: memref<1x2x128xf32, #tpu.memory_space<vmem>>) attributes {dimension_semantics = [#tpu.dimension_semantics<parallel>, #tpu.dimension_semantics<parallel>, #tpu.dimension_semantics<arbitrary>], iteration_bounds = array<i64: 2, 1, 1>, scalar_prefetch = 0 : i64, scratch_operands = 0 : i64, tpu.core_type = #tpu.core_type<tc>, window_params = [{transform_indices = @transform_0, window_bounds = array<i64: 1, 2, 4, 5, 384>}, {transform_indices = @transform_1, window_bounds = array<i64: 3, 384, 128>}, {transform_indices = @transform_2, window_bounds = array<i64: 1, 16, 128>}, {transform_indices = @transform_3, window_bounds = array<i64: 1, 2, 128>}]} {
    %c0 = arith.constant 0 : index
    %c0_0 = arith.constant 0 : index
    %c0_1 = arith.constant 0 : index
    %c0_2 = arith.constant 0 : index
    %c0_3 = arith.constant 0 : index
    %0 = vector.load %arg3[%c0, %c0_0, %c0_1, %c0_2, %c0_3] : memref<1x2x4x5x384xbf16, #tpu.memory_space<vmem>>, vector<1x1x4x4x384xbf16>
    %1 = vector.shape_cast %0 : vector<1x1x4x4x384xbf16> to vector<4x4x384xbf16>
    %2 = vector.shape_cast %1 : vector<4x4x384xbf16> to vector<16x384xbf16>
    %c0_4 = arith.constant 0 : index
    %c0_5 = arith.constant 0 : index
    %c0_6 = arith.constant 0 : index
    %3 = vector.load %arg4[%c0_4, %c0_5, %c0_6] : memref<3x384x128xbf16, #tpu.memory_space<vmem>>, vector<1x384x128xbf16>
    %4 = vector.shape_cast %3 : vector<1x384x128xbf16> to vector<384x128xbf16>
    %cst = arith.constant dense<0.000000e+00> : vector<16x128xf32>
    %5 = tpu.matmul %2, %4, %cst {dimension_numbers = #tpu.dot_dimension_numbers<[1], [0], [0], [1], [0, 0, 1, 1], [], []>} : vector<16x384xbf16>, vector<384x128xbf16>, vector<16x128xf32> -> vector<16x128xf32>
    %c0_7 = arith.constant 0 : index
    %c1 = arith.constant 1 : index
    %c0_8 = arith.constant 0 : index
    %c0_9 = arith.constant 0 : index
    %c0_10 = arith.constant 0 : index
    %6 = vector.load %arg3[%c0_7, %c1, %c0_8, %c0_9, %c0_10] : memref<1x2x4x5x384xbf16, #tpu.memory_space<vmem>>, vector<1x1x4x4x384xbf16>
    %7 = vector.shape_cast %6 : vector<1x1x4x4x384xbf16> to vector<4x4x384xbf16>
    %8 = vector.shape_cast %7 : vector<4x4x384xbf16> to vector<16x384xbf16>
    %c1_11 = arith.constant 1 : index
    %c0_12 = arith.constant 0 : index
    %c0_13 = arith.constant 0 : index
    %9 = vector.load %arg4[%c1_11, %c0_12, %c0_13] : memref<3x384x128xbf16, #tpu.memory_space<vmem>>, vector<1x384x128xbf16>
    %10 = vector.shape_cast %9 : vector<1x384x128xbf16> to vector<384x128xbf16>
    %cst_14 = arith.constant dense<0.000000e+00> : vector<16x128xf32>
    %11 = tpu.matmul %8, %10, %cst_14 {dimension_numbers = #tpu.dot_dimension_numbers<[1], [0], [0], [1], [0, 0, 1, 1], [], []>} : vector<16x384xbf16>, vector<384x128xbf16>, vector<16x128xf32> -> vector<16x128xf32>
    %12 = arith.addf %5, %11 : vector<16x128xf32>
    %c0_15 = arith.constant 0 : index
    %c0_16 = arith.constant 0 : index
    %c0_17 = arith.constant 0 : index
    %c1_18 = arith.constant 1 : index
    %c0_19 = arith.constant 0 : index
    %13 = vector.load %arg3[%c0_15, %c0_16, %c0_17, %c1_18, %c0_19] : memref<1x2x4x5x384xbf16, #tpu.memory_space<vmem>>, vector<1x1x4x4x384xbf16>
    %14 = vector.shape_cast %13 : vector<1x1x4x4x384xbf16> to vector<4x4x384xbf16>
    %15 = vector.shape_cast %14 : vector<4x4x384xbf16> to vector<16x384xbf16>
    %c2 = arith.constant 2 : index
    %c0_20 = arith.constant 0 : index
    %c0_21 = arith.constant 0 : index
    %16 = vector.load %arg4[%c2, %c0_20, %c0_21] : memref<3x384x128xbf16, #tpu.memory_space<vmem>>, vector<1x384x128xbf16>
    %17 = vector.shape_cast %16 : vector<1x384x128xbf16> to vector<384x128xbf16>
    %cst_22 = arith.constant dense<0.000000e+00> : vector<16x128xf32>
    %18 = tpu.matmul %15, %17, %cst_22 {dimension_numbers = #tpu.dot_dimension_numbers<[1], [0], [0], [1], [0, 0, 1, 1], [], []>} : vector<16x384xbf16>, vector<384x128xbf16>, vector<16x128xf32> -> vector<16x128xf32>
    %19 = arith.addf %12, %18 : vector<16x128xf32>
    %20 = arith.truncf %19 : vector<16x128xf32> to vector<16x128xbf16>
    %c0_23 = arith.constant 0 : index
    %c0_24 = arith.constant 0 : index
    %c0_25 = arith.constant 0 : index
    %21 = vector.load %arg5[%c0_23, %c0_24, %c0_25] : memref<1x16x128xbf16, #tpu.memory_space<vmem>>, vector<1x16x128xbf16>
    %22 = vector.shape_cast %21 : vector<1x16x128xbf16> to vector<16x128xbf16>
    %23 = vector.shape_cast %20 : vector<16x128xbf16> to vector<1x16x128xbf16>
    tpu.vector_store %arg5[%c0_23, %c0_24, %c0_25], %23 {strides = array<i32>} : memref<1x16x128xbf16, #tpu.memory_space<vmem>>, vector<1x16x128xbf16>,
    %c0_i32 = arith.constant 0 : i32
    %24 = arith.cmpi eq, %arg2, %c0_i32 : i32
    %25 = arith.extui %24 : i1 to i32
    %c0_i32_26 = arith.constant 0 : i32
    %26 = arith.cmpi ne, %25, %c0_i32_26 : i32
    scf.if %26 {
      %cst_35 = arith.constant 0.000000e+00 : f32
      %39 = vector.broadcast %cst_35 : f32 to vector<2x128xf32>
      %c0_36 = arith.constant 0 : index
      %c0_37 = arith.constant 0 : index
      %c0_38 = arith.constant 0 : index
      %40 = vector.load %arg6[%c0_36, %c0_37, %c0_38] : memref<1x2x128xf32, #tpu.memory_space<vmem>>, vector<1x2x128xf32>
      %41 = vector.shape_cast %40 : vector<1x2x128xf32> to vector<2x128xf32>
      %42 = vector.shape_cast %39 : vector<2x128xf32> to vector<1x2x128xf32>
      tpu.vector_store %arg6[%c0_36, %c0_37, %c0_38], %42 {strides = array<i32>} : memref<1x2x128xf32, #tpu.memory_space<vmem>>, vector<1x2x128xf32>,
    } else {
    }
    %c0_27 = arith.constant 0 : index
    %c0_28 = arith.constant 0 : index
    %c0_29 = arith.constant 0 : index
    %27 = vector.load %arg6[%c0_27, %c0_28, %c0_29] : memref<1x2x128xf32, #tpu.memory_space<vmem>>, vector<1x2x128xf32>
    %28 = vector.shape_cast %27 : vector<1x2x128xf32> to vector<2x128xf32>
    %cst_30 = arith.constant dense<0.000000e+00> : vector<128xf32>
    %29 = vector.multi_reduction <add>, %19, %cst_30 [0] : vector<16x128xf32> to vector<128xf32>
    %30 = vector.shape_cast %29 : vector<128xf32> to vector<1x128xf32>
    %31 = arith.mulf %19, %19 : vector<16x128xf32>
    %cst_31 = arith.constant dense<0.000000e+00> : vector<128xf32>
    %32 = vector.multi_reduction <add>, %31, %cst_31 [0] : vector<16x128xf32> to vector<128xf32>
    %33 = vector.shape_cast %32 : vector<128xf32> to vector<1x128xf32>
    %34 = tpu.concatenate %30, %33 in 0 : vector<1x128xf32>, vector<1x128xf32> -> vector<2x128xf32>
    %35 = arith.addf %28, %34 : vector<2x128xf32>
    %c0_32 = arith.constant 0 : index
    %c0_33 = arith.constant 0 : index
    %c0_34 = arith.constant 0 : index
    %36 = vector.load %arg6[%c0_32, %c0_33, %c0_34] : memref<1x2x128xf32, #tpu.memory_space<vmem>>, vector<1x2x128xf32>
    %37 = vector.shape_cast %36 : vector<1x2x128xf32> to vector<2x128xf32>
    %38 = vector.shape_cast %35 : vector<2x128xf32> to vector<1x2x128xf32>
    tpu.vector_store %arg6[%c0_32, %c0_33, %c0_34], %38 {strides = array<i32>} : memref<1x2x128xf32, #tpu.memory_space<vmem>>, vector<1x2x128xf32>,
    return
  }
  func.func @transform_0(%arg0: i32, %arg1: i32, %arg2: i32) -> (i32, i32, i32, i32, i32) {
    %c0_i32 = arith.constant 0 : i32
    %c0_i32_0 = arith.constant 0 : i32
    %c0_i32_1 = arith.constant 0 : i32
    %c0_i32_2 = arith.constant 0 : i32
    return %arg0, %c0_i32, %arg2, %c0_i32_0, %c0_i32_1 : i32, i32, i32, i32, i32
  }
  func.func @transform_1(%arg0: i32, %arg1: i32, %arg2: i32) -> (i32, i32, i32) {
    %c0_i32 = arith.constant 0 : i32
    %c0_i32_0 = arith.constant 0 : i32
    %c0_i32_1 = arith.constant 0 : i32
    return %c0_i32, %c0_i32_0, %arg1 : i32, i32, i32
  }
  func.func @transform_2(%arg0: i32, %arg1: i32, %arg2: i32) -> (i32, i32, i32) {
    %c0_i32 = arith.constant 0 : i32
    return %arg0, %arg2, %arg1 : i32, i32, i32
  }
  func.func @transform_3(%arg0: i32, %arg1: i32, %arg2: i32) -> (i32, i32, i32) {
    %c0_i32 = arith.constant 0 : i32
    %c0_i32_0 = arith.constant 0 : i32
    return %arg0, %c0_i32, %arg1 : i32, i32, i32
  }
}

module attributes {stable_mosaic.version = 11 : i64} {
  func.func @_norm_relu_kernel(%arg0: i32, %arg1: i32, %arg2: memref<1x16x128xbf16, #tpu.memory_space<vmem>>, %arg3: memref<1x2x128xf32, #tpu.memory_space<vmem>>, %arg4: memref<1x16x128xf32, #tpu.memory_space<vmem>>) attributes {dimension_semantics = [#tpu.dimension_semantics<parallel>, #tpu.dimension_semantics<parallel>], iteration_bounds = array<i64: 2, 1>, scalar_prefetch = 0 : i64, scratch_operands = 0 : i64, tpu.core_type = #tpu.core_type<tc>, window_params = [{transform_indices = @transform_0, window_bounds = array<i64: 1, 16, 128>}, {transform_indices = @transform_1, window_bounds = array<i64: 1, 2, 128>}, {transform_indices = @transform_2, window_bounds = array<i64: 1, 16, 128>}]} {
    %c0 = arith.constant 0 : index
    %c0_0 = arith.constant 0 : index
    %c0_1 = arith.constant 0 : index
    %0 = vector.load %arg2[%c0, %c0_0, %c0_1] : memref<1x16x128xbf16, #tpu.memory_space<vmem>>, vector<1x16x128xbf16>
    %1 = vector.shape_cast %0 : vector<1x16x128xbf16> to vector<16x128xbf16>
    %2 = arith.extf %1 : vector<16x128xbf16> to vector<16x128xf32>
    %c0_2 = arith.constant 0 : index
    %c0_3 = arith.constant 0 : index
    %c0_4 = arith.constant 0 : index
    %3 = vector.load %arg3[%c0_2, %c0_3, %c0_4] : memref<1x2x128xf32, #tpu.memory_space<vmem>>, vector<1x2x128xf32>
    %4 = vector.shape_cast %3 : vector<1x2x128xf32> to vector<2x128xf32>
    %5 = vector.extract_strided_slice %4 {offsets = [0, 0], sizes = [1, 128], strides = [1, 1]} : vector<2x128xf32> to vector<1x128xf32>
    %cst = arith.constant 6.250000e-02 : f32
    %6 = vector.broadcast %cst : f32 to vector<1x128xf32>
    %7 = arith.mulf %5, %6 : vector<1x128xf32>
    %8 = vector.extract_strided_slice %4 {offsets = [1, 0], sizes = [1, 128], strides = [1, 1]} : vector<2x128xf32> to vector<1x128xf32>
    %cst_5 = arith.constant 6.250000e-02 : f32
    %9 = vector.broadcast %cst_5 : f32 to vector<1x128xf32>
    %10 = arith.mulf %8, %9 : vector<1x128xf32>
    %11 = arith.mulf %7, %7 : vector<1x128xf32>
    %12 = arith.subf %10, %11 : vector<1x128xf32>
    %cst_6 = arith.constant 0.000000e+00 : f32
    %13 = vector.broadcast %cst_6 : f32 to vector<1x128xf32>
    %14 = arith.maximumf %12, %13 : vector<1x128xf32>
    %cst_7 = arith.constant 9.99999974E-6 : f32
    %15 = vector.broadcast %cst_7 : f32 to vector<1x128xf32>
    %16 = arith.addf %14, %15 : vector<1x128xf32>
    %17 = math.rsqrt %16 : vector<1x128xf32>
    %18 = vector.broadcast %7 : vector<1x128xf32> to vector<16x128xf32>
    %19 = arith.subf %2, %18 : vector<16x128xf32>
    %20 = vector.broadcast %17 : vector<1x128xf32> to vector<16x128xf32>
    %21 = arith.mulf %19, %20 : vector<16x128xf32>
    %cst_8 = arith.constant 0.000000e+00 : f32
    %22 = vector.broadcast %cst_8 : f32 to vector<16x128xf32>
    %23 = arith.maximumf %21, %22 : vector<16x128xf32>
    %c0_9 = arith.constant 0 : index
    %c0_10 = arith.constant 0 : index
    %c0_11 = arith.constant 0 : index
    %24 = vector.load %arg4[%c0_9, %c0_10, %c0_11] : memref<1x16x128xf32, #tpu.memory_space<vmem>>, vector<1x16x128xf32>
    %25 = vector.shape_cast %24 : vector<1x16x128xf32> to vector<16x128xf32>
    %26 = vector.shape_cast %23 : vector<16x128xf32> to vector<1x16x128xf32>
    tpu.vector_store %arg4[%c0_9, %c0_10, %c0_11], %26 {strides = array<i32>} : memref<1x16x128xf32, #tpu.memory_space<vmem>>, vector<1x16x128xf32>,
    return
  }
  func.func @transform_0(%arg0: i32, %arg1: i32) -> (i32, i32, i32) {
    %c0_i32 = arith.constant 0 : i32
    %c0_i32_0 = arith.constant 0 : i32
    return %arg0, %arg1, %c0_i32 : i32, i32, i32
  }
  func.func @transform_1(%arg0: i32, %arg1: i32) -> (i32, i32, i32) {
    %c0_i32 = arith.constant 0 : i32
    %c0_i32_0 = arith.constant 0 : i32
    %c0_i32_1 = arith.constant 0 : i32
    return %arg0, %c0_i32, %c0_i32_0 : i32, i32, i32
  }
  func.func @transform_2(%arg0: i32, %arg1: i32) -> (i32, i32, i32) {
    %c0_i32 = arith.constant 0 : i32
    %c0_i32_0 = arith.constant 0 : i32
    return %arg0, %arg1, %c0_i32 : i32, i32, i32
  }
}

</mosaic_0001>

<bundles_post_ra>
// kernel: downsample_block.7
= control target key start
LH: loop header
LB: loop body
LE: loop exit
PB: predicated region body
PF: predicated region fallthrough
CT: control target
= control target key end

     0   :  { %s954_s9 = smov 0   ;;  %s956_s10 = smov 0   ;;  %s1180_s0 = inlined_call_operand.vmem [shape: bf16[2,256,128], index: 0, kind: input, shape index: {}]   ;;  %s1181_s1 = inlined_call_operand.vmem [shape: f32[2,2,128], index: 1, kind: input, shape index: {}]   ;;  %s1182_s2 = inlined_call_operand.vmem [shape: bf16[2,256,128], index: 2, kind: output, shape index: {}]  }
   0x1   :  { %s958_s11 = smov 0  }
   0x2 LB: > { %s24_s12 = sadd.s32 1, %s933_s10  ;;  %p641_p0 = scmp.ge.s32.totalorder %s937_s11, 1  ;;  %s937_s11 = sphi %s958_s11, %s12_s11   ;;  %s933_s10 = sphi %s956_s10, %s1184_s10   ;;  %s929_s9 = sphi %s954_s9, %s1183_s9  }
   0x3   : > { %p26_p1 = scmp.ge.s32.totalorder %s24_s12, 2  ;;  %p142_p2 = scmp.lt.s32.totalorder %s937_s11, 3 }
   0x5   : > { %s1186_s12 = smov (%p26_p1, %s24_s12), 0  ;;  %p143_p3 = pnand %p641_p0, %p142_p2 }
   0x6   : > { %p177_p4 = scmp.lt.s32.totalorder (!%p143_p3), %s929_s9, 1  ;;  %v274_v0 = vlaneseq (!%p143_p3) }
   0x7   : > { %146 = sbr.rel (%p143_p3) target bundleno = 67 (0x43), region = 28 }
   0x8   : > { %v979_v2 = vshrl.u32 (!%p143_p3), %v274_v0, 7 }
   0xa   : > { %v276_v5 = vsub.s32 (!%p143_p3), 0, %v979_v2  ;;  %v312_v17 = vsub.s32 (!%p143_p3), 1, %v979_v2 }
   0xe   : > { %s1188_s9 = smov (!%p177_p4, %s929_s9), 1 }
   0xf   : > { %s644_s13 = sshll.u32 %s1188_s9, 1  ;;  %s681_s14 = sshll.u32 %s1188_s9, 7 }
  0x10   : > { %s189_s17 = scalar_lea.vmem %s1181_s1, %s644_s13  ;;  %s986_s20 = scalar_lea.vmem %s1180_s0, %s681_s14 }
  0x11   : > { %v264_v1 = vld [vmem:[%s189_s17] sm:$0x3]  ;;  %v859_v8 = vld [vmem:[%s986_s20 + $0x8] sm:$0xff]   ;;  %v860_v10 = vld [vmem:[%s986_s20 + $0x10] sm:$0xff]   ;;  %s1106_s23 = scalar_lea.vmem %s1182_s2, %s681_s14 }
  0x12   : > { %v265_v3 = vmul.f32 0.00390625, %v264_v1  ;;  %v716_v6 = vld [vmem:[%s986_s20] sm:$0xff]   ;;  %v861_v11 = vld [vmem:[%s986_s20 + $0x18] sm:$0xff]   ;;  %v721_v18 = vunpack.c.l.bf16 %v859_v8  ;;  %v863_v19 = vld [vmem:[%s986_s20 + $0x28] sm:$0xff]   ;;  %v722_v21 = vunpack.c.h.bf16 %v859_v8  ;;  %v725_v22 = vunpack.c.l.bf16 %v860_v10 }
  0x13   : > { %v717_v12 = vunpack.c.l.bf16 %v716_v6  ;;  %v862_v14 = vld [vmem:[%s986_s20 + $0x20] sm:$0xff]   ;;  %v718_v15 = vunpack.c.h.bf16 %v716_v6  ;;  %v864_v20 = vld [vmem:[%s986_s20 + $0x30] sm:$0xff]   ;;  %v726_v23 = vunpack.c.h.bf16 %v860_v10  ;;  %v729_v24 = vunpack.c.l.bf16 %v861_v11  ;;  %v865_v29 = vld [vmem:[%s986_s20 + $0x38] sm:$0xff]  }
  0x14   : > { %v266_v4 = vmul.f32 %v265_v3, %v265_v3  ;;  %v993_v13 = vrot.slane %v265_v3, %v276_v5  ;;  %v730_v26 = vunpack.c.h.bf16 %v861_v11  ;;  %v733_v27 = vunpack.c.l.bf16 %v862_v14  ;;  %v866_v37 = vld [vmem:[%s986_s20 + $0x40] sm:$0xff]   ;;  %v867_v42 = vld [vmem:[%s986_s20 + $0x48] sm:$0xff]   ;;  %v868_v47 = vld [vmem:[%s986_s20 + $0x50] sm:$0xff]  }
  0x15   : > { %v734_v28 = vunpack.c.h.bf16 %v862_v14  ;;  %v737_v31 = vunpack.c.l.bf16 %v863_v19  ;;  %v738_v32 = vunpack.c.h.bf16 %v863_v19  ;;  %v741_v33 = vunpack.c.l.bf16 %v864_v20  ;;  %v869_v52 = vld [vmem:[%s986_s20 + $0x58] sm:$0xff]   ;;  %v870_v53 = vld [vmem:[%s986_s20 + $0x60] sm:$0xff]   ;;  %v871_v58 = vld [vmem:[%s986_s20 + $0x68] sm:$0xff]  }
  0x16   : > { %v268_v7 = vrot.slane %v266_v4, 7  ;;  %v1001_v30 = vsub.f32 %v717_v12, %v993_v13  ;;  %v279_v34 = vsub.f32 %v718_v15, %v993_v13  ;;  %v280_v35 = vsub.f32 %v721_v18, %v993_v13  ;;  %v872_v63 = vld [vmem:[%s986_s20 + $0x70] sm:$0xff]   ;;  %v873_v0 = vld [vmem:[%s986_s20 + $0x78] sm:$0xff]  }
  0x17   : > { %v742_v36 = vunpack.c.h.bf16 %v864_v20  ;;  %v281_v38 = vsub.f32 %v722_v21, %v993_v13  ;;  %v282_v39 = vsub.f32 %v725_v22, %v993_v13  ;;  %v745_v40 = vunpack.c.l.bf16 %v865_v29 }
  0x18   : > { %v270_v9 = vsub.f32 %v265_v3, %v268_v7  ;;  %v746_v41 = vunpack.c.h.bf16 %v865_v29  ;;  %v283_v43 = vsub.f32 %v726_v23, %v993_v13  ;;  %v284_v44 = vsub.f32 %v729_v24, %v993_v13 }
  0x19   : > { %v285_v45 = vsub.f32 %v730_v26, %v993_v13  ;;  %v1013_v46 = vsub.f32 %v733_v27, %v993_v13  ;;  %v1017_v48 = vsub.f32 %v734_v28, %v993_v13  ;;  %v1020_v49 = vsub.f32 %v737_v31, %v993_v13 }
  0x1a   : > { %v271_v16 = vmax.f32 %v270_v9, 0.0  ;;  %v1023_v50 = vsub.f32 %v738_v32, %v993_v13  ;;  %v749_v51 = vunpack.c.l.bf16 %v866_v37  ;;  %v1028_v54 = vsub.f32 %v741_v33, %v993_v13 }
  0x1b   : > { %v1031_v55 = vsub.f32 %v742_v36, %v993_v13  ;;  %v750_v56 = vunpack.c.h.bf16 %v866_v37  ;;  %v753_v57 = vunpack.c.l.bf16 %v867_v42  ;;  %v1035_v59 = vsub.f32 %v745_v40, %v993_v13 }
  0x1c   : > { %v272_v25 = vadd.f32 1e-05, %v271_v16  ;;  %v1038_v60 = vsub.f32 %v746_v41, %v993_v13  ;;  %v754_v61 = vunpack.c.h.bf16 %v867_v42  ;;  %v757_v62 = vunpack.c.l.bf16 %v868_v47 }
  0x1d   : > { %v758_v1 = vunpack.c.h.bf16 %v868_v47  ;;  %v761_v3 = vunpack.c.l.bf16 %v869_v52  ;;  %v762_v4 = vunpack.c.h.bf16 %v869_v52  ;;  %v765_v5 = vunpack.c.l.bf16 %v870_v53 }
  0x1e   : > { %913 = vrsqrt.f32 %v272_v25  ;;  %v1043_v6 = vsub.f32 %v749_v51, %v993_v13  ;;  %v766_v7 = vunpack.c.h.bf16 %v870_v53  ;;  %v769_v8 = vunpack.c.l.bf16 %v871_v58 }
  0x1f   : > { %v770_v9 = vunpack.c.h.bf16 %v871_v58  ;;  %v773_v10 = vunpack.c.l.bf16 %v872_v63  ;;  %v774_v11 = vunpack.c.h.bf16 %v872_v63  ;;  %v777_v12 = vunpack.c.l.bf16 %v873_v0 }
  0x20   : > { %v778_v14 = vunpack.c.h.bf16 %v873_v0  ;;  %v295_v15 = vsub.f32 %v750_v56, %v993_v13  ;;  %v1047_v16 = vsub.f32 %v753_v57, %v993_v13  ;;  %v1050_v18 = vsub.f32 %v754_v61, %v993_v13 }
  0x21   : > { %v1053_v19 = vsub.f32 %v757_v62, %v993_v13  ;;  %v1056_v21 = vsub.f32 %v758_v1, %v993_v13  ;;  %v1059_v22 = vsub.f32 %v761_v3, %v993_v13  ;;  %v1062_v23 = vsub.f32 %v762_v4, %v993_v13 }
  0x22   : > { %v1065_v24 = vsub.f32 %v765_v5, %v993_v13  ;;  %v1072_v26 = vsub.f32 %v766_v7, %v993_v13  ;;  %v1075_v27 = vsub.f32 %v769_v8, %v993_v13  ;;  %v1078_v28 = vsub.f32 %v770_v9, %v993_v13 }
  0x23   : > { %v1081_v29 = vsub.f32 %v773_v10, %v993_v13  ;;  %v1084_v31 = vsub.f32 %v774_v11, %v993_v13  ;;  %v1087_v2 = vsub.f32 %v777_v12, %v993_v13 }
  0x28   : > { %v914_v20 = vpop.eup %913 }
  0x29   : > { %v1069_v25 = vrot.slane %v914_v20, %v312_v17  ;;  %v1090_v17 = vsub.f32 %v778_v14, %v993_v13 }
  0x2b   : > { %v314_v32 = vmul.f32 %v1069_v25, %v1001_v30  ;;  %v315_v33 = vmul.f32 %v1069_v25, %v279_v34  ;;  %v316_v36 = vmul.f32 %v1069_v25, %v280_v35  ;;  %v317_v37 = vmul.f32 %v1069_v25, %v281_v38 }
  0x2c   : > { %v318_v40 = vmul.f32 %v1069_v25, %v282_v39  ;;  %v319_v41 = vmul.f32 %v1069_v25, %v283_v43  ;;  %v320_v42 = vmul.f32 %v1069_v25, %v284_v44  ;;  %v321_v47 = vmul.f32 %v1069_v25, %v285_v45 }
  0x2d   : > { %v346_v51 = vmax.f32 %v314_v32, 0.0  ;;  %v347_v13 = vmax.f32 %v315_v33, 0.0  ;;  %v348_v52 = vmax.f32 %v316_v36, 0.0  ;;  %v349_v53 = vmax.f32 %v317_v37, 0.0 }
  0x2e   : > { %v350_v30 = vmax.f32 %v318_v40, 0.0  ;;  %v351_v34 = vmax.f32 %v319_v41, 0.0  ;;  %v352_v35 = vmax.f32 %v320_v42, 0.0  ;;  %v353_v38 = vmax.f32 %v321_v47, 0.0 }
  0x2f   : > { %v782_v39 = vpack.c.bf16 %v347_v13, %v346_v51  ;;  %v787_v43 = vpack.c.bf16 %v349_v53, %v348_v52  ;;  %v322_v44 = vmul.f32 %v1069_v25, %v1013_v46  ;;  %v323_v45 = vmul.f32 %v1069_v25, %v1017_v48 }
  0x30   : > { %v792_v56 = vpack.c.bf16 %v351_v34, %v350_v30  ;;  %v797_v57 = vpack.c.bf16 %v353_v38, %v352_v35  ;;  %v324_v58 = vmul.f32 %v1069_v25, %v1020_v49  ;;  %v325_v61 = vmul.f32 %v1069_v25, %v1023_v50 }
  0x31   : > { %783 = vst [vmem:[%s1106_s23] sm:$0xff] %v782_v39   ;;  %874 = vst [vmem:[%s1106_s23 + $0x8] sm:$0xff] %v787_v43   ;;  %v354_v62 = vmax.f32 %v322_v44, 0.0  ;;  %v355_v63 = vmax.f32 %v323_v45, 0.0  ;;  %v326_v0 = vmul.f32 %v1069_v25, %v1028_v54  ;;  %v327_v46 = vmul.f32 %v1069_v25, %v1031_v55 }
  0x32   : > { %875 = vst [vmem:[%s1106_s23 + $0x10] sm:$0xff] %v792_v56   ;;  %876 = vst [vmem:[%s1106_s23 + $0x18] sm:$0xff] %v797_v57   ;;  %v356_v48 = vmax.f32 %v324_v58, 0.0  ;;  %v357_v1 = vmax.f32 %v325_v61, 0.0  ;;  %v328_v49 = vmul.f32 %v1069_v25, %v1035_v59  ;;  %v329_v50 = vmul.f32 %v1069_v25, %v1038_v60 }
  0x33   : > { %v802_v3 = vpack.c.bf16 %v355_v63, %v354_v62  ;;  %v358_v4 = vmax.f32 %v326_v0, 0.0  ;;  %v359_v5 = vmax.f32 %v327_v46, 0.0  ;;  %v330_v54 = vmul.f32 %v1069_v25, %v1043_v6 }
  0x34   : > { %v807_v7 = vpack.c.bf16 %v357_v1, %v356_v48  ;;  %v360_v55 = vmax.f32 %v328_v49, 0.0  ;;  %v361_v8 = vmax.f32 %v329_v50, 0.0  ;;  %v331_v9 = vmul.f32 %v1069_v25, %v295_v15 }
  0x35   : > { %877 = vst [vmem:[%s1106_s23 + $0x20] sm:$0xff] %v802_v3   ;;  %v812_v10 = vpack.c.bf16 %v359_v5, %v358_v4  ;;  %v362_v11 = vmax.f32 %v330_v54, 0.0  ;;  %v332_v59 = vmul.f32 %v1069_v25, %v1047_v16  ;;  %v333_v60 = vmul.f32 %v1069_v25, %v1050_v18 }
  0x36   : > { %878 = vst [vmem:[%s1106_s23 + $0x28] sm:$0xff] %v807_v7   ;;  %v817_v12 = vpack.c.bf16 %v361_v8, %v360_v55  ;;  %v363_v14 = vmax.f32 %v331_v9, 0.0  ;;  %v334_v6 = vmul.f32 %v1069_v25, %v1053_v19  ;;  %v335_v15 = vmul.f32 %v1069_v25, %v1056_v21 }
  0x37   : > { %879 = vst [vmem:[%s1106_s23 + $0x30] sm:$0xff] %v812_v10   ;;  %v364_v20 = vmax.f32 %v332_v59, 0.0  ;;  %v365_v32 = vmax.f32 %v333_v60, 0.0  ;;  %v336_v33 = vmul.f32 %v1069_v25, %v1059_v22  ;;  %v337_v16 = vmul.f32 %v1069_v25, %v1062_v23 }
  0x38   : > { %880 = vst [vmem:[%s1106_s23 + $0x38] sm:$0xff] %v817_v12   ;;  %v822_v18 = vpack.c.bf16 %v363_v14, %v362_v11  ;;  %v366_v36 = vmax.f32 %v334_v6, 0.0  ;;  %v367_v37 = vmax.f32 %v335_v15, 0.0  ;;  %v338_v19 = vmul.f32 %v1069_v25, %v1065_v24 }
  0x39   : > { %v827_v40 = vpack.c.bf16 %v365_v32, %v364_v20  ;;  %v368_v21 = vmax.f32 %v336_v33, 0.0  ;;  %v369_v41 = vmax.f32 %v337_v16, 0.0  ;;  %v339_v42 = vmul.f32 %v1069_v25, %v1072_v26 }
  0x3a   : > { %881 = vst [vmem:[%s1106_s23 + $0x40] sm:$0xff] %v822_v18   ;;  %v832_v22 = vpack.c.bf16 %v367_v37, %v366_v36  ;;  %v370_v47 = vmax.f32 %v338_v19, 0.0  ;;  %v340_v23 = vmul.f32 %v1069_v25, %v1075_v27  ;;  %v341_v51 = vmul.f32 %v1069_v25, %v1078_v28 }
  0x3b   : > { %882 = vst [vmem:[%s1106_s23 + $0x48] sm:$0xff] %v827_v40   ;;  %v837_v13 = vpack.c.bf16 %v369_v41, %v368_v21  ;;  %v371_v24 = vmax.f32 %v339_v42, 0.0  ;;  %v342_v52 = vmul.f32 %v1069_v25, %v1081_v29  ;;  %v343_v26 = vmul.f32 %v1069_v25, %v1084_v31 }
  0x3c   : > { %883 = vst [vmem:[%s1106_s23 + $0x50] sm:$0xff] %v832_v22   ;;  %v372_v53 = vmax.f32 %v340_v23, 0.0  ;;  %v373_v30 = vmax.f32 %v341_v51, 0.0  ;;  %v344_v27 = vmul.f32 %v1069_v25, %v1087_v2  ;;  %v345_v28 = vmul.f32 %v1069_v25, %v1090_v17 }
  0x3d   : > { %884 = vst [vmem:[%s1106_s23 + $0x58] sm:$0xff] %v837_v13   ;;  %v842_v34 = vpack.c.bf16 %v371_v24, %v370_v47  ;;  %v374_v35 = vmax.f32 %v342_v52, 0.0  ;;  %v375_v38 = vmax.f32 %v343_v26, 0.0 }
  0x3e   : > { %v847_v29 = vpack.c.bf16 %v373_v30, %v372_v53  ;;  %v376_v39 = vmax.f32 %v344_v27, 0.0  ;;  %v377_v43 = vmax.f32 %v345_v28, 0.0 }
  0x3f   : > { %885 = vst [vmem:[%s1106_s23 + $0x60] sm:$0xff] %v842_v34   ;;  %v852_v31 = vpack.c.bf16 %v375_v38, %v374_v35 }
  0x40   : > { %886 = vst [vmem:[%s1106_s23 + $0x68] sm:$0xff] %v847_v29   ;;  %v857_v44 = vpack.c.bf16 %v377_v43, %v376_v39 }
  0x41   : > { %887 = vst [vmem:[%s1106_s23 + $0x70] sm:$0xff] %v852_v31  }
  0x42   : > { %888 = vst [vmem:[%s1106_s23 + $0x78] sm:$0xff] %v857_v44  }
  0x43 PF: > { %s12_s11 = sadd.s32 1, %s937_s11   ;;  %s1183_s9 = smov %s933_s10 }
  0x44   : > { %p9_p5 = scmp.ge.s32.totalorder %s12_s11, 4   ;;  %s1184_s10 = smov %s1186_s12 }
  0x46   :  { %11 = sbr.rel (!%p9_p5) target bundleno = 2 (0x2), region = 61 }

// kernel: downsample_block.6
= control target key start
LH: loop header
LB: loop body
LE: loop exit
PB: predicated region body
PF: predicated region fallthrough
CT: control target
= control target key end

     0   :  { %s1552_s12 = smov 0   ;;  %s1554_s13 = smov 0   ;;  %s1782_s0 = inlined_call_operand.vmem [shape: bf16[2,1,16,16,147], index: 0, kind: input, shape index: {}]   ;;  %s1783_s1 = inlined_call_operand.vmem [shape: bf16[1,147,128], index: 1, kind: input, shape index: {}]   ;;  %s1784_s2 = inlined_call_operand.vmem [shape: bf16[2,256,128], index: 2, kind: output, shape index: {0}]   ;;  %s1785_s3 = inlined_call_operand.vmem [shape: f32[2,2,128], index: 3, kind: output, shape index: {1}]  }
   0x1   :  { %s1556_s14 = smov 0  }
   0x2 LB: > { %s33_s15 = sadd.s32 1, %s1523_s13  ;;  %p1173_p0 = scmp.ge.s32.totalorder %s1527_s14, 1  ;;  %s1527_s14 = sphi %s1556_s14, %s14_s14   ;;  %s1523_s13 = sphi %s1554_s13, %s1787_s13   ;;  %s1519_s12 = sphi %s1552_s12, %s1786_s12  }
   0x3   : > { %p35_p1 = scmp.ge.s32.totalorder %s33_s15, 2  ;;  %p182_p2 = scmp.lt.s32.totalorder %s1527_s14, 3 }
   0x5   : > { %s1789_s15 = smov (%p35_p1, %s33_s15), 0  ;;  %p183_p3 = pnand %p1173_p0, %p182_p2 }
   0x6   : > { %v1447_v0 = vld [vmem:[%s1783_s1] sm:$0xff] (!%p183_p3)   ;;  %v1529_v1 = vmov (!%p183_p3), 0   ;;  %v1448_v2 = vld [vmem:[%s1783_s1 + $0x8] sm:$0xff] (!%p183_p3)   ;;  %v1449_v3 = vld [vmem:[%s1783_s1 + $0x10] sm:$0xff] (!%p183_p3)   ;;  %p230_p4 = scmp.lt.s32.totalorder (!%p183_p3), %s1519_s12, 1  ;;  %vm517_vm0 = vcmask (!%p183_p3), 154624  }
   0x7   : > { %186 = sbr.rel (%p183_p3) target bundleno = 369 (0x171), region = 28  ;;  %573 = vmatprep.subr.bf16.mxu0 (!%p183_p3), %v1529_v1  ;;  %1400 = vmatprep.subr.bf16.mxu1 (!%p183_p3), %v1529_v1  ;;  %v1450_v4 = vld [vmem:[%s1783_s1 + $0x18] sm:$0xff] (!%p183_p3)   ;;  %v1451_v6 = vld [vmem:[%s1783_s1 + $0x20] sm:$0xff] (!%p183_p3)   ;;  %v1452_v7 = vld [vmem:[%s1783_s1 + $0x28] sm:$0xff] (!%p183_p3)   ;;  %vm566_vm1 = vcmask (!%p183_p3), 1040384   ;;  %vm567_vm2 = vcmask (!%p183_p3), 1041408  }
   0x8   : > { %574 = vmatpush1.bf16.msra.mxu0 (!%p183_p3), %v1447_v0  ;;  %1410 = vmatpush1.bf16.msra.mxu1 (!%p183_p3), %v1447_v0  ;;  %v1453_v9 = vld [vmem:[%s1783_s1 + $0x30] sm:$0xff] (!%p183_p3)   ;;  %v1454_v10 = vld [vmem:[%s1783_s1 + $0x38] sm:$0xff] (!%p183_p3)   ;;  %v1530_v11 = vmov (!%p183_p3), 65535   ;;  %v1455_v13 = vld [vmem:[%s1783_s1 + $0x40] sm:$0xff] (!%p183_p3)   ;;  %v1531_v47 = vmov (!%p183_p3), 0.0  }
   0x9   : > { %575 = vmatprep.subr.bf16.mxu0 (!%p183_p3), %v1529_v1  ;;  %1401 = vmatprep.subr.bf16.mxu1 (!%p183_p3), %v1529_v1  ;;  %v568_v12 = vsel (!%p183_p3), %vm566_vm1, 4294967295, %v1530_v11  ;;  %v1456_v14 = vld [vmem:[%s1783_s1 + $0x48] ss:$0 sps:$4 sm:$0x33] (!%p183_p3)  }
   0xa   : > { %v569_v15 = vsel (!%p183_p3), %vm567_vm2, %v568_v12, 0 }
   0xb   : > { %v571_v16 = vand.u32 (!%p183_p3), %v1456_v14, %v569_v15 }
   0xc   : > { %576 = vmatpush1.bf16.msra.mxu0 (!%p183_p3), %v1448_v2  ;;  %1411 = vmatpush1.bf16.msra.mxu1 (!%p183_p3), %v1448_v2 }
   0xd   : > { %577 = vmatprep.subr.bf16.mxu0 (!%p183_p3), %v1529_v1  ;;  %1402 = vmatprep.subr.bf16.mxu1 (!%p183_p3), %v1529_v1 }
   0xe   : > { %s1791_s12 = smov (!%p230_p4, %s1519_s12), 1 }
   0xf   : > { %s1271_s24 = sshll.u32 %s1791_s12, 8  ;;  %s1178_s17 = sshll.u32 %s1791_s12, 1 }
  0x10   : > { %578 = vmatpush1.bf16.msra.mxu0 %v1449_v3  ;;  %1412 = vmatpush1.bf16.msra.mxu1 %v1449_v3  ;;  %s1588_s27 = scalar_lea.vmem %s1782_s0, %s1271_s24  ;;  %s1661_s20 = scalar_lea.vmem %s1785_s3, %s1178_s17 }
  0x11   : > { %579 = vmatprep.subr.bf16.mxu0 %v1529_v1  ;;  %1403 = vmatprep.subr.bf16.mxu1 %v1529_v1  ;;  %v1459_v5 = vld [vmem:[%s1588_s27 + $0x4] ss:$8 sps:$4 sm:$0xff]   ;;  %v1457_v17 = vld [vmem:[%s1588_s27] ss:$8 sps:$4 sm:$0xff]   ;;  %v1460_v19 = vld [vmem:[%s1588_s27 + $0x14] ss:$8 sps:$4 sm:$0xff]  }
  0x12   : > { %1221 = vmatprep.mubr.msk.bf16.mxu0 %vm517_vm0, %v1459_v5  ;;  %v1471_v8 = vld [vmem:[%s1588_s27 + $0x84] ss:$8 sps:$4 sm:$0xff]   ;;  %v1469_v18 = vld [vmem:[%s1588_s27 + $0x80] ss:$8 sps:$4 sm:$0xff]   ;;  %v1475_v20 = vld [vmem:[%s1588_s27 + $0x94] ss:$8 sps:$4 sm:$0xff]  }
  0x13   : > { %1229 = vmatprep.mubr.msk.bf16.mxu1 %vm517_vm0, %v1471_v8  ;;  %v1462_v21 = vld [vmem:[%s1588_s27 + $0x10] ss:$8 sps:$4 sm:$0xff]   ;;  %v1463_v23 = vld [vmem:[%s1588_s27 + $0x24] ss:$8 sps:$4 sm:$0xff]   ;;  %v1465_v25 = vld [vmem:[%s1588_s27 + $0x20] ss:$8 sps:$4 sm:$0xff]  }
  0x14   : > { %580 = vmatpush1.bf16.msra.mxu0 %v1450_v4  ;;  %1413 = vmatpush1.bf16.msra.mxu1 %v1450_v4  ;;  %v1477_v22 = vld [vmem:[%s1588_s27 + $0x90] ss:$8 sps:$4 sm:$0xff]   ;;  %v1481_v24 = vld [vmem:[%s1588_s27 + $0xa4] ss:$8 sps:$4 sm:$0xff]   ;;  %v1483_v26 = vld [vmem:[%s1588_s27 + $0xa0] ss:$8 sps:$4 sm:$0xff]  }
  0x15   : > { %581 = vmatprep.subr.bf16.mxu0 %v1529_v1  ;;  %1404 = vmatprep.subr.bf16.mxu1 %v1529_v1  ;;  %v1466_v27 = vld [vmem:[%s1588_s27 + $0x34] ss:$8 sps:$4 sm:$0xff]   ;;  %v1468_v29 = vld [vmem:[%s1588_s27 + $0x30] ss:$8 sps:$4 sm:$0xff]   ;;  %v1472_v31 = vld [vmem:[%s1588_s27 + $0x44] ss:$8 sps:$4 sm:$0xff]  }
  0x16   : > { %v1487_v28 = vld [vmem:[%s1588_s27 + $0xb4] ss:$8 sps:$4 sm:$0xff]   ;;  %v1489_v30 = vld [vmem:[%s1588_s27 + $0xb0] ss:$8 sps:$4 sm:$0xff]   ;;  %v1493_v32 = vld [vmem:[%s1588_s27 + $0xc4] ss:$8 sps:$4 sm:$0xff]  }
  0x17   : > { %v1474_v33 = vld [vmem:[%s1588_s27 + $0x40] ss:$8 sps:$4 sm:$0xff]   ;;  %v1478_v35 = vld [vmem:[%s1588_s27 + $0x54] ss:$8 sps:$4 sm:$0xff]   ;;  %v1480_v37 = vld [vmem:[%s1588_s27 + $0x50] ss:$8 sps:$4 sm:$0xff]  }
  0x18   : > { %582 = vmatpush1.bf16.msra.mxu0 %v1451_v6  ;;  %1414 = vmatpush1.bf16.msra.mxu1 %v1451_v6  ;;  %v1495_v34 = vld [vmem:[%s1588_s27 + $0xc0] ss:$8 sps:$4 sm:$0xff]   ;;  %v1496_v36 = vld [vmem:[%s1588_s27 + $0xd4] ss:$8 sps:$4 sm:$0xff]   ;;  %v1498_v38 = vld [vmem:[%s1588_s27 + $0xd0] ss:$8 sps:$4 sm:$0xff]  }
  0x19   : > { %583 = vmatprep.subr.bf16.mxu0 %v1529_v1  ;;  %1405 = vmatprep.subr.bf16.mxu1 %v1529_v1  ;;  %v1484_v39 = vld [vmem:[%s1588_s27 + $0x64] ss:$8 sps:$4 sm:$0xff]   ;;  %v1486_v41 = vld [vmem:[%s1588_s27 + $0x60] ss:$8 sps:$4 sm:$0xff]   ;;  %v1490_v43 = vld [vmem:[%s1588_s27 + $0x74] ss:$8 sps:$4 sm:$0xff]  }
  0x1a   : > { %v1499_v40 = vld [vmem:[%s1588_s27 + $0xe4] ss:$8 sps:$4 sm:$0xff]   ;;  %v1501_v42 = vld [vmem:[%s1588_s27 + $0xe0] ss:$8 sps:$4 sm:$0xff]   ;;  %v1502_v44 = vld [vmem:[%s1588_s27 + $0xf4] ss:$8 sps:$4 sm:$0xff]  }
  0x1b   : > { %v1492_v45 = vld [vmem:[%s1588_s27 + $0x70] ss:$8 sps:$4 sm:$0xff]   ;;  %898 = vst [vmem:[%s1661_s20] sm:$0x3] %v1531_v47  ;;  %s1272_s21 = sshll.u32 %s1791_s12, 7 }
  0x1c   : > { %584 = vmatpush1.bf16.msra.mxu0 %v1452_v7  ;;  %1415 = vmatpush1.bf16.msra.mxu1 %v1452_v7  ;;  %v1504_v46 = vld [vmem:[%s1588_s27 + $0xf0] ss:$8 sps:$4 sm:$0xff]   ;;  %s1670_s24 = scalar_lea.vmem %s1784_s2, %s1272_s21 }
  0x1d   : > { %585 = vmatprep.subr.bf16.mxu0 %v1529_v1  ;;  %1406 = vmatprep.subr.bf16.mxu1 %v1529_v1 }
  0x20   : > { %586 = vmatpush1.bf16.msra.mxu0 %v1453_v9  ;;  %1416 = vmatpush1.bf16.msra.mxu1 %v1453_v9 }
  0x21   : > { %587 = vmatprep.subr.bf16.mxu0 %v1529_v1  ;;  %1407 = vmatprep.subr.bf16.mxu1 %v1529_v1 }
  0x24   : > { %588 = vmatpush1.bf16.msra.mxu0 %v1454_v10  ;;  %1417 = vmatpush1.bf16.msra.mxu1 %v1454_v10 }
  0x25   : > { %589 = vmatprep.subr.bf16.mxu0 %v1529_v1  ;;  %1408 = vmatprep.subr.bf16.mxu1 %v1529_v1 }
  0x28   : > { %590 = vmatpush1.bf16.msra.mxu0 %v1455_v13  ;;  %1418 = vmatpush1.bf16.msra.mxu1 %v1455_v13 }
  0x29   : > { %591 = vmatprep.subr.bf16.mxu0 %v1529_v1  ;;  %1409 = vmatprep.subr.bf16.mxu1 %v1529_v1 }
  0x2c   : > { %592 = vmatpush1.bf16.msra.mxu0 %v571_v16  ;;  %1419 = vmatpush1.bf16.msra.mxu1 %v571_v16 }
  0x2f   : > { %606 = vmatmul.mubr.bf16.vlgmr.msra.gmra.mrb[0].mxu0 %v1457_v17  ;;  %670 = vmatmul.mubr.bf16.vlgmr.msra.gmra.mrb[0].mxu1 %v1469_v18 }
  0x30   : > { %1222 = vmatprep.mubr.msk.bf16.mxu0 %vm517_vm0, %v1460_v19  ;;  %1230 = vmatprep.mubr.msk.bf16.mxu1 %vm517_vm0, %v1475_v20 }
  0x37   : > { %614 = vmatmul.mubr.bf16.gmra.mrb[4].mxu0 %v1462_v21  ;;  %678 = vmatmul.mubr.bf16.gmra.mrb[4].mxu1 %v1477_v22 }
  0x38   : > { %1223 = vmatprep.mubr.msk.bf16.mxu0 %vm517_vm0, %v1463_v23  ;;  %1231 = vmatprep.mubr.msk.bf16.mxu1 %vm517_vm0, %v1481_v24 }
  0x3f   : > { %622 = vmatmul.mubr.bf16.gmra.mrb[8].mxu0 %v1465_v25  ;;  %686 = vmatmul.mubr.bf16.gmra.mrb[8].mxu1 %v1483_v26 }
  0x40   : > { %1224 = vmatprep.mubr.msk.bf16.mxu0 %vm517_vm0, %v1466_v27  ;;  %1232 = vmatprep.mubr.msk.bf16.mxu1 %vm517_vm0, %v1487_v28 }
  0x47   : > { %630 = vmatmul.mubr.bf16.gmra.mrb[12].mxu0 %v1468_v29  ;;  %694 = vmatmul.mubr.bf16.gmra.mrb[12].mxu1 %v1489_v30 }
  0x48   : > { %1225 = vmatprep.mubr.msk.bf16.mxu0 %vm517_vm0, %v1472_v31  ;;  %1233 = vmatprep.mubr.msk.bf16.mxu1 %vm517_vm0, %v1493_v32 }
  0x4f   : > { %638 = vmatmul.mubr.bf16.gmra.mrb[16].mxu0 %v1474_v33  ;;  %702 = vmatmul.mubr.bf16.gmra.mrb[16].mxu1 %v1495_v34 }
  0x50   : > { %1226 = vmatprep.mubr.msk.bf16.mxu0 %vm517_vm0, %v1478_v35  ;;  %1234 = vmatprep.mubr.msk.bf16.mxu1 %vm517_vm0, %v1496_v36 }
  0x57   : > { %646 = vmatmul.mubr.bf16.gmra.mrb[20].mxu0 %v1480_v37  ;;  %710 = vmatmul.mubr.bf16.gmra.mrb[20].mxu1 %v1498_v38 }
  0x58   : > { %1227 = vmatprep.mubr.msk.bf16.mxu0 %vm517_vm0, %v1484_v39  ;;  %1235 = vmatprep.mubr.msk.bf16.mxu1 %vm517_vm0, %v1499_v40 }
  0x5f   : > { %654 = vmatmul.mubr.bf16.gmra.mrb[24].mxu0 %v1486_v41  ;;  %718 = vmatmul.mubr.bf16.gmra.mrb[24].mxu1 %v1501_v42 }
  0x60   : > { %1228 = vmatprep.mubr.msk.bf16.mxu0 %vm517_vm0, %v1490_v43  ;;  %1236 = vmatprep.mubr.msk.bf16.mxu1 %vm517_vm0, %v1502_v44 }
  0x67   : > { %662 = vmatmul.mubr.bf16.gmra.mrb[28].mxu0 %v1492_v45  ;;  %726 = vmatmul.mubr.bf16.gmra.mrb[28].mxu1 %v1504_v46 }
 0x102   : > { %v607_v48 = vpop.f32.mrb[0].mxu0  ;;  %v1665_v49 = vpop.f32.mrb[0].mxu1 }
 0x103   : > { %v609_v50 = vpop.f32.mrb[1].mxu0  ;;  %v673_v51 = vpop.f32.mrb[1].mxu1  ;;  %v937_v52 = vmul.f32 %v607_v48, %v607_v48 }
 0x104   : > { %v610_v53 = vpop.f32.mrb[2].mxu0  ;;  %v1672_v54 = vpop.f32.mrb[2].mxu1 }
 0x105   : > { %v1308_v55 = vpack.c.bf16 %v610_v53, %v607_v48  ;;  %v900_v56 = vadd.f32 %v610_v53, %v607_v48  ;;  %v938_v57 = vmul.f32 %v610_v53, %v610_v53  ;;  %v612_v58 = vpop.f32.mrb[3].mxu0  ;;  %v1348_v59 = vpack.c.bf16 %v1672_v54, %v1665_v49  ;;  %v676_v60 = vpop.f32.mrb[3].mxu1 }
 0x107   : > { %1309 = vst [vmem:[%s1670_s24] sm:$0xff] %v1308_v55   ;;  %v969_v61 = vadd.f32 %v938_v57, %v937_v52  ;;  %1392 = vst [vmem:[%s1670_s24 + $0x40] sm:$0xff] %v1348_v59  }
 0x10a   : > { %v615_v62 = vpop.f32.mrb[4].mxu0  ;;  %v1678_v63 = vpop.f32.mrb[4].mxu1 }
 0x10b   : > { %v901_v0 = vadd.f32 %v900_v56, %v615_v62  ;;  %v939_v1 = vmul.f32 %v615_v62, %v615_v62  ;;  %v617_v2 = vpop.f32.mrb[5].mxu0  ;;  %v681_v3 = vpop.f32.mrb[5].mxu1 }
 0x10c   : > { %v618_v4 = vpop.f32.mrb[6].mxu0  ;;  %v1680_v5 = vpop.f32.mrb[6].mxu1 }
 0x10d   : > { %v970_v6 = vadd.f32 %v969_v61, %v939_v1  ;;  %v1313_v7 = vpack.c.bf16 %v618_v4, %v615_v62  ;;  %v902_v8 = vadd.f32 %v901_v0, %v618_v4  ;;  %v940_v9 = vmul.f32 %v618_v4, %v618_v4  ;;  %v620_v10 = vpop.f32.mrb[7].mxu0  ;;  %v684_v11 = vpop.f32.mrb[7].mxu1 }
 0x10e   : > { %v1353_v12 = vpack.c.bf16 %v1680_v5, %v1678_v63 }
 0x10f   : > { %1385 = vst [vmem:[%s1670_s24 + $0x8] sm:$0xff] %v1313_v7   ;;  %v971_v13 = vadd.f32 %v970_v6, %v940_v9 }
 0x110   : > { %1393 = vst [vmem:[%s1670_s24 + $0x48] sm:$0xff] %v1353_v12  }
 0x112   : > { %v623_v14 = vpop.f32.mrb[8].mxu0  ;;  %v1686_v15 = vpop.f32.mrb[8].mxu1 }
 0x113   : > { %v903_v16 = vadd.f32 %v902_v8, %v623_v14  ;;  %v941_v17 = vmul.f32 %v623_v14, %v623_v14  ;;  %v625_v18 = vpop.f32.mrb[9].mxu0  ;;  %v689_v19 = vpop.f32.mrb[9].mxu1 }
 0x114   : > { %v626_v20 = vpop.f32.mrb[10].mxu0  ;;  %v1688_v21 = vpop.f32.mrb[10].mxu1 }
 0x115   : > { %v972_v22 = vadd.f32 %v971_v13, %v941_v17  ;;  %v1318_v23 = vpack.c.bf16 %v626_v20, %v623_v14  ;;  %v904_v24 = vadd.f32 %v903_v16, %v626_v20  ;;  %v942_v25 = vmul.f32 %v626_v20, %v626_v20  ;;  %v628_v26 = vpop.f32.mrb[11].mxu0  ;;  %v692_v27 = vpop.f32.mrb[11].mxu1 }
 0x116   : > { %v1358_v28 = vpack.c.bf16 %v1688_v21, %v1686_v15 }
 0x117   : > { %1386 = vst [vmem:[%s1670_s24 + $0x10] sm:$0xff] %v1318_v23   ;;  %v973_v29 = vadd.f32 %v972_v22, %v942_v25 }
 0x118   : > { %1394 = vst [vmem:[%s1670_s24 + $0x50] sm:$0xff] %v1358_v28  }
 0x11a   : > { %v631_v30 = vpop.f32.mrb[12].mxu0  ;;  %v1694_v31 = vpop.f32.mrb[12].mxu1 }
 0x11b   : > { %v905_v32 = vadd.f32 %v904_v24, %v631_v30  ;;  %v943_v33 = vmul.f32 %v631_v30, %v631_v30  ;;  %v633_v34 = vpop.f32.mrb[13].mxu0  ;;  %v697_v35 = vpop.f32.mrb[13].mxu1 }
 0x11c   : > { %v634_v36 = vpop.f32.mrb[14].mxu0  ;;  %v1696_v37 = vpop.f32.mrb[14].mxu1 }
 0x11d   : > { %v974_v38 = vadd.f32 %v973_v29, %v943_v33  ;;  %v1323_v39 = vpack.c.bf16 %v634_v36, %v631_v30  ;;  %v906_v40 = vadd.f32 %v905_v32, %v634_v36  ;;  %v944_v41 = vmul.f32 %v634_v36, %v634_v36  ;;  %v636_v42 = vpop.f32.mrb[15].mxu0  ;;  %v700_v43 = vpop.f32.mrb[15].mxu1 }
 0x11e   : > { %v1363_v44 = vpack.c.bf16 %v1696_v37, %v1694_v31 }
 0x11f   : > { %1387 = vst [vmem:[%s1670_s24 + $0x18] sm:$0xff] %v1323_v39   ;;  %v975_v45 = vadd.f32 %v974_v38, %v944_v41 }
 0x120   : > { %1395 = vst [vmem:[%s1670_s24 + $0x58] sm:$0xff] %v1363_v44  }
 0x122   : > { %v639_v46 = vpop.f32.mrb[16].mxu0  ;;  %v1702_v47 = vpop.f32.mrb[16].mxu1 }
 0x123   : > { %v907_v48 = vadd.f32 %v906_v40, %v639_v46  ;;  %v945_v50 = vmul.f32 %v639_v46, %v639_v46  ;;  %v641_v51 = vpop.f32.mrb[17].mxu0  ;;  %v705_v52 = vpop.f32.mrb[17].mxu1 }
 0x124   : > { %v642_v53 = vpop.f32.mrb[18].mxu0  ;;  %v1704_v55 = vpop.f32.mrb[18].mxu1 }
 0x125   : > { %v976_v56 = vadd.f32 %v975_v45, %v945_v50  ;;  %v1328_v57 = vpack.c.bf16 %v642_v53, %v639_v46  ;;  %v908_v58 = vadd.f32 %v907_v48, %v642_v53  ;;  %v946_v59 = vmul.f32 %v642_v53, %v642_v53  ;;  %v644_v60 = vpop.f32.mrb[19].mxu0  ;;  %v708_v61 = vpop.f32.mrb[19].mxu1 }
 0x126   : > { %v1368_v62 = vpack.c.bf16 %v1704_v55, %v1702_v47  ;;  %v954_v60 = vmul.f32 %v1672_v54, %v1672_v54 }
 0x127   : > { %1388 = vst [vmem:[%s1670_s24 + $0x20] sm:$0xff] %v1328_v57   ;;  %v977_v0 = vadd.f32 %v976_v56, %v946_v59  ;;  %v953_v57 = vmul.f32 %v1665_v49, %v1665_v49 }
 0x128   : > { %1396 = vst [vmem:[%s1670_s24 + $0x60] sm:$0xff] %v1368_v62  }
 0x12a   : > { %v647_v1 = vpop.f32.mrb[20].mxu0  ;;  %v1710_v2 = vpop.f32.mrb[20].mxu1 }
 0x12b   : > { %v909_v3 = vadd.f32 %v908_v58, %v647_v1  ;;  %v947_v4 = vmul.f32 %v647_v1, %v647_v1  ;;  %v649_v6 = vpop.f32.mrb[21].mxu0  ;;  %v713_v7 = vpop.f32.mrb[21].mxu1 }
 0x12c   : > { %v650_v8 = vpop.f32.mrb[22].mxu0  ;;  %v1712_v9 = vpop.f32.mrb[22].mxu1  ;;  %v957_v7 = vmul.f32 %v1686_v15, %v1686_v15 }
 0x12d   : > { %v978_v10 = vadd.f32 %v977_v0, %v947_v4  ;;  %v1333_v11 = vpack.c.bf16 %v650_v8, %v647_v1  ;;  %v910_v12 = vadd.f32 %v909_v3, %v650_v8  ;;  %v948_v13 = vmul.f32 %v650_v8, %v650_v8  ;;  %v652_v14 = vpop.f32.mrb[23].mxu0  ;;  %v716_v16 = vpop.f32.mrb[23].mxu1 }
 0x12e   : > { %v1373_v17 = vpack.c.bf16 %v1712_v9, %v1710_v2  ;;  %v955_v0 = vmul.f32 %v1678_v63, %v1678_v63  ;;  %v956_v4 = vmul.f32 %v1680_v5, %v1680_v5 }
 0x12f   : > { %1389 = vst [vmem:[%s1670_s24 + $0x28] sm:$0xff] %v1333_v11   ;;  %v979_v18 = vadd.f32 %v978_v10, %v948_v13 }
 0x130   : > { %1397 = vst [vmem:[%s1670_s24 + $0x68] sm:$0xff] %v1373_v17  }
 0x132   : > { %v655_v19 = vpop.f32.mrb[24].mxu0  ;;  %v1718_v20 = vpop.f32.mrb[24].mxu1 }
 0x133   : > { %v911_v22 = vadd.f32 %v910_v12, %v655_v19  ;;  %v949_v23 = vmul.f32 %v655_v19, %v655_v19  ;;  %v657_v24 = vpop.f32.mrb[25].mxu0  ;;  %v721_v25 = vpop.f32.mrb[25].mxu1 }
 0x134   : > { %v658_v26 = vpop.f32.mrb[26].mxu0  ;;  %v1720_v27 = vpop.f32.mrb[26].mxu1  ;;  %v963_v25 = vmul.f32 %v1710_v2, %v1710_v2 }
 0x135   : > { %v980_v28 = vadd.f32 %v979_v18, %v949_v23  ;;  %v1338_v29 = vpack.c.bf16 %v658_v26, %v655_v19  ;;  %v912_v30 = vadd.f32 %v911_v22, %v658_v26  ;;  %v950_v32 = vmul.f32 %v658_v26, %v658_v26  ;;  %v660_v33 = vpop.f32.mrb[27].mxu0  ;;  %v724_v34 = vpop.f32.mrb[27].mxu1 }
 0x136   : > { %v1378_v35 = vpack.c.bf16 %v1720_v27, %v1718_v20  ;;  %v961_v18 = vmul.f32 %v1702_v47, %v1702_v47  ;;  %v962_v23 = vmul.f32 %v1704_v55, %v1704_v55  ;;  %v966_v33 = vmul.f32 %v1720_v27, %v1720_v27 }
 0x137   : > { %1390 = vst [vmem:[%s1670_s24 + $0x30] sm:$0xff] %v1338_v29   ;;  %v981_v36 = vadd.f32 %v980_v28, %v950_v32  ;;  %v964_v28 = vmul.f32 %v1712_v9, %v1712_v9 }
 0x138   : > { %1398 = vst [vmem:[%s1670_s24 + $0x70] sm:$0xff] %v1378_v35  }
 0x13a   : > { %v663_v38 = vpop.f32.mrb[28].mxu0  ;;  %v727_v39 = vpop.f32.mrb[28].mxu1 }
 0x13b   : > { %v913_v40 = vadd.f32 %v912_v30, %v663_v38  ;;  %v951_v41 = vmul.f32 %v663_v38, %v663_v38  ;;  %v665_v42 = vpop.f32.mrb[29].mxu0  ;;  %v729_v43 = vpop.f32.mrb[29].mxu1  ;;  %v965_v30 = vmul.f32 %v1718_v20, %v1718_v20  ;;  %v967_v34 = vmul.f32 %v727_v39, %v727_v39 }
 0x13c   : > { %v666_v44 = vpop.f32.mrb[30].mxu0  ;;  %v730_v45 = vpop.f32.mrb[30].mxu1 }
 0x13d   : > { %v982_v46 = vadd.f32 %v981_v36, %v951_v41  ;;  %v1343_v48 = vpack.c.bf16 %v666_v44, %v663_v38  ;;  %v914_v50 = vadd.f32 %v913_v40, %v666_v44  ;;  %v952_v51 = vmul.f32 %v666_v44, %v666_v44  ;;  %v668_v52 = vpop.f32.mrb[31].mxu0  ;;  %v732_v53 = vpop.f32.mrb[31].mxu1 }
 0x13e   : > { %v1383_v56 = vpack.c.bf16 %v730_v45, %v727_v39  ;;  %v968_v40 = vmul.f32 %v730_v45, %v730_v45 }
 0x13f   : > { %1391 = vst [vmem:[%s1670_s24 + $0x38] sm:$0xff] %v1343_v48   ;;  %v915_v58 = vadd.f32 %v914_v50, %v1665_v49  ;;  %v983_v59 = vadd.f32 %v982_v46, %v952_v51 }
 0x140   : > { %1399 = vst [vmem:[%s1670_s24 + $0x78] sm:$0xff] %v1383_v56  }
 0x141   : > { %v916_v61 = vadd.f32 %v915_v58, %v1672_v54  ;;  %v984_v62 = vadd.f32 %v983_v59, %v953_v57  ;;  %v958_v54 = vmul.f32 %v1688_v21, %v1688_v21 }
 0x143   : > { %v917_v1 = vadd.f32 %v916_v61, %v1678_v63  ;;  %v985_v3 = vadd.f32 %v984_v62, %v954_v60  ;;  %v959_v63 = vmul.f32 %v1694_v31, %v1694_v31 }
 0x145   : > { %v918_v6 = vadd.f32 %v917_v1, %v1680_v5  ;;  %v986_v49 = vadd.f32 %v985_v3, %v955_v0  ;;  %v960_v5 = vmul.f32 %v1696_v37, %v1696_v37 }
 0x147   : > { %v987_v8 = vadd.f32 %v986_v49, %v956_v4  ;;  %v919_v10 = vadd.f32 %v918_v6, %v1686_v15 }
 0x149   : > { %v920_v11 = vadd.f32 %v919_v10, %v1688_v21  ;;  %v988_v12 = vadd.f32 %v987_v8, %v957_v7 }
 0x14b   : > { %v921_v13 = vadd.f32 %v920_v11, %v1694_v31  ;;  %v989_v14 = vadd.f32 %v988_v12, %v958_v54 }
 0x14d   : > { %v922_v16 = vadd.f32 %v921_v13, %v1696_v37  ;;  %v990_v17 = vadd.f32 %v989_v14, %v959_v63 }
 0x14f   : > { %v923_v15 = vadd.f32 %v922_v16, %v1702_v47  ;;  %v991_v19 = vadd.f32 %v990_v17, %v960_v5 }
 0x151   : > { %v992_v21 = vadd.f32 %v991_v19, %v961_v18  ;;  %v924_v22 = vadd.f32 %v923_v15, %v1704_v55 }
 0x153   : > { %v993_v31 = vadd.f32 %v992_v21, %v962_v23  ;;  %v925_v24 = vadd.f32 %v924_v22, %v1710_v2 }
 0x155   : > { %v994_v37 = vadd.f32 %v993_v31, %v963_v25  ;;  %v926_v26 = vadd.f32 %v925_v24, %v1712_v9 }
 0x157   : > { %v995_v47 = vadd.f32 %v994_v37, %v964_v28  ;;  %v927_v29 = vadd.f32 %v926_v26, %v1718_v20 }
 0x159   : > { %v996_v32 = vadd.f32 %v995_v47, %v965_v30  ;;  %v928_v55 = vadd.f32 %v927_v29, %v1720_v27  ;;  %v899_v27 = vld [vmem:[%s1661_s20] sm:$0x3] }
 0x15b   : > { %v997_v2 = vadd.f32 %v996_v32, %v966_v33  ;;  %v929_v35 = vadd.f32 %v928_v55, %v727_v39 }
 0x15d   : > { %v998_v36 = vadd.f32 %v997_v2, %v967_v34  ;;  %v930_v38 = vadd.f32 %v929_v35, %v730_v45 }
 0x15f   : > { %v931_v9 = vrot.slane %v930_v38, 4  ;;  %v999_v41 = vadd.f32 %v998_v36, %v968_v40 }
 0x161   : > { %v932_v42 = vadd.f32 %v931_v9, %v930_v38  ;;  %v1000_v43 = vrot.slane %v999_v41, 4 }
 0x163   : > { %v933_v44 = vrot.slane %v932_v42, 2  ;;  %v1001_v20 = vadd.f32 %v1000_v43, %v999_v41 }
 0x165   : > { %v934_v46 = vadd.f32 %v933_v44, %v932_v42  ;;  %v1002_v48 = vrot.slane %v1001_v20, 2 }
 0x167   : > { %v935_v50 = vrot.slane %v934_v46, 1  ;;  %v1003_v51 = vadd.f32 %v1002_v48, %v1001_v20 }
 0x169   : > { %v1004_v52 = vrot.slane %v1003_v51, 1  ;;  %v936_v53 = vadd.f32 %v935_v50, %v934_v46 }
 0x16b   : > { %v1005_v56 = vadd.f32 %v1004_v52, %v1003_v51 }
 0x16d   : > { %v1006_v39 = vsel %vm566_vm1, %v936_v53, %v1005_v56 }
 0x16e   : > { %v1007_v57 = vadd.f32 %v1006_v39, %v899_v27 }
 0x170   : > { %1008 = vst [vmem:[%s1661_s20] sm:$0x3] %v1007_v57 }
 0x171 PF: > { %s14_s14 = sadd.s32 1, %s1527_s14   ;;  %s1786_s12 = smov %s1523_s13 }
 0x172   : > { %p11_p5 = scmp.ge.s32.totalorder %s14_s14, 4   ;;  %s1787_s13 = smov %s1789_s15 }
 0x174   :  { %13 = sbr.rel (!%p11_p5) target bundleno = 2 (0x2), region = 77 }

// kernel: downsample_block.9
= control target key start
LH: loop header
LB: loop body
LE: loop exit
PB: predicated region body
PF: predicated region fallthrough
CT: control target
= control target key end

     0   :  { %s534_s9 = smov 0   ;;  %s536_s10 = smov 0   ;;  %s578_s0 = inlined_call_operand.vmem [shape: bf16[2,64,128], index: 0, kind: input, shape index: {}]   ;;  %s579_s1 = inlined_call_operand.vmem [shape: f32[2,2,128], index: 1, kind: input, shape index: {}]   ;;  %s580_s2 = inlined_call_operand.vmem [shape: bf16[2,64,128], index: 2, kind: output, shape index: {}]  }
   0x1   :  { %s538_s11 = smov 0  }
   0x2 LB: > { %s24_s12 = sadd.s32 1, %s513_s10  ;;  %p401_p0 = scmp.ge.s32.totalorder %s517_s11, 1  ;;  %s517_s11 = sphi %s538_s11, %s12_s11   ;;  %s513_s10 = sphi %s536_s10, %s582_s10   ;;  %s509_s9 = sphi %s534_s9, %s581_s9  }
   0x3   : > { %p26_p1 = scmp.ge.s32.totalorder %s24_s12, 2  ;;  %p142_p2 = scmp.lt.s32.totalorder %s517_s11, 3 }
   0x5   : > { %s584_s12 = smov (%p26_p1, %s24_s12), 0  ;;  %p143_p3 = pnand %p401_p0, %p142_p2 }
   0x6   : > { %p177_p4 = scmp.lt.s32.totalorder (!%p143_p3), %s509_s9, 1  ;;  %v226_v4 = vlaneseq (!%p143_p3) }
   0x7   : > { %146 = sbr.rel (%p143_p3) target bundleno = 51 (0x33), region = 28 }
   0x8   : > { %v227_v7 = vshrl.u32 (!%p143_p3), %v226_v4, 7 }
   0xa   : > { %v228_v10 = vsub.s32 (!%p143_p3), 0, %v227_v7  ;;  %v240_v23 = vsub.s32 (!%p143_p3), 1, %v227_v7 }
   0xe   : > { %s586_s9 = smov (!%p177_p4, %s509_s9), 1 }
   0xf   : > { %s404_s13 = sshll.u32 %s586_s9, 1  ;;  %s417_s17 = sshll.u32 %s586_s9, 5 }
  0x10   : > { %s189_s16 = scalar_lea.vmem %s579_s1, %s404_s13  ;;  %s184_s20 = scalar_lea.vmem %s578_s0, %s417_s17 }
  0x11   : > { %v216_v0 = vld [vmem:[%s189_s16] sm:$0x3]  ;;  %v463_v11 = vld [vmem:[%s184_s20 + $0x8] sm:$0xff]   ;;  %v464_v12 = vld [vmem:[%s184_s20 + $0x10] sm:$0xff]   ;;  %s198_s23 = scalar_lea.vmem %s580_s2, %s417_s17 }
  0x12   : > { %v217_v1 = vmul.f32 0.015625, %v216_v0  ;;  %v428_v9 = vld [vmem:[%s184_s20] sm:$0xff]   ;;  %v465_v13 = vld [vmem:[%s184_s20 + $0x18] sm:$0xff]   ;;  %v433_v17 = vunpack.c.l.bf16 %v463_v11  ;;  %v434_v18 = vunpack.c.h.bf16 %v463_v11  ;;  %v437_v19 = vunpack.c.l.bf16 %v464_v12 }
  0x13   : > { %v429_v14 = vunpack.c.l.bf16 %v428_v9  ;;  %v430_v15 = vunpack.c.h.bf16 %v428_v9  ;;  %v438_v20 = vunpack.c.h.bf16 %v464_v12  ;;  %v441_v21 = vunpack.c.l.bf16 %v465_v13 }
  0x14   : > { %v218_v2 = vmul.f32 %v217_v1, %v217_v1  ;;  %v229_v16 = vrot.slane %v217_v1, %v228_v10  ;;  %v442_v22 = vunpack.c.h.bf16 %v465_v13 }
  0x16   : > { %v220_v3 = vrot.slane %v218_v2, 7  ;;  %v230_v24 = vsub.f32 %v429_v14, %v229_v16  ;;  %v231_v25 = vsub.f32 %v430_v15, %v229_v16  ;;  %v232_v26 = vsub.f32 %v433_v17, %v229_v16 }
  0x17   : > { %v233_v27 = vsub.f32 %v434_v18, %v229_v16  ;;  %v234_v29 = vsub.f32 %v437_v19, %v229_v16  ;;  %v235_v30 = vsub.f32 %v438_v20, %v229_v16  ;;  %v236_v31 = vsub.f32 %v441_v21, %v229_v16 }
  0x18   : > { %v222_v5 = vsub.f32 %v217_v1, %v220_v3  ;;  %v237_v32 = vsub.f32 %v442_v22, %v229_v16 }
  0x1a   : > { %v223_v6 = vmax.f32 %v222_v5, 0.0 }
  0x1c   : > { %v224_v8 = vadd.f32 1e-05, %v223_v6 }
  0x1e   : > { %493 = vrsqrt.f32 %v224_v8 }
  0x28   : > { %v494_v28 = vpop.eup %493 }
  0x29   : > { %v241_v33 = vrot.slane %v494_v28, %v240_v23 }
  0x2b   : > { %v242_v34 = vmul.f32 %v241_v33, %v230_v24  ;;  %v243_v35 = vmul.f32 %v241_v33, %v231_v25  ;;  %v244_v36 = vmul.f32 %v241_v33, %v232_v26  ;;  %v245_v37 = vmul.f32 %v241_v33, %v233_v27 }
  0x2c   : > { %v246_v38 = vmul.f32 %v241_v33, %v234_v29  ;;  %v247_v39 = vmul.f32 %v241_v33, %v235_v30  ;;  %v248_v40 = vmul.f32 %v241_v33, %v236_v31  ;;  %v249_v41 = vmul.f32 %v241_v33, %v237_v32 }
  0x2d   : > { %v250_v42 = vmax.f32 %v242_v34, 0.0  ;;  %v251_v43 = vmax.f32 %v243_v35, 0.0  ;;  %v252_v44 = vmax.f32 %v244_v36, 0.0  ;;  %v253_v45 = vmax.f32 %v245_v37, 0.0 }
  0x2e   : > { %v254_v46 = vmax.f32 %v246_v38, 0.0  ;;  %v255_v47 = vmax.f32 %v247_v39, 0.0  ;;  %v256_v48 = vmax.f32 %v248_v40, 0.0  ;;  %v257_v49 = vmax.f32 %v249_v41, 0.0 }
  0x2f   : > { %v446_v50 = vpack.c.bf16 %v251_v43, %v250_v42  ;;  %v451_v51 = vpack.c.bf16 %v253_v45, %v252_v44 }
  0x30   : > { %v456_v52 = vpack.c.bf16 %v255_v47, %v254_v46  ;;  %v461_v53 = vpack.c.bf16 %v257_v49, %v256_v48 }
  0x31   : > { %447 = vst [vmem:[%s198_s23] sm:$0xff] %v446_v50   ;;  %466 = vst [vmem:[%s198_s23 + $0x8] sm:$0xff] %v451_v51  }
  0x32   : > { %467 = vst [vmem:[%s198_s23 + $0x10] sm:$0xff] %v456_v52   ;;  %468 = vst [vmem:[%s198_s23 + $0x18] sm:$0xff] %v461_v53  }
  0x33 PF: > { %s12_s11 = sadd.s32 1, %s517_s11   ;;  %s581_s9 = smov %s513_s10 }
  0x34   : > { %p9_p5 = scmp.ge.s32.totalorder %s12_s11, 4   ;;  %s582_s10 = smov %s584_s12 }
  0x36   :  { %11 = sbr.rel (!%p9_p5) target bundleno = 2 (0x2), region = 61 }

// kernel: downsample_block.8
= control target key start
LH: loop header
LB: loop body
LE: loop exit
PB: predicated region body
PF: predicated region fallthrough
CT: control target
= control target key end

     0   :  { %s2663_s12 = smov 0   ;;  %s2665_s13 = smov 0   ;;  %s3069_s0 = inlined_call_operand.vmem [shape: bf16[2,2,8,9,384], index: 0, kind: input, shape index: {}]   ;;  %s3070_s1 = inlined_call_operand.vmem [shape: bf16[3,384,128], index: 1, kind: input, shape index: {}]   ;;  %s3071_s2 = inlined_call_operand.vmem [shape: bf16[2,64,128], index: 2, kind: output, shape index: {0}]   ;;  %s3072_s3 = inlined_call_operand.vmem [shape: f32[2,2,128], index: 3, kind: output, shape index: {1}]  }
   0x1   :  { %s2667_s14 = smov 0  }
   0x2 LB: > { %s33_s15 = sadd.s32 1, %s2636_s13  ;;  %p1957_p0 = scmp.ge.s32.totalorder %s2640_s14, 1  ;;  %s2640_s14 = sphi %s2667_s14, %s14_s14   ;;  %s2636_s13 = sphi %s2665_s13, %s3076_s13   ;;  %s2632_s12 = sphi %s2663_s12, %s3075_s12  }
   0x3   : > { %p35_p1 = scmp.ge.s32.totalorder %s33_s15, 2  ;;  %p182_p2 = scmp.lt.s32.totalorder %s2640_s14, 3 }
   0x5   : > { %s3078_s15 = smov (%p35_p1, %s33_s15), 0  ;;  %p183_p3 = pnand %p1957_p0, %p182_p2 }
   0x6   : > { %v2518_v0 = vld [vmem:[%s3070_s1 + $0x100] sm:$0xff] (!%p183_p3)   ;;  %v2521_v3 = vld [vmem:[%s3070_s1 + $0x108] sm:$0xff] (!%p183_p3)   ;;  %v2524_v6 = vld [vmem:[%s3070_s1 + $0x110] sm:$0xff] (!%p183_p3)   ;;  %p230_p4 = scmp.lt.s32.totalorder (!%p183_p3), %s2632_s12, 1  ;;  %vm1103_vm0 = vsmask.f32 (!%p183_p3), 3328 }
   0x7   : > { %186 = sbr.rel (%p183_p3) target bundleno = 369 (0x171), region = 28  ;;  %v2519_v1 = vld [vmem:[%s3070_s1 + $0x140] sm:$0xff] (!%p183_p3)   ;;  %2224 = vmatprep.subr.bf16.mxu0 (!%p183_p3), %v2518_v0  ;;  %v2522_v4 = vld [vmem:[%s3070_s1 + $0x148] sm:$0xff] (!%p183_p3)   ;;  %v2525_v7 = vld [vmem:[%s3070_s1 + $0x150] sm:$0xff] (!%p183_p3)   ;;  %vm1104_vm1 = vsmask.f32 (!%p183_p3), 7440 }
   0x8   : > { %v2520_v2 = vld [vmem:[%s3070_s1 + $0xc0] sm:$0xff] (!%p183_p3)   ;;  %2380 = vmatprep.subr.bf16.mxu1 (!%p183_p3), %v2519_v1  ;;  %v2523_v5 = vld [vmem:[%s3070_s1 + $0xc8] sm:$0xff] (!%p183_p3)   ;;  %v2526_v8 = vld [vmem:[%s3070_s1 + $0xd0] sm:$0xff] (!%p183_p3)   ;;  %vm1789_vm3 = vcmask (!%p183_p3), 1040384  }
   0x9   : > { %2225 = vmatpush3.bf16.msra.mxu0 (!%p183_p3), %v2520_v2  ;;  %2381 = vmatpush3.bf16.msra.mxu1 (!%p183_p3), %v2519_v1  ;;  %v2527_v9 = vld [vmem:[%s3070_s1 + $0x118] sm:$0xff] (!%p183_p3)   ;;  %v2530_v12 = vld [vmem:[%s3070_s1 + $0x120] sm:$0xff] (!%p183_p3)   ;;  %v2533_v15 = vld [vmem:[%s3070_s1 + $0x128] sm:$0xff] (!%p183_p3)  }
   0xa   : > { %2226 = vmatprep.subr.bf16.mxu0 (!%p183_p3), %v2521_v3  ;;  %2382 = vmatprep.subr.bf16.mxu1 (!%p183_p3), %v2522_v4  ;;  %v2528_v10 = vld [vmem:[%s3070_s1 + $0x158] sm:$0xff] (!%p183_p3)   ;;  %v2531_v13 = vld [vmem:[%s3070_s1 + $0x160] sm:$0xff] (!%p183_p3)   ;;  %v2534_v16 = vld [vmem:[%s3070_s1 + $0x168] sm:$0xff] (!%p183_p3)  }
   0xb   : > { %v2529_v11 = vld [vmem:[%s3070_s1 + $0xd8] sm:$0xff] (!%p183_p3)   ;;  %v2532_v14 = vld [vmem:[%s3070_s1 + $0xe0] sm:$0xff] (!%p183_p3)   ;;  %v2535_v17 = vld [vmem:[%s3070_s1 + $0xe8] sm:$0xff] (!%p183_p3)  }
   0xc   : > { %v2536_v18 = vld [vmem:[%s3070_s1 + $0x130] sm:$0xff] (!%p183_p3)   ;;  %v2539_v21 = vld [vmem:[%s3070_s1 + $0x138] sm:$0xff] (!%p183_p3)   ;;  %v2546_v26 = vld [vmem:[%s3070_s1 + $0x40] sm:$0xff] (!%p183_p3)  }
   0xd   : > { %2227 = vmatpush3.bf16.msra.mxu0 (!%p183_p3), %v2523_v5  ;;  %2383 = vmatpush3.bf16.msra.mxu1 (!%p183_p3), %v2522_v4  ;;  %v2537_v19 = vld [vmem:[%s3070_s1 + $0x170] sm:$0xff] (!%p183_p3)   ;;  %v2540_v22 = vld [vmem:[%s3070_s1 + $0x178] sm:$0xff] (!%p183_p3)   ;;  %v2547_v28 = vld [vmem:[%s3070_s1 + $0x80] sm:$0xff] (!%p183_p3)  }
   0xe   : > { %2228 = vmatprep.subr.bf16.mxu0 %v2524_v6  ;;  %2384 = vmatprep.subr.bf16.mxu1 %v2525_v7  ;;  %s3080_s12 = smov (!%p230_p4, %s2632_s12), 1  ;;  %v2538_v20 = vld [vmem:[%s3070_s1 + $0xf0] sm:$0xff]   ;;  %v2541_v25 = vld [vmem:[%s3070_s1 + $0xf8] sm:$0xff]   ;;  %v2549_v30 = vld [vmem:[%s3070_s1] sm:$0xff]  }
   0xf   : > { %s2492_s27 = smul.u32 384, %s3080_s12  ;;  %v2550_v31 = vld [vmem:[%s3070_s1 + $0x48] sm:$0xff]   ;;  %v2556_v35 = vld [vmem:[%s3070_s1 + $0x50] sm:$0xff]   ;;  %v2559_v39 = vld [vmem:[%s3070_s1 + $0x58] sm:$0xff]   ;;  %s2192_s6 = sshll.u32 %s3080_s12, 5 }
  0x10   : > { %v2551_v32 = vld [vmem:[%s3070_s1 + $0x88] sm:$0xff]   ;;  %v2557_v36 = vld [vmem:[%s3070_s1 + $0x90] sm:$0xff]   ;;  %v2560_v40 = vld [vmem:[%s3070_s1 + $0x98] sm:$0xff]   ;;  %s3050_s9 = scalar_lea.vmem %s3071_s2, %s2192_s6 }
  0x11   : > { %2229 = vmatpush3.bf16.msra.mxu0 %v2526_v8  ;;  %2385 = vmatpush3.bf16.msra.mxu1 %v2525_v7  ;;  %s2754_s11 = scalar_lea.vmem %s3069_s0, %s2492_s27  ;;  %v2552_v34 = vld [vmem:[%s3070_s1 + $0x8] sm:$0xff]   ;;  %v2558_v38 = vld [vmem:[%s3070_s1 + $0x10] sm:$0xff]   ;;  %v2561_v42 = vld [vmem:[%s3070_s1 + $0x18] sm:$0xff]  }
  0x12   : > { %2230 = vmatprep.subr.bf16.mxu0 %v2527_v9  ;;  %2386 = vmatprep.subr.bf16.mxu1 %v2528_v10  ;;  %v2544_v23 = vld [vmem:[%s2754_s11 + $0xc4] ss:$24 sps:$4 sm:$0xff]   ;;  %v2545_v24 = vld [vmem:[%s2754_s11 + $0xc8] ss:$24 sps:$4 sm:$0xff]   ;;  %v2548_v29 = vld [vmem:[%s2754_s11 + $0xf8] ss:$24 sps:$4 sm:$0xff]  }
  0x13   : > { %635 = vmatprep.mubr.bf16.mxu0 %v2544_v23  ;;  %v2542_v27 = vld [vmem:[%s2754_s11 + $0xc0] ss:$24 sps:$4 sm:$0xff]   ;;  %2396 = vmatprep.mubr.bf16.mxu1 %v2545_v24  ;;  %v2553_v33 = vld [vmem:[%s2754_s11 + $0xf4] ss:$24 sps:$4 sm:$0xff]   ;;  %v2555_v37 = vld [vmem:[%s2754_s11 + $0xf0] ss:$24 sps:$4 sm:$0xff]  }
  0x14   : > { %v2562_v41 = vld [vmem:[%s2754_s11 + $0x124] ss:$24 sps:$4 sm:$0xff]   ;;  %v2564_v44 = vld [vmem:[%s2754_s11 + $0x120] ss:$24 sps:$4 sm:$0xff]   ;;  %v2568_v47 = vld [vmem:[%s3070_s1 + $0x68] sm:$0xff]  }
  0x15   : > { %2231 = vmatpush3.bf16.msra.mxu0 %v2529_v11  ;;  %2387 = vmatpush3.bf16.msra.mxu1 %v2528_v10  ;;  %v2565_v43 = vld [vmem:[%s3070_s1 + $0x60] sm:$0xff]   ;;  %v2569_v48 = vld [vmem:[%s3070_s1 + $0xa8] sm:$0xff]   ;;  %v2575_v52 = vld [vmem:[%s3070_s1 + $0x70] sm:$0xff]  }
  0x16   : > { %2232 = vmatprep.subr.bf16.mxu0 %v2530_v12  ;;  %2388 = vmatprep.subr.bf16.mxu1 %v2531_v13  ;;  %v2566_v45 = vld [vmem:[%s3070_s1 + $0xa0] sm:$0xff]   ;;  %v2571_v49 = vld [vmem:[%s2754_s11 + $0x154] ss:$24 sps:$4 sm:$0xff]   ;;  %v2577_v54 = vld [vmem:[%s2754_s11 + $0x158] ss:$24 sps:$4 sm:$0xff]  }
  0x17   : > { %v2567_v46 = vld [vmem:[%s3070_s1 + $0x20] sm:$0xff]   ;;  %v2570_v50 = vld [vmem:[%s3070_s1 + $0x28] sm:$0xff]   ;;  %v2576_v53 = vld [vmem:[%s3070_s1 + $0xb0] sm:$0xff]  }
  0x18   : > { %v2574_v51 = vld [vmem:[%s2754_s11 + $0x128] ss:$24 sps:$4 sm:$0xff]   ;;  %v2578_v56 = vld [vmem:[%s3070_s1 + $0x30] sm:$0xff]   ;;  %v2579_v57 = vld [vmem:[%s3070_s1 + $0x78] sm:$0xff]  }
  0x19   : > { %2233 = vmatpush3.bf16.msra.mxu0 %v2532_v14  ;;  %2389 = vmatpush3.bf16.msra.mxu1 %v2531_v13  ;;  %v2573_v55 = vld [vmem:[%s2754_s11 + $0x150] ss:$24 sps:$4 sm:$0xff]   ;;  %v2580_v58 = vld [vmem:[%s3070_s1 + $0xb8] sm:$0xff]   ;;  %v265_v59 = vld [vmem:[%s2754_s11] sm:$0xff] }
  0x1a   : > { %2234 = vmatprep.subr.bf16.mxu0 %v2533_v15  ;;  %2390 = vmatprep.subr.bf16.mxu1 %v2534_v16  ;;  %v267_v60 = vld [vmem:[%s2754_s11 + $0x18] sm:$0xff]  ;;  %v2584_v62 = vld [vmem:[%s2754_s11 + $0x8] ss:$24 sps:$4 sm:$0xff]   ;;  %v1107_v2 = vshrl.u32 %v265_v59, 16  ;;  %v1110_v6 = vshll.u32 %v265_v59, 16  ;;  %v269_v12 = vld [vmem:[%s2754_s11 + $0x30] sm:$0xff] }
  0x1b   : > { %v2063_v61 = vcombine.high %v265_v59, %v267_v60  ;;  %v2581_v63 = vld [vmem:[%s3070_s1 + $0x38] sm:$0xff]   ;;  %v2585_v0 = vld [vmem:[%s3070_s1 + $0x1c0] sm:$0xff]   ;;  %v2062_v4 = vcombine.low %v265_v59, %v267_v60  ;;  %v2589_v7 = vld [vmem:[%s3070_s1 + $0x1c8] sm:$0xff]   ;;  %v1135_v8 = vshrl.u32 %v267_v60, 16  ;;  %v1138_v10 = vshll.u32 %v267_v60, 16 }
  0x1c   : > { %v2586_v1 = vld [vmem:[%s3070_s1 + $0x200] sm:$0xff]   ;;  %v2587_v3 = vld [vmem:[%s2754_s11 + $0x38] ss:$24 sps:$4 sm:$0xff]   ;;  %v2590_v9 = vld [vmem:[%s3070_s1 + $0x208] sm:$0xff]   ;;  %v1109_v14 = vrot.slane %v1107_v2, 4  ;;  %v1166_v23 = vshll.u32 %v269_v12, 16 }
  0x1d   : > { %2235 = vmatpush3.bf16.msra.mxu0 %v2535_v17  ;;  %2391 = vmatpush3.bf16.msra.mxu1 %v2534_v16  ;;  %v2588_v5 = vld [vmem:[%s3070_s1 + $0x180] sm:$0xff]   ;;  %v2591_v11 = vld [vmem:[%s3070_s1 + $0x188] sm:$0xff]   ;;  %v2594_v16 = vld [vmem:[%s3070_s1 + $0x1d0] sm:$0xff]   ;;  %v1112_v17 = vrot.slane %v1110_v6, 5 }
  0x1e   : > { %2236 = vmatprep.subr.bf16.mxu0 %v2536_v18  ;;  %2392 = vmatprep.subr.bf16.mxu1 %v2537_v19  ;;  %v271_v13 = vld [vmem:[%s2754_s11 + $0x48] sm:$0xff]  ;;  %v2595_v18 = vld [vmem:[%s3070_s1 + $0x210] sm:$0xff]   ;;  %v2615_v6 = vld [vmem:[%s3070_s1 + $0x1f8] sm:$0xff]  }
  0x1f   : > { %v2066_v15 = vcombine.high %v269_v12, %v271_v13  ;;  %v2065_v24 = vcombine.low %v269_v12, %v271_v13  ;;  %v2607_v59 = vld [vmem:[%s3070_s1 + $0x1a8] sm:$0xff]   ;;  %vm2963_vm2 = vmor %vm1103_vm0, %vm1104_vm1 }
  0x21   : > { %2237 = vmatpush3.bf16.msra.mxu0 %v2538_v20  ;;  %2393 = vmatpush3.bf16.msra.mxu1 %v2537_v19  ;;  %v1137_v19 = vrot.slane %v1135_v8, 4  ;;  %v1140_v20 = vrot.slane %v1138_v10, 5  ;;  %v1077_v10 = vld [vmem:[%s2754_s11 + $0x24] sm:$0x11] }
  0x22   : > { %2238 = vmatprep.subr.bf16.mxu0 %v2539_v21  ;;  %2394 = vmatprep.subr.bf16.mxu1 %v2540_v22  ;;  %v1163_v21 = vshrl.u32 %v269_v12, 16 }
  0x25   : > { %2239 = vmatpush3.bf16.msra.mxu0 %v2541_v25  ;;  %2395 = vmatpush3.bf16.msra.mxu1 %v2540_v22  ;;  %v2596_v22 = vld [vmem:[%s3070_s1 + $0x190] sm:$0xff]   ;;  %v2597_v25 = vld [vmem:[%s3070_s1 + $0x1d8] sm:$0xff]  }
  0x26   : > { %2276 = vmatprep.subr.bf16.mxu0 %v2546_v26  ;;  %2404 = vmatprep.subr.bf16.mxu1 %v2547_v28  ;;  %v1165_v26 = vrot.slane %v1163_v21, 4 }
  0x28   : > { %636 = vmatmul.mubr.bf16.vlgmr.msra.gmra.mrb[0].mxu0 %v2542_v27  ;;  %2397 = vmatmul.mubr.bf16.vlgmr.msra.gmra.mrb[0].mxu1 %v2548_v29  ;;  %v2598_v27 = vld [vmem:[%s3070_s1 + $0x218] sm:$0xff]   ;;  %v1113_v29 = vor.u32 %v1112_v17, %v1109_v14  ;;  %v1144_v14 = vshll.u32 %v1077_v10, 16  ;;  %v1090_v10 = vld [vmem:[%s2754_s11 + $0x74] sm:$0x1] }
  0x29   : > { %2277 = vmatpush3.bf16.msra.mxu0 %v2549_v30  ;;  %2405 = vmatpush3.bf16.msra.mxu1 %v2547_v28  ;;  %v273_v28 = vld [vmem:[%s2754_s11 + $0x60] sm:$0xff]  ;;  %v1168_v30 = vrot.slane %v1166_v23, 5  ;;  %v2617_v17 = vld [vmem:[%s3070_s1 + $0x1b8] sm:$0xff]  }
  0x2a   : > { %2278 = vmatprep.subr.bf16.mxu0 %v2550_v31  ;;  %2406 = vmatprep.subr.bf16.mxu1 %v2551_v32  ;;  %v275_v31 = vld [vmem:[%s2754_s11 + $0x78] sm:$0xff] }
  0x2b   : > { %643 = vmatprep.mubr.bf16.mxu0 %v2553_v33  ;;  %2400 = vmatprep.mubr.bf16.mxu1 %v2574_v51  ;;  %v2599_v33 = vld [vmem:[%s3070_s1 + $0x198] sm:$0xff]   ;;  %v1219_v51 = vshrl.u32 %v273_v28, 16 }
  0x2d   : > { %2279 = vmatpush3.bf16.msra.mxu0 %v2552_v34  ;;  %2407 = vmatpush3.bf16.msra.mxu1 %v2551_v32  ;;  %v1191_v32 = vshrl.u32 %v271_v13, 16  ;;  %v2069_v34 = vcombine.high %v273_v28, %v275_v31  ;;  %v1221_v60 = vrot.slane %v1219_v51, 4 }
  0x2e   : > { %2280 = vmatprep.subr.bf16.mxu0 %v2556_v35  ;;  %2408 = vmatprep.subr.bf16.mxu1 %v2557_v36  ;;  %v1141_v35 = vor.u32 %v1140_v20, %v1137_v19  ;;  %v1076_v19 = vld [vmem:[%s2754_s11 + $0x20] sm:$0xf]  ;;  %v1078_v20 = vld [vmem:[%s2754_s11 + $0x2c] sm:$0x1] }
  0x30   : > { %644 = vmatmul.mubr.bf16.gmra.mrb[4].mxu0 %v2555_v37  ;;  %2401 = vmatmul.mubr.bf16.gmra.mrb[4].mxu1 %v2577_v54  ;;  %v2602_v37 = vld [vmem:[%s3070_s1 + $0x1e0] sm:$0xff]   ;;  %v2611_v54 = vld [vmem:[%s2754_s11 + $0x98] ss:$24 sps:$4 sm:$0xff]  }
  0x31   : > { %2281 = vmatpush3.bf16.msra.mxu0 %v2558_v38  ;;  %2409 = vmatpush3.bf16.msra.mxu1 %v2557_v36  ;;  %v1194_v36 = vshll.u32 %v271_v13, 16  ;;  %v1169_v38 = vor.u32 %v1168_v30, %v1165_v26 }
  0x32   : > { %2282 = vmatprep.subr.bf16.mxu0 %v2559_v39  ;;  %2410 = vmatprep.subr.bf16.mxu1 %v2560_v40  ;;  %v2603_v39 = vld [vmem:[%s3070_s1 + $0x220] sm:$0xff]  }
  0x33   : > { %651 = vmatprep.mubr.bf16.mxu0 %v2562_v41  ;;  %2420 = vmatprep.mubr.bf16.mxu1 %v2584_v62  ;;  %v1193_v41 = vrot.slane %v1191_v32, 4  ;;  %v1158_v32 = vshll.u32 %v1078_v20, 16 }
  0x35   : > { %2283 = vmatpush3.bf16.msra.mxu0 %v2561_v42  ;;  %2411 = vmatpush3.bf16.msra.mxu1 %v2560_v40  ;;  %v2899_v40 = vrot.slane %v1113_v29, 4  ;;  %v1196_v42 = vrot.slane %v1194_v36, 5 }
  0x36   : > { %2284 = vmatprep.subr.bf16.mxu0 %v2565_v43  ;;  %2412 = vmatprep.subr.bf16.mxu1 %v2566_v45  ;;  %v2604_v43 = vld [vmem:[%s3070_s1 + $0x1a0] sm:$0xff]  }
  0x38   : > { %652 = vmatmul.mubr.bf16.gmra.mrb[8].mxu0 %v2564_v44  ;;  %v2904_v44 = vrot.slane %v1141_v35, 4 }
  0x39   : > { %2285 = vmatpush3.bf16.msra.mxu0 %v2567_v46  ;;  %2413 = vmatpush3.bf16.msra.mxu1 %v2566_v45  ;;  %v2068_v45 = vcombine.low %v273_v28, %v275_v31  ;;  %v2605_v46 = vld [vmem:[%s3070_s1 + $0x1e8] sm:$0xff]  }
  0x3a   : > { %2286 = vmatprep.subr.bf16.mxu0 %v2568_v47  ;;  %2414 = vmatprep.subr.bf16.mxu1 %v2569_v48  ;;  %v2606_v47 = vld [vmem:[%s3070_s1 + $0x228] sm:$0xff]  }
  0x3b   : > { %659 = vmatprep.mubr.bf16.mxu0 %v2571_v49  ;;  %v2916_v49 = vld [vmem:[%s2754_s11 + $0xa8] sm:$0xff] }
  0x3d   : > { %2287 = vmatpush3.bf16.msra.mxu0 %v2570_v50  ;;  %2415 = vmatpush3.bf16.msra.mxu1 %v2569_v48  ;;  %v2913_v48 = vld [vmem:[%s2754_s11 + $0x90] sm:$0xff]  ;;  %v2918_v50 = vrot.slane %v1169_v38, 4 }
  0x3e   : > { %2288 = vmatprep.subr.bf16.mxu0 %v2575_v52  ;;  %2416 = vmatprep.subr.bf16.mxu1 %v2576_v53  ;;  %v1222_v52 = vshll.u32 %v273_v28, 16  ;;  %v1275_v8 = vshrl.u32 %v2913_v48, 16  ;;  %v1278_v12 = vshll.u32 %v2913_v48, 16  ;;  %v1080_v28 = vld [vmem:[%s2754_s11 + $0x38] sm:$0xf] }
  0x3f   : > { %v1084_v38 = vld [vmem:[%s2754_s11 + $0x50] sm:$0xf]  ;;  %v1180_v51 = vshll.u32 %v1080_v28, 16 }
  0x40   : > { %660 = vmatmul.mubr.bf16.gmra.mrb[12].mxu0 %v2573_v55  ;;  %v1197_v55 = vor.u32 %v1196_v42, %v1193_v41  ;;  %v1224_v62 = vrot.slane %v1222_v52, 5 }
  0x41   : > { %2289 = vmatpush3.bf16.msra.mxu0 %v2578_v56  ;;  %2417 = vmatpush3.bf16.msra.mxu1 %v2576_v53  ;;  %v2609_v53 = vld [vmem:[%s2754_s11 + $0x68] ss:$24 sps:$4 sm:$0xff]   ;;  %v2072_v56 = vcombine.high %v2913_v48, %v2916_v49 }
  0x42   : > { %2290 = vmatprep.subr.bf16.mxu0 %v2579_v57  ;;  %2418 = vmatprep.subr.bf16.mxu1 %v2580_v58  ;;  %v1247_v57 = vshrl.u32 %v275_v31, 16  ;;  %v1225_v2 = vor.u32 %v1224_v62, %v1221_v60 }
  0x43   : > { %973 = vmatprep.mubr.bf16.mxu0 %v2063_v61  ;;  %v2612_v61 = vld [vmem:[%s3070_s1 + $0x1f0] sm:$0xff]  }
  0x45   : > { %2291 = vmatpush3.bf16.msra.mxu0 %v2581_v63  ;;  %2419 = vmatpush3.bf16.msra.mxu1 %v2580_v58  ;;  %v1250_v58 = vshll.u32 %v275_v31, 16  ;;  %v2613_v63 = vld [vmem:[%s3070_s1 + $0x230] sm:$0xff]   ;;  %v1152_v31 = vshll.u32 %v1076_v19, 16 }
  0x46   : > { %2328 = vmatprep.subr.bf16.mxu0 %v2585_v0  ;;  %2428 = vmatprep.subr.bf16.mxu1 %v2586_v1  ;;  %v2933_v0 = vrot.slane %v1197_v55, 4  ;;  %v1208_v55 = vshll.u32 %v1084_v38, 16 }
  0x48   : > { %974 = vmatmul.mubr.bf16.vlgmr.msra.gmra.mrb[16].mxu0 %v2062_v4  ;;  %2421 = vmatmul.mubr.bf16.vlgmr.msra.gmra.mrb[0].mxu1 %v2587_v3  ;;  %v2938_v3 = vrot.slane %v1247_v57, 4  ;;  %v2940_v4 = vrot.slane %v1250_v58, 5  ;;  %v1182_v58 = vrot.slane %v1180_v51, 5 }
  0x49   : > { %2329 = vmatpush3.bf16.msra.mxu0 %v2588_v5  ;;  %2429 = vmatpush3.bf16.msra.mxu1 %v2586_v1  ;;  %v2614_v1 = vld [vmem:[%s3070_s1 + $0x1b0] sm:$0xff]   ;;  %v2071_v5 = vcombine.low %v2913_v48, %v2916_v49 }
  0x4a   : > { %2330 = vmatprep.subr.bf16.mxu0 %v2589_v7  ;;  %2430 = vmatprep.subr.bf16.mxu1 %v2590_v9  ;;  %v2616_v7 = vld [vmem:[%s3070_s1 + $0x238] sm:$0xff]   ;;  %v1253_v23 = vor.u32 %v2940_v4, %v2938_v3  ;;  %v1303_v4 = vshrl.u32 %v2916_v49, 16 }
  0x4b   : > { %981 = vmatprep.mubr.bf16.mxu0 %v2066_v15  ;;  %2424 = vmatprep.mubr.bf16.mxu1 %v2609_v53  ;;  %v1072_v15 = vld [vmem:[%s2754_s11 + $0x8] sm:$0xf]  ;;  %v1081_v53 = vld [vmem:[%s2754_s11 + $0x3c] sm:$0x11] }
  0x4c   : > { %v1121_v21 = vshrl.u32 %v1072_v15, 16 }
  0x4d   : > { %2331 = vmatpush3.bf16.msra.mxu0 %v2591_v11  ;;  %2431 = vmatpush3.bf16.msra.mxu1 %v2590_v9  ;;  %v1073_v9 = vld [vmem:[%s2754_s11 + $0xc] sm:$0x11]  ;;  %v2953_v11 = vrot.slane %v1225_v2, 4  ;;  %v1210_v2 = vrot.slane %v1208_v55, 5 }
  0x4e   : > { %2332 = vmatprep.subr.bf16.mxu0 %v2594_v16  ;;  %2432 = vmatprep.subr.bf16.mxu1 %v2595_v18  ;;  %v1116_v13 = vshll.u32 %v1073_v9, 16  ;;  %v1074_v16 = vld [vmem:[%s2754_s11 + $0x14] sm:$0x1]  ;;  %v1123_v29 = vrot.slane %v1121_v21, 4 }
  0x4f   : > { %v1130_v26 = vshll.u32 %v1074_v16, 16 }
  0x50   : > { %982 = vmatmul.mubr.bf16.gmra.mrb[20].mxu0 %v2065_v24  ;;  %2425 = vmatmul.mubr.bf16.gmra.mrb[4].mxu1 %v2611_v54  ;;  %v1118_v24 = vrot.slane %v1116_v13, 5 }
  0x51   : > { %2333 = vmatpush3.bf16.msra.mxu0 %v2596_v22  ;;  %2433 = vmatpush3.bf16.msra.mxu1 %v2595_v18  ;;  %v1124_v22 = vshll.u32 %v1072_v15, 16  ;;  %v1132_v36 = vrot.slane %v1130_v26, 5  ;;  %v1092_v15 = vld [vmem:[%s2754_s11 + $0x80] sm:$0xf] }
  0x52   : > { %2334 = vmatprep.subr.bf16.mxu0 %v2597_v25  ;;  %2434 = vmatprep.subr.bf16.mxu1 %v2598_v27  ;;  %v1146_v25 = vrot.slane %v1144_v14, 5 }
  0x53   : > { %989 = vmatprep.mubr.bf16.mxu0 %v2069_v34  ;;  %v1126_v30 = vrot.slane %v1124_v22, 5  ;;  %v1119_v34 = vsel %vm2963_vm2, %v2899_v40, %v1118_v24 }
  0x54   : > { %v1147_v35 = vsel %vm2963_vm2, %v2904_v44, %v1146_v25  ;;  %v1205_v44 = vshrl.u32 %v1084_v38, 16  ;;  %v1094_v25 = vld [vmem:[%s2754_s11 + $0x8c] sm:$0x1]  ;;  %v1098_v38 = vld [vmem:[%s2754_s11 + $0xa4] sm:$0x1] }
  0x55   : > { %2335 = vmatpush3.bf16.msra.mxu0 %v2599_v33  ;;  %2435 = vmatpush3.bf16.msra.mxu1 %v2598_v27  ;;  %v1149_v27 = vshrl.u32 %v1076_v19, 16  ;;  %v1082_v33 = vld [vmem:[%s2754_s11 + $0x44] sm:$0x1]  ;;  %v2147_v41 = vcombine.high %v1119_v34, %v1147_v35  ;;  %v1127_v42 = vor.u32 %v1126_v30, %v1123_v29 }
  0x56   : > { %2336 = vmatprep.subr.bf16.mxu0 %v2602_v37  ;;  %2436 = vmatprep.subr.bf16.mxu1 %v2603_v39  ;;  %v1186_v52 = vshll.u32 %v1082_v33, 16  ;;  %v1096_v33 = vld [vmem:[%s2754_s11 + $0x98] sm:$0xf] }
  0x57   : > { %v1151_v37 = vrot.slane %v1149_v27, 4  ;;  %v1128_v40 = vrot.slane %v1127_v42, 4  ;;  %v1292_v51 = vshll.u32 %v1096_v33, 16 }
  0x58   : > { %990 = vmatmul.mubr.bf16.gmra.mrb[24].mxu0 %v2068_v45  ;;  %v1086_v45 = vld [vmem:[%s2754_s11 + $0x5c] sm:$0x1] }
  0x59   : > { %2337 = vmatpush3.bf16.msra.mxu0 %v2604_v43  ;;  %2437 = vmatpush3.bf16.msra.mxu1 %v2603_v39  ;;  %v2146_v39 = vcombine.low %v1119_v34, %v1147_v35  ;;  %v1154_v43 = vrot.slane %v1152_v31, 5  ;;  %v1214_v60 = vshll.u32 %v1086_v45, 16  ;;  %v1133_v62 = vsel %vm2963_vm2, %v1128_v40, %v1132_v36 }
  0x5a   : > { %2338 = vmatprep.subr.bf16.mxu0 %v2605_v46  ;;  %2438 = vmatprep.subr.bf16.mxu1 %v2606_v47  ;;  %v1160_v46 = vrot.slane %v1158_v32, 5  ;;  %v1261_v32 = vshrl.u32 %v1092_v15, 16  ;;  %v1298_v40 = vshll.u32 %v1098_v38, 16 }
  0x5b   : > { %997 = vmatprep.mubr.bf16.mxu0 %v2072_v56  ;;  %v1155_v54 = vor.u32 %v1154_v43, %v1151_v37  ;;  %v1085_v56 = vld [vmem:[%s2754_s11 + $0x54] sm:$0x11]  ;;  %v1264_v43 = vshll.u32 %v1092_v15, 16 }
  0x5c   : > { %v1200_v9 = vshll.u32 %v1085_v56, 16  ;;  %v1263_v42 = vrot.slane %v1261_v32, 4 }
  0x5d   : > { %2339 = vmatpush3.bf16.msra.mxu0 %v2607_v59  ;;  %2439 = vmatpush3.bf16.msra.mxu1 %v2606_v47  ;;  %v1177_v47 = vshrl.u32 %v1080_v28, 16  ;;  %v1188_v59 = vrot.slane %v1186_v52, 5  ;;  %v1242_v28 = vshll.u32 %v1090_v10, 16  ;;  %v1266_v52 = vrot.slane %v1264_v43, 5 }
  0x5e   : > { %2340 = vmatprep.subr.bf16.mxu0 %v2612_v61  ;;  %2440 = vmatprep.subr.bf16.mxu1 %v2613_v63  ;;  %v1088_v61 = vld [vmem:[%s2754_s11 + $0x68] sm:$0xf]  ;;  %v1202_v22 = vrot.slane %v1200_v9, 5 }
  0x5f   : > { %v1179_v57 = vrot.slane %v1177_v47, 4  ;;  %v1233_v16 = vshrl.u32 %v1088_v61, 16  ;;  %v1244_v37 = vrot.slane %v1242_v28, 5  ;;  %v1289_v47 = vshrl.u32 %v1096_v33, 16 }
  0x60   : > { %998 = vmatmul.mubr.bf16.gmra.mrb[28].mxu0 %v2071_v5  ;;  %v1203_v31 = vsel %vm2963_vm2, %v2933_v0, %v1202_v22 }
  0x61   : > { %2341 = vmatpush3.bf16.msra.mxu0 %v2614_v1  ;;  %2441 = vmatpush3.bf16.msra.mxu1 %v2613_v63  ;;  %v1156_v63 = vrot.slane %v1155_v54, 4  ;;  %v1207_v1 = vrot.slane %v1205_v44, 4  ;;  %v1183_v5 = vor.u32 %v1182_v58, %v1179_v57  ;;  %v1235_v26 = vrot.slane %v1233_v16, 4  ;;  %v1089_v44 = vld [vmem:[%s2754_s11 + $0x6c] sm:$0x11] }
  0x62   : > { %2342 = vmatprep.subr.bf16.mxu0 %v2615_v6  ;;  %2442 = vmatprep.subr.bf16.mxu1 %v2616_v7  ;;  %v1216_v6 = vrot.slane %v1214_v60, 5  ;;  %v1291_v56 = vrot.slane %v1289_v47, 4  ;;  %v1294_v57 = vrot.slane %v1292_v51, 5  ;;  %v1267_v60 = vor.u32 %v1266_v52, %v1263_v42 }
  0x63   : > { %1603 = vmatprep.mubr.bf16.mxu0 %v2147_v41  ;;  %v1161_v13 = vsel %vm2963_vm2, %v1156_v63, %v1160_v46  ;;  %v1211_v14 = vor.u32 %v1210_v2, %v1207_v1  ;;  %v1184_v20 = vrot.slane %v1183_v5, 4  ;;  %v1102_v46 = vld [vmem:[%s2754_s11 + $0xbc] sm:$0x1]  ;;  %v1228_v5 = vshll.u32 %v1089_v44, 16 }
  0x64   : > { %v2148_v19 = vcombine.low %v1133_v62, %v1161_v13  ;;  %v1326_v63 = vshll.u32 %v1102_v46, 16  ;;  %v1295_v1 = vor.u32 %v1294_v57, %v1291_v56  ;;  %v1268_v9 = vrot.slane %v1267_v60, 4 }
  0x65   : > { %2343 = vmatpush3.bf16.msra.mxu0 %v2617_v17  ;;  %2443 = vmatpush3.bf16.msra.mxu1 %v2616_v7  ;;  %v1172_v7 = vshll.u32 %v1081_v53, 16  ;;  %v1236_v17 = vshll.u32 %v1088_v61, 16  ;;  %v1212_v24 = vrot.slane %v1211_v14, 4  ;;  %v1189_v29 = vsel %vm2963_vm2, %v1184_v20, %v1188_v59  ;;  %v1093_v59 = vld [vmem:[%s2754_s11 + $0x84] sm:$0x11] }
  0x66   : > { %2444 = vmatprep.mubr.bf16.mxu1 %v2148_v19  ;;  %v1300_v61 = vrot.slane %v1298_v40, 5  ;;  %v1328_v10 = vrot.slane %v1326_v63, 5  ;;  %v1256_v13 = vshll.u32 %v1093_v59, 16  ;;  %v1277_v14 = vrot.slane %v1275_v8, 4 }
  0x67   : > { %v1174_v21 = vrot.slane %v1172_v7, 5  ;;  %v1238_v27 = vrot.slane %v1236_v17, 5  ;;  %v1217_v34 = vsel %vm2963_vm2, %v1212_v24, %v1216_v6  ;;  %v1254_v6 = vrot.slane %v1253_v23, 4  ;;  %v1097_v7 = vld [vmem:[%s2754_s11 + $0x9c] sm:$0x11] }
  0x68   : > { %1604 = vmatmul.mubr.bf16.vlgmr.msra.gmra.mrb[32].mxu0 %v2146_v39  ;;  %v1100_v39 = vld [vmem:[%s2754_s11 + $0xb0] sm:$0xf]  ;;  %v2151_v41 = vcombine.low %v1189_v29, %v1217_v34  ;;  %v1296_v15 = vrot.slane %v1295_v1, 4  ;;  %v1230_v17 = vrot.slane %v1228_v5, 5  ;;  %v1280_v19 = vrot.slane %v1278_v12, 5 }
  0x69   : > { %v1175_v30 = vsel %vm2963_vm2, %v2918_v50, %v1174_v21  ;;  %v1239_v36 = vor.u32 %v1238_v27, %v1235_v26  ;;  %v1270_v50 = vshll.u32 %v1094_v25, 16  ;;  %v1317_v54 = vshrl.u32 %v1100_v39, 16  ;;  %v1101_v25 = vld [vmem:[%s2754_s11 + $0xb4] sm:$0x11]  ;;  %s1961_s11 = sshll.u32 %s3080_s12, 1 }
  0x6a   : > { %v2150_v35 = vcombine.high %v1175_v30, %v1203_v31  ;;  %v2149_v0 = vcombine.low %v1175_v30, %v1203_v31  ;;  %2445 = vmatmul.mubr.bf16.vlgmr.msra.gmra.mrb[0].mxu1 %v2151_v41  ;;  %v1320_v58 = vshll.u32 %v1100_v39, 16  ;;  %v1258_v21 = vrot.slane %v1256_v13, 5  ;;  %s3039_s5 = scalar_lea.vmem %s3072_s3, %s1961_s11 }
  0x6b   : > { %v1240_v45 = vrot.slane %v1239_v36, 4  ;;  %v1272_v53 = vrot.slane %v1270_v50, 5  ;;  %v1319_v62 = vrot.slane %v1317_v54, 4  ;;  %v1284_v3 = vshll.u32 %v1097_v7, 16 }
  0x6c   : > { %1611 = vmatprep.mubr.bf16.mxu0 %v2150_v35  ;;  %v1322_v2 = vrot.slane %v1320_v58, 5  ;;  %v1301_v22 = vsel %vm2963_vm2, %v1296_v15, %v1300_v61  ;;  %v1231_v8 = vsel %vm2963_vm2, %v2953_v11, %v1230_v17  ;;  %v1259_v48 = vsel %vm2963_vm2, %v1254_v6, %v1258_v21 }
  0x6d   : > { %v1245_v55 = vsel %vm2963_vm2, %v1240_v45, %v1244_v37  ;;  %v1273_v20 = vsel %vm2963_vm2, %v1268_v9, %v1272_v53  ;;  %v1281_v12 = vor.u32 %v1280_v19, %v1277_v14  ;;  %v1305_v26 = vrot.slane %v1303_v4, 4 }
  0x6e   : > { %v1323_v16 = vor.u32 %v1322_v2, %v1319_v62  ;;  %v2154_v23 = vcombine.low %v1245_v55, %v1273_v20  ;;  %v2153_v28 = vcombine.high %v1231_v8, %v1259_v48  ;;  %v2152_v29 = vcombine.low %v1231_v8, %v1259_v48 }
  0x6f   : > { %v1306_v30 = vshll.u32 %v2916_v49, 16  ;;  %v1312_v32 = vshll.u32 %v1101_v25, 16  ;;  %v1282_v33 = vrot.slane %v1281_v12, 4  ;;  %v1286_v11 = vrot.slane %v1284_v3, 5 }
  0x70   : > { %1612 = vmatmul.mubr.bf16.gmra.mrb[36].mxu0 %v2149_v0  ;;  %v1324_v24 = vrot.slane %v1323_v16, 4  ;;  %2448 = vmatprep.mubr.bf16.mxu1 %v2154_v23  ;;  %v2642_v42 = vmov 0.0  }
  0x71   : > { %1619 = vmatprep.mubr.bf16.mxu0 %v2153_v28  ;;  %v1308_v34 = vrot.slane %v1306_v30, 5  ;;  %v1314_v36 = vrot.slane %v1312_v32, 5  ;;  %v1287_v37 = vsel %vm2963_vm2, %v1282_v33, %v1286_v11  ;;  %1753 = vst [vmem:[%s3039_s5] sm:$0x3] %v2642_v42 }
  0x72   : > { %v1329_v27 = vsel %vm2963_vm2, %v1324_v24, %v1328_v10 }
  0x73   : > { %v2157_v31 = vcombine.low %v1301_v22, %v1329_v27  ;;  %v1309_v35 = vor.u32 %v1308_v34, %v1305_v26 }
  0x75   : > { %2449 = vmatmul.mubr.bf16.gmra.mrb[4].mxu1 %v2157_v31  ;;  %v1310_v38 = vrot.slane %v1309_v35, 4 }
  0x77   : > { %v1315_v39 = vsel %vm2963_vm2, %v1310_v38, %v1314_v36 }
  0x78   : > { %1620 = vmatmul.mubr.bf16.gmra.mrb[40].mxu0 %v2152_v29  ;;  %v2156_v41 = vcombine.high %v1287_v37, %v1315_v39  ;;  %v2155_v49 = vcombine.low %v1287_v37, %v1315_v39 }
  0x7a   : > { %1627 = vmatprep.mubr.bf16.mxu0 %v2156_v41 }
  0x80   : > { %1628 = vmatmul.mubr.bf16.gmra.mrb[44].mxu0 %v2155_v49 }
  0xfb   : > { %v2240_v43 = vpop.f32.mrb[0].mxu0 }
  0xfc   : > { %v2241_v50 = vpop.f32.mrb[1].mxu0 }
  0xfd   : > { %v2242_v45 = vadd.f32 %v2241_v50, %v2240_v43  ;;  %v2243_v0 = vpop.f32.mrb[2].mxu0 }
  0xfe   : > { %v2244_v46 = vpop.f32.mrb[3].mxu0 }
  0xff   : > { %v2245_v18 = vadd.f32 %v2244_v46, %v2243_v0 }
 0x103   : > { %v2246_v47 = vpop.f32.mrb[4].mxu0 }
 0x104   : > { %v2247_v51 = vpop.f32.mrb[5].mxu0 }
 0x105   : > { %v2248_v52 = vadd.f32 %v2247_v51, %v2246_v47  ;;  %v2249_v53 = vpop.f32.mrb[6].mxu0 }
 0x106   : > { %v2250_v40 = vpop.f32.mrb[7].mxu0 }
 0x107   : > { %v2251_v54 = vadd.f32 %v2250_v40, %v2249_v53 }
 0x10b   : > { %v2252_v44 = vpop.f32.mrb[8].mxu0 }
 0x10c   : > { %v2253_v55 = vpop.f32.mrb[9].mxu0 }
 0x10d   : > { %v2254_v56 = vadd.f32 %v2253_v55, %v2252_v44  ;;  %v2255_v57 = vpop.f32.mrb[10].mxu0 }
 0x10e   : > { %v2256_v58 = vpop.f32.mrb[11].mxu0 }
 0x10f   : > { %v2257_v59 = vadd.f32 %v2256_v58, %v2255_v57 }
 0x113   : > { %v2258_v60 = vpop.f32.mrb[12].mxu0 }
 0x114   : > { %v2259_v61 = vpop.f32.mrb[13].mxu0 }
 0x115   : > { %v2260_v62 = vadd.f32 %v2259_v61, %v2258_v60  ;;  %v2261_v63 = vpop.f32.mrb[14].mxu0 }
 0x116   : > { %v2262_v1 = vpop.f32.mrb[15].mxu0 }
 0x117   : > { %v2263_v2 = vadd.f32 %v2262_v1, %v2261_v63 }
 0x11b   : > { %v2292_v5 = vpop.f32.mrb[16].mxu0 }
 0x11c   : > { %v2293_v6 = vpop.f32.mrb[17].mxu0 }
 0x11d   : > { %v2294_v7 = vadd.f32 %v2293_v6, %v2292_v5  ;;  %v2295_v9 = vpop.f32.mrb[18].mxu0 }
 0x11e   : > { %v2296_v10 = vpop.f32.mrb[19].mxu0 }
 0x11f   : > { %v2455_v13 = vadd.f32 %v2294_v7, %v2242_v45  ;;  %v2297_v14 = vadd.f32 %v2296_v10, %v2295_v9 }
 0x121   : > { %v2461_v15 = vadd.f32 %v2297_v14, %v2245_v18 }
 0x123   : > { %v2298_v16 = vpop.f32.mrb[20].mxu0 }
 0x124   : > { %v2299_v17 = vpop.f32.mrb[21].mxu0 }
 0x125   : > { %v2300_v19 = vadd.f32 %v2299_v17, %v2298_v16  ;;  %v2301_v20 = vpop.f32.mrb[22].mxu0 }
 0x126   : > { %v2302_v21 = vpop.f32.mrb[23].mxu0 }
 0x127   : > { %v2452_v3 = vadd.f32 %v2300_v19, %v2248_v52  ;;  %v2303_v4 = vadd.f32 %v2302_v21, %v2301_v20 }
 0x129   : > { %v2458_v23 = vadd.f32 %v2303_v4, %v2251_v54 }
 0x12b   : > { %v2304_v22 = vpop.f32.mrb[24].mxu0 }
 0x12c   : > { %v2305_v24 = vpop.f32.mrb[25].mxu0 }
 0x12d   : > { %v2306_v8 = vadd.f32 %v2305_v24, %v2304_v22  ;;  %v2307_v25 = vpop.f32.mrb[26].mxu0 }
 0x12e   : > { %v2308_v48 = vpop.f32.mrb[27].mxu0 }
 0x12f   : > { %v2467_v12 = vadd.f32 %v2306_v8, %v2254_v56  ;;  %v2309_v26 = vadd.f32 %v2308_v48, %v2307_v25 }
 0x131   : > { %v2473_v27 = vadd.f32 %v2309_v26, %v2257_v59 }
 0x133   : > { %v2310_v28 = vpop.f32.mrb[28].mxu0 }
 0x134   : > { %v2311_v29 = vpop.f32.mrb[29].mxu0 }
 0x135   : > { %v2312_v30 = vadd.f32 %v2311_v29, %v2310_v28  ;;  %v2313_v31 = vpop.f32.mrb[30].mxu0 }
 0x136   : > { %v2314_v32 = vpop.f32.mrb[31].mxu0 }
 0x137   : > { %v3042_v33 = vadd.f32 %v2312_v30, %v2260_v62  ;;  %v2315_v11 = vadd.f32 %v2314_v32, %v2313_v31 }
 0x139   : > { %v3044_v34 = vadd.f32 %v2315_v11, %v2263_v2 }
 0x13b   : > { %v2344_v35 = vpop.f32.mrb[32].mxu0 }
 0x13c   : > { %v2345_v36 = vpop.f32.mrb[33].mxu0 }
 0x13d   : > { %v2346_v37 = vadd.f32 %v2345_v36, %v2344_v35  ;;  %v2347_v38 = vpop.f32.mrb[34].mxu0  ;;  %v2446_v43 = vpop.f32.mrb[0].mxu1 }
 0x13e   : > { %v2348_v39 = vpop.f32.mrb[35].mxu0  ;;  %v1670_v50 = vpop.f32.mrb[1].mxu1 }
 0x13f   : > { %v2456_v41 = vadd.f32 %v2455_v13, %v2346_v37  ;;  %v2349_v49 = vadd.f32 %v2348_v39, %v2347_v38  ;;  %v2447_v46 = vpop.f32.mrb[2].mxu1 }
 0x140   : > { %v1673_v47 = vpop.f32.mrb[3].mxu1 }
 0x141   : > { %v2462_v42 = vadd.f32 %v2461_v15, %v2349_v49  ;;  %v2457_v0 = vadd.f32 %v2456_v41, %v1670_v50 }
 0x143   : > { %v2350_v45 = vpop.f32.mrb[36].mxu0  ;;  %v2463_v53 = vadd.f32 %v2462_v42, %v1673_v47  ;;  %v1768_v55 = vmul.f32 %v2457_v0, %v2457_v0 }
 0x144   : > { %v2351_v18 = vpop.f32.mrb[37].mxu0 }
 0x145   : > { %v2352_v51 = vadd.f32 %v2351_v18, %v2350_v45  ;;  %v2353_v52 = vpop.f32.mrb[38].mxu0  ;;  %v2204_v56 = vpack.c.bf16 %v2463_v53, %v2457_v0  ;;  %v1755_v57 = vadd.f32 %v2463_v53, %v2457_v0  ;;  %v1769_v58 = vmul.f32 %v2463_v53, %v2463_v53 }
 0x146   : > { %v2354_v40 = vpop.f32.mrb[39].mxu0 }
 0x147   : > { %v2453_v54 = vadd.f32 %v2452_v3, %v2352_v51  ;;  %v2355_v44 = vadd.f32 %v2354_v40, %v2353_v52  ;;  %2205 = vst [vmem:[%s3050_s9] sm:$0xff] %v2204_v56   ;;  %v1776_v61 = vadd.f32 %v1769_v58, %v1768_v55 }
 0x148   : > { %v2450_v9 = vpop.f32.mrb[4].mxu1 }
 0x149   : > { %v2454_v59 = vadd.f32 %v2453_v54, %v2446_v43  ;;  %v2459_v60 = vadd.f32 %v2458_v23, %v2355_v44  ;;  %v1686_v13 = vpop.f32.mrb[5].mxu1  ;;  %v1754_v44 = vld [vmem:[%s3039_s5] sm:$0x3] }
 0x14a   : > { %v2451_v16 = vpop.f32.mrb[6].mxu1 }
 0x14b   : > { %v1756_v62 = vadd.f32 %v2454_v59, %v1755_v57  ;;  %v1770_v63 = vmul.f32 %v2454_v59, %v2454_v59  ;;  %v2460_v1 = vadd.f32 %v2459_v60, %v2447_v46  ;;  %v2356_v10 = vpop.f32.mrb[40].mxu0  ;;  %v1689_v20 = vpop.f32.mrb[7].mxu1 }
 0x14c   : > { %v2357_v15 = vpop.f32.mrb[41].mxu0 }
 0x14d   : > { %v1777_v2 = vadd.f32 %v1776_v61, %v1770_v63  ;;  %v2209_v5 = vpack.c.bf16 %v2460_v1, %v2454_v59  ;;  %v1757_v6 = vadd.f32 %v2460_v1, %v1756_v62  ;;  %v1771_v7 = vmul.f32 %v2460_v1, %v2460_v1  ;;  %v2359_v19 = vpop.f32.mrb[42].mxu0 }
 0x14e   : > { %v2358_v17 = vadd.f32 %v2357_v15, %v2356_v10  ;;  %v2360_v21 = vpop.f32.mrb[43].mxu0 }
 0x14f   : > { %2221 = vst [vmem:[%s3050_s9 + $0x8] sm:$0xff] %v2209_v5   ;;  %v1778_v14 = vadd.f32 %v1777_v2, %v1771_v7  ;;  %v2361_v4 = vadd.f32 %v2360_v21, %v2359_v19 }
 0x150   : > { %v2468_v3 = vadd.f32 %v2467_v12, %v2358_v17 }
 0x151   : > { %v2474_v22 = vadd.f32 %v2473_v27, %v2361_v4 }
 0x152   : > { %v2469_v23 = vadd.f32 %v2468_v3, %v1686_v13 }
 0x153   : > { %v2475_v25 = vadd.f32 %v2474_v22, %v1689_v20  ;;  %v2362_v48 = vpop.f32.mrb[44].mxu0 }
 0x154   : > { %v1758_v24 = vadd.f32 %v2469_v23, %v1757_v6  ;;  %v1772_v8 = vmul.f32 %v2469_v23, %v2469_v23  ;;  %v2363_v31 = vpop.f32.mrb[45].mxu0 }
 0x155   : > { %v2214_v28 = vpack.c.bf16 %v2475_v25, %v2469_v23  ;;  %v1773_v30 = vmul.f32 %v2475_v25, %v2475_v25  ;;  %v2364_v32 = vadd.f32 %v2363_v31, %v2362_v48  ;;  %v2365_v11 = vpop.f32.mrb[46].mxu0 }
 0x156   : > { %v1779_v26 = vadd.f32 %v1778_v14, %v1772_v8  ;;  %v1759_v29 = vadd.f32 %v2475_v25, %v1758_v24  ;;  %v2366_v36 = vpop.f32.mrb[47].mxu0 }
 0x157   : > { %2222 = vst [vmem:[%s3050_s9 + $0x10] sm:$0xff] %v2214_v28   ;;  %v2465_v12 = vadd.f32 %v3042_v33, %v2364_v32  ;;  %v2367_v37 = vadd.f32 %v2366_v36, %v2365_v11 }
 0x158   : > { %v1780_v35 = vadd.f32 %v1779_v26, %v1773_v30 }
 0x159   : > { %v2466_v38 = vadd.f32 %v2465_v12, %v2450_v9  ;;  %v2471_v27 = vadd.f32 %v3044_v34, %v2367_v37 }
 0x15b   : > { %v1760_v39 = vadd.f32 %v2466_v38, %v1759_v29  ;;  %v1774_v41 = vmul.f32 %v2466_v38, %v2466_v38  ;;  %v2472_v49 = vadd.f32 %v2471_v27, %v2451_v16 }
 0x15d   : > { %v1781_v42 = vadd.f32 %v1780_v35, %v1774_v41  ;;  %v2219_v43 = vpack.c.bf16 %v2472_v49, %v2466_v38  ;;  %v1761_v50 = vadd.f32 %v2472_v49, %v1760_v39  ;;  %v1775_v45 = vmul.f32 %v2472_v49, %v2472_v49 }
 0x15f   : > { %2223 = vst [vmem:[%s3050_s9 + $0x18] sm:$0xff] %v2219_v43   ;;  %v1762_v0 = vrot.slane %v1761_v50, 4  ;;  %v1782_v46 = vadd.f32 %v1781_v42, %v1775_v45 }
 0x161   : > { %v1763_v18 = vadd.f32 %v1762_v0, %v1761_v50  ;;  %v1783_v47 = vrot.slane %v1782_v46, 4 }
 0x163   : > { %v1764_v51 = vrot.slane %v1763_v18, 2  ;;  %v1784_v33 = vadd.f32 %v1783_v47, %v1782_v46 }
 0x165   : > { %v1765_v52 = vadd.f32 %v1764_v51, %v1763_v18  ;;  %v1785_v53 = vrot.slane %v1784_v33, 2 }
 0x167   : > { %v1766_v40 = vrot.slane %v1765_v52, 1  ;;  %v1786_v34 = vadd.f32 %v1785_v53, %v1784_v33 }
 0x169   : > { %v1787_v54 = vrot.slane %v1786_v34, 1  ;;  %v1767_v55 = vadd.f32 %v1766_v40, %v1765_v52 }
 0x16b   : > { %v1788_v56 = vadd.f32 %v1787_v54, %v1786_v34 }
 0x16d   : > { %v1790_v57 = vsel %vm1789_vm3, %v1767_v55, %v1788_v56 }
 0x16e   : > { %v1791_v58 = vadd.f32 %v1790_v57, %v1754_v44 }
 0x170   : > { %1792 = vst [vmem:[%s3039_s5] sm:$0x3] %v1791_v58 }
 0x171 PF: > { %s14_s14 = sadd.s32 1, %s2640_s14   ;;  %s3075_s12 = smov %s2636_s13 }
 0x172   : > { %p11_p5 = scmp.ge.s32.totalorder %s14_s14, 4   ;;  %s3076_s13 = smov %s3078_s15 }
 0x174   :  { %13 = sbr.rel (!%p11_p5) target bundleno = 2 (0x2), region = 80 }

// kernel: downsample_block.11
= control target key start
LH: loop header
LB: loop body
LE: loop exit
PB: predicated region body
PF: predicated region fallthrough
CT: control target
= control target key end

     0   :  { %s412_s9 = smov 0   ;;  %s414_s10 = smov 0   ;;  %s453_s0 = inlined_call_operand.vmem [shape: bf16[2,16,128], index: 0, kind: input, shape index: {}]   ;;  %s454_s1 = inlined_call_operand.vmem [shape: f32[2,2,128], index: 1, kind: input, shape index: {}]   ;;  %s455_s2 = inlined_call_operand.vmem [shape: f32[2,16,128], index: 2, kind: output, shape index: {}]  }
   0x1   :  { %s416_s11 = smov 0  }
   0x2 LB: > { %s24_s12 = sadd.s32 1, %s391_s10  ;;  %p333_p0 = scmp.ge.s32.totalorder %s395_s11, 1  ;;  %s395_s11 = sphi %s416_s11, %s12_s11   ;;  %s391_s10 = sphi %s414_s10, %s457_s10   ;;  %s387_s9 = sphi %s412_s9, %s456_s9  }
   0x3   : > { %p26_p1 = scmp.ge.s32.totalorder %s24_s12, 2  ;;  %p142_p2 = scmp.lt.s32.totalorder %s395_s11, 3 }
   0x5   : > { %s459_s12 = smov (%p26_p1, %s24_s12), 0  ;;  %p143_p3 = pnand %p333_p0, %p142_p2 }
   0x6   : > { %p177_p4 = scmp.lt.s32.totalorder (!%p143_p3), %s387_s9, 1  ;;  %v214_v4 = vlaneseq (!%p143_p3) }
   0x7   : > { %146 = sbr.rel (%p143_p3) target bundleno = 48 (0x30), region = 28 }
   0x8   : > { %v215_v7 = vshrl.u32 (!%p143_p3), %v214_v4, 7 }
   0xa   : > { %v216_v9 = vsub.s32 (!%p143_p3), 0, %v215_v7  ;;  %v222_v14 = vsub.s32 (!%p143_p3), 1, %v215_v7 }
   0xe   : > { %s461_s9 = smov (!%p177_p4, %s387_s9), 1 }
   0xf   : > { %s336_s13 = sshll.u32 %s461_s9, 1  ;;  %s341_s17 = sshll.u32 %s461_s9, 3 }
  0x10   : > { %s189_s16 = scalar_lea.vmem %s454_s1, %s336_s13  ;;  %s184_s20 = scalar_lea.vmem %s453_s0, %s341_s17 }
  0x11   : > { %v204_v0 = vld [vmem:[%s189_s16] sm:$0x3]  ;;  %s342_s21 = sshll.u32 %s461_s9, 4 }
  0x12   : > { %v205_v1 = vmul.f32 0.0625, %v204_v0  ;;  %v344_v10 = vld [vmem:[%s184_s20] sm:$0xff]   ;;  %s198_s24 = scalar_lea.vmem %s455_s2, %s342_s21 }
  0x13   : > { %v345_v11 = vunpack.c.l.bf16 %v344_v10  ;;  %v346_v13 = vunpack.c.h.bf16 %v344_v10 }
  0x14   : > { %v206_v2 = vmul.f32 %v205_v1, %v205_v1  ;;  %v217_v12 = vrot.slane %v205_v1, %v216_v9 }
  0x16   : > { %v208_v3 = vrot.slane %v206_v2, 7  ;;  %v218_v15 = vsub.f32 %v345_v11, %v217_v12  ;;  %v219_v16 = vsub.f32 %v346_v13, %v217_v12 }
  0x18   : > { %v210_v5 = vsub.f32 %v205_v1, %v208_v3 }
  0x1a   : > { %v211_v6 = vmax.f32 %v210_v5, 0.0 }
  0x1c   : > { %v212_v8 = vadd.f32 1e-05, %v211_v6 }
  0x1e   : > { %371 = vrsqrt.f32 %v212_v8 }
  0x28   : > { %v372_v17 = vpop.eup %371 }
  0x29   : > { %v223_v18 = vrot.slane %v372_v17, %v222_v14 }
  0x2b   : > { %v224_v19 = vmul.f32 %v223_v18, %v218_v15  ;;  %v225_v20 = vmul.f32 %v223_v18, %v219_v16 }
  0x2d   : > { %v226_v21 = vmax.f32 %v224_v19, 0.0  ;;  %v227_v22 = vmax.f32 %v225_v20, 0.0 }
  0x2f   : > { %228 = vst [vmem:[%s198_s24] sm:$0xff] %v226_v21  ;;  %229 = vst [vmem:[%s198_s24 + $0x8] sm:$0xff] %v227_v22 }
  0x30 PF: > { %s12_s11 = sadd.s32 1, %s395_s11   ;;  %s456_s9 = smov %s391_s10 }
  0x31   : > { %p9_p5 = scmp.ge.s32.totalorder %s12_s11, 4   ;;  %s457_s10 = smov %s459_s12 }
  0x33   :  { %11 = sbr.rel (!%p9_p5) target bundleno = 2 (0x2), region = 61 }

// kernel: downsample_block.10
= control target key start
LH: loop header
LB: loop body
LE: loop exit
PB: predicated region body
PF: predicated region fallthrough
CT: control target
= control target key end

     0   :  { %s2240_s12 = smov 0   ;;  %s2242_s13 = smov 0   ;;  %s2605_s0 = inlined_call_operand.vmem [shape: bf16[2,2,4,5,384], index: 0, kind: input, shape index: {}]   ;;  %s2606_s1 = inlined_call_operand.vmem [shape: bf16[3,384,128], index: 1, kind: input, shape index: {}]   ;;  %s2607_s2 = inlined_call_operand.vmem [shape: bf16[2,16,128], index: 2, kind: output, shape index: {0}]   ;;  %s2608_s3 = inlined_call_operand.vmem [shape: f32[2,2,128], index: 3, kind: output, shape index: {1}]  }
   0x1   :  { %s2244_s14 = smov 0  }
   0x2 LB: > { %s33_s15 = sadd.s32 1, %s2211_s13  ;;  %p1701_p0 = scmp.ge.s32.totalorder %s2215_s14, 1  ;;  %s2215_s14 = sphi %s2244_s14, %s14_s14   ;;  %s2211_s13 = sphi %s2242_s13, %s2616_s13   ;;  %s2207_s12 = sphi %s2240_s12, %s2615_s12  }
   0x3   : > { %p35_p1 = scmp.ge.s32.totalorder %s33_s15, 2  ;;  %p182_p2 = scmp.lt.s32.totalorder %s2215_s14, 3 }
   0x5   : > { %s2618_s15 = smov (%p35_p1, %s33_s15), 0  ;;  %p183_p3 = pnand %p1701_p0, %p182_p2 }
   0x6   : > { %v2121_v0 = vld [vmem:[%s2606_s1 + $0x100] sm:$0xff] (!%p183_p3)   ;;  %v2217_v1 = vmov (!%p183_p3), 0.0   ;;  %v2124_v4 = vld [vmem:[%s2606_s1 + $0x108] sm:$0xff] (!%p183_p3)   ;;  %vm2218_vm0 = vmmov (!%p183_p3), 0   ;;  %v2127_v7 = vld [vmem:[%s2606_s1 + $0x110] sm:$0xff] (!%p183_p3)   ;;  %p230_p4 = scmp.lt.s32.totalorder (!%p183_p3), %s2207_s12, 1  ;;  %v522_v19 = vlaneseq (!%p183_p3) }
   0x7   : > { %186 = sbr.rel (%p183_p3) target bundleno = 345 (0x159), region = 28  ;;  %2019 = vmatprep.subr.bf16.mxu1 (!%p183_p3), %v2217_v1  ;;  %v2122_v2 = vld [vmem:[%s2606_s1 + $0x140] sm:$0xff] (!%p183_p3)   ;;  %1926 = vmatprep.subr.bf16.mxu0 (!%p183_p3), %v2121_v0  ;;  %v2125_v5 = vld [vmem:[%s2606_s1 + $0x148] sm:$0xff] (!%p183_p3)   ;;  %v2128_v8 = vld [vmem:[%s2606_s1 + $0x150] sm:$0xff] (!%p183_p3)   ;;  %v2219_v28 = vmov (!%p183_p3), 1983009808  }
   0x8   : > { %v2123_v3 = vld [vmem:[%s2606_s1 + $0xc0] sm:$0xff] (!%p183_p3)   ;;  %2020 = vmatpush3.bf16.msra.mxu1 (!%p183_p3), %v2122_v2  ;;  %v2126_v6 = vld [vmem:[%s2606_s1 + $0xc8] sm:$0xff] (!%p183_p3)   ;;  %2035 = vmatprep.mubr.msk.bf16.mxu1 (!%p183_p3), %vm2218_vm0, %v2217_v1  ;;  %v2129_v9 = vld [vmem:[%s2606_s1 + $0xd0] sm:$0xff] (!%p183_p3)   ;;  %v523_v24 = vshrl.u32 (!%p183_p3), %v522_v19, 7  ;;  %v520_v29 = vunpack.c.l.s4 (!%p183_p3), %v2219_v28  ;;  %vm1123_vm1 = vsmask.f32 (!%p183_p3), 1280 }
   0x9   : > { %1927 = vmatpush3.bf16.msra.mxu0 (!%p183_p3), %v2123_v3  ;;  %2021 = vmatprep.subr.bf16.mxu1 (!%p183_p3), %v2217_v1  ;;  %v2130_v10 = vld [vmem:[%s2606_s1 + $0x118] sm:$0xff] (!%p183_p3)   ;;  %v2133_v13 = vld [vmem:[%s2606_s1 + $0x120] sm:$0xff] (!%p183_p3)   ;;  %v2136_v16 = vld [vmem:[%s2606_s1 + $0x128] sm:$0xff] (!%p183_p3)   ;;  %vm1124_vm2 = vsmask.f32 (!%p183_p3), 3336  ;;  %vm1533_vm8 = vcmask (!%p183_p3), 1040384  }
   0xa   : > { %1928 = vmatprep.subr.bf16.mxu0 (!%p183_p3), %v2124_v4  ;;  %v2131_v11 = vld [vmem:[%s2606_s1 + $0x158] sm:$0xff] (!%p183_p3)   ;;  %v2134_v14 = vld [vmem:[%s2606_s1 + $0x160] sm:$0xff] (!%p183_p3)   ;;  %v2137_v17 = vld [vmem:[%s2606_s1 + $0x168] sm:$0xff] (!%p183_p3)   ;;  %v521_v34 = vunpack.c.0.s8 (!%p183_p3), %v520_v29  ;;  %vm1126_vm3 = vsmask.f32 (!%p183_p3), 5392 }
   0xb   : > { %v2132_v12 = vld [vmem:[%s2606_s1 + $0xd8] sm:$0xff] (!%p183_p3)   ;;  %v2135_v15 = vld [vmem:[%s2606_s1 + $0xe0] sm:$0xff] (!%p183_p3)   ;;  %v2138_v18 = vld [vmem:[%s2606_s1 + $0xe8] sm:$0xff] (!%p183_p3)   ;;  %vm1128_vm4 = vsmask.f32 (!%p183_p3), 7448 }
   0xc   : > { %2022 = vmatpush3.bf16.msra.mxu1 (!%p183_p3), %v2125_v5  ;;  %v2139_v20 = vld [vmem:[%s2606_s1 + $0x130] sm:$0xff] (!%p183_p3)   ;;  %v2142_v23 = vld [vmem:[%s2606_s1 + $0x138] sm:$0xff] (!%p183_p3)   ;;  %v2145_v35 = vld [vmem:[%s2606_s1 + $0x40] sm:$0xff] (!%p183_p3)   ;;  %v2360_v38 = vsub.s32 (!%p183_p3), %v521_v34, %v523_v24 }
   0xd   : > { %1929 = vmatpush3.bf16.msra.mxu0 (!%p183_p3), %v2126_v6  ;;  %2023 = vmatprep.subr.bf16.mxu1 (!%p183_p3), %v2217_v1  ;;  %v2140_v21 = vld [vmem:[%s2606_s1 + $0x170] sm:$0xff] (!%p183_p3)   ;;  %v2143_v26 = vld [vmem:[%s2606_s1 + $0x178] sm:$0xff] (!%p183_p3)   ;;  %v2147_v49 = vld [vmem:[%s2606_s1] sm:$0xff] (!%p183_p3)  }
   0xe   : > { %1930 = vmatprep.subr.bf16.mxu0 %v2127_v7  ;;  %s2620_s12 = smov (!%p230_p4, %s2207_s12), 1  ;;  %v2141_v22 = vld [vmem:[%s2606_s1 + $0xf0] sm:$0xff]   ;;  %v2144_v31 = vld [vmem:[%s2606_s1 + $0xf8] sm:$0xff]   ;;  %v2148_v51 = vld [vmem:[%s2606_s1 + $0x48] sm:$0xff]  }
   0xf   : > { %s2093_s25 = smul.u32 96, %s2620_s12  ;;  %v2146_v52 = vld [vmem:[%s2606_s1 + $0x80] sm:$0xff]   ;;  %v2150_v54 = vld [vmem:[%s2606_s1 + $0x8] sm:$0xff]   ;;  %v2151_v55 = vld [vmem:[%s2606_s1 + $0x50] sm:$0xff]   ;;  %s1705_s29 = sshll.u32 %s2620_s12, 1 }
  0x10   : > { %2024 = vmatpush3.bf16.msra.mxu1 %v2128_v8  ;;  %v2149_v56 = vld [vmem:[%s2606_s1 + $0x88] sm:$0xff]   ;;  %v2153_v57 = vld [vmem:[%s2606_s1 + $0x10] sm:$0xff]   ;;  %v2154_v58 = vld [vmem:[%s2606_s1 + $0x58] sm:$0xff]   ;;  %s2586_s5 = scalar_lea.vmem %s2608_s3, %s1705_s29  ;;  %s1918_s6 = sshll.u32 %s2620_s12, 3 }
  0x11   : > { %1931 = vmatpush3.bf16.msra.mxu0 %v2129_v9  ;;  %2025 = vmatprep.subr.bf16.mxu1 %v2217_v1  ;;  %s2336_s9 = scalar_lea.vmem %s2605_s0, %s2093_s25  ;;  %v2152_v59 = vld [vmem:[%s2606_s1 + $0x90] sm:$0xff]   ;;  %v2156_v60 = vld [vmem:[%s2606_s1 + $0x18] sm:$0xff]   ;;  %v2157_v61 = vld [vmem:[%s2606_s1 + $0x60] sm:$0xff]   ;;  %1515 = vst [vmem:[%s2586_s5] sm:$0x3] %v2217_v1  ;;  %s255_s10 = scalar_lea.vmem %s2607_s2, %s1918_s6 }
  0x12   : > { %1932 = vmatprep.subr.bf16.mxu0 %v2130_v10  ;;  %v1722_v25 = vld.sshfl [vmem:[%s2336_s9 + $0x30] sm:$0xf pattern:$0x76325410]  ;;  %v2155_v62 = vld [vmem:[%s2606_s1 + $0x98] sm:$0xff]   ;;  %v2159_v63 = vld [vmem:[%s2606_s1 + $0x20] sm:$0xff]  }
  0x13   : > { %v1724_v27 = vld.sshfl [vmem:[%s2336_s9 + $0x3c] sm:$0xf pattern:$0x76325410]  ;;  %v2160_v0 = vld [vmem:[%s2606_s1 + $0x68] sm:$0xff]   ;;  %v2163_v5 = vld [vmem:[%s2606_s1 + $0x70] sm:$0xff]  }
  0x14   : > { %2026 = vmatpush3.bf16.msra.mxu1 %v2131_v11  ;;  %v1726_v30 = vld.sshfl [vmem:[%s2336_s9 + $0x48] sm:$0xf pattern:$0x76325410]  ;;  %v1778_v33 = vcombine.low %v1722_v25, %v1724_v27  ;;  %v2158_v2 = vld [vmem:[%s2606_s1 + $0xa0] sm:$0xff]   ;;  %v2165_v8 = vld [vmem:[%s2606_s1 + $0x30] sm:$0xff]  }
  0x15   : > { %1933 = vmatpush3.bf16.msra.mxu0 %v2132_v12  ;;  %2027 = vmatprep.subr.bf16.mxu1 %v2217_v1  ;;  %v1728_v32 = vld.sshfl [vmem:[%s2336_s9 + $0x54] sm:$0xf pattern:$0x76325410]  ;;  %v2161_v3 = vld [vmem:[%s2606_s1 + $0xa8] sm:$0xff]   ;;  %vm2535_vm5 = vmor %vm1123_vm1, %vm1124_vm2 }
  0x16   : > { %1934 = vmatprep.subr.bf16.mxu0 %v2133_v13  ;;  %v1780_v36 = vcombine.low %v1726_v30, %v1728_v32  ;;  %v1723_v37 = vld.sshfl [vmem:[%s2336_s9 + $0x38] sm:$0x3 pattern:$0x76325410]  ;;  %v525_v42 = vrot.slane %v1778_v33, %v2360_v38  ;;  %v2162_v4 = vld [vmem:[%s2606_s1 + $0x28] sm:$0xff]   ;;  %v2171_v30 = vld [vmem:[%s2606_s1 + $0x180] sm:$0xff]  }
  0x17   : > { %v1725_v39 = vld.sshfl [vmem:[%s2336_s9 + $0x44] sm:$0x3 pattern:$0x76325410]  ;;  %v2167_v27 = vld [vmem:[%s2606_s1 + $0xb8] sm:$0xff]   ;;  %v2172_v32 = vld [vmem:[%s2606_s1 + $0x1c8] sm:$0xff]  }
  0x18   : > { %2028 = vmatpush3.bf16.msra.mxu1 %v2134_v14  ;;  %v1727_v40 = vld.sshfl [vmem:[%s2336_s9 + $0x50] sm:$0x3 pattern:$0x76325410]  ;;  %v1779_v41 = vcombine.low %v1723_v37, %v1725_v39  ;;  %v539_v43 = vrot.slane %v1780_v36, %v2360_v38  ;;  %v2170_v33 = vld [vmem:[%s2606_s1 + $0x200] sm:$0xff]   ;;  %v2174_v34 = vld [vmem:[%s2606_s1 + $0x188] sm:$0xff]  }
  0x19   : > { %1935 = vmatpush3.bf16.msra.mxu0 %v2135_v15  ;;  %2029 = vmatprep.subr.bf16.mxu1 %v2217_v1  ;;  %v1729_v44 = vld.sshfl [vmem:[%s2336_s9 + $0x5c] sm:$0x3 pattern:$0x76325410]  ;;  %v2164_v15 = vld [vmem:[%s2606_s1 + $0xb0] sm:$0xff]   ;;  %v2173_v36 = vld [vmem:[%s2606_s1 + $0x208] sm:$0xff]  }
  0x1a   : > { %1936 = vmatprep.subr.bf16.mxu0 %v2136_v16  ;;  %v1781_v45 = vcombine.low %v1727_v40, %v1729_v44  ;;  %v532_v46 = vrot.slane %v1779_v41, %v2360_v38  ;;  %v548_v47 = vcombine.high %v525_v42, %v539_v43  ;;  %v547_v48 = vcombine.low %v525_v42, %v539_v43  ;;  %v1706_v6 = vld.sshfl [vmem:[%s2336_s9] sm:$0xf pattern:$0x76325410]  ;;  %v2166_v16 = vld [vmem:[%s2606_s1 + $0x78] sm:$0xff]   ;;  %v2177_v37 = vld [vmem:[%s2606_s1 + $0x190] sm:$0xff]  }
  0x1b   : > { %v1708_v7 = vld.sshfl [vmem:[%s2336_s9 + $0xc] sm:$0xf pattern:$0x76325410]  ;;  %v2178_v39 = vld [vmem:[%s2606_s1 + $0x1d8] sm:$0xff]   ;;  %v2181_v42 = vld [vmem:[%s2606_s1 + $0x1e0] sm:$0xff]  }
  0x1c   : > { %2030 = vmatpush3.bf16.msra.mxu1 %v2137_v17  ;;  %v546_v50 = vrot.slane %v1781_v45, %v2360_v38  ;;  %729 = vmatprep.mubr.bf16.mxu0 %v548_v47  ;;  %v1710_v9 = vld.sshfl [vmem:[%s2336_s9 + $0x18] sm:$0xf pattern:$0x76325410]  ;;  %v1806_v10 = vcombine.low %v1706_v6, %v1708_v7  ;;  %v2176_v40 = vld [vmem:[%s2606_s1 + $0x210] sm:$0xff]   ;;  %v2183_v44 = vld [vmem:[%s2606_s1 + $0x1a0] sm:$0xff]  }
  0x1d   : > { %1937 = vmatpush3.bf16.msra.mxu0 %v2138_v18  ;;  %2031 = vmatprep.subr.bf16.mxu1 %v2217_v1  ;;  %v1712_v11 = vld.sshfl [vmem:[%s2336_s9 + $0x24] sm:$0xf pattern:$0x76325410]  ;;  %v2180_v41 = vld [vmem:[%s2606_s1 + $0x198] sm:$0xff]   ;;  %vm2548_vm6 = vmor %vm2535_vm5, %vm1126_vm3 }
  0x1e   : > { %1938 = vmatprep.subr.bf16.mxu0 %v2139_v20  ;;  %v549_v53 = vcombine.low %v532_v46, %v546_v50  ;;  %v1808_v12 = vcombine.low %v1710_v9, %v1712_v11  ;;  %v789_v13 = vrot.slane %v1806_v10, %v2360_v38  ;;  %v1707_v14 = vld.sshfl [vmem:[%s2336_s9 + $0x8] sm:$0x3 pattern:$0x76325410]  ;;  %v2179_v43 = vld [vmem:[%s2606_s1 + $0x218] sm:$0xff]   ;;  %v2182_v45 = vld [vmem:[%s2606_s1 + $0x220] sm:$0xff]  }
  0x1f   : > { %v1709_v17 = vld.sshfl [vmem:[%s2336_s9 + $0x14] sm:$0x3 pattern:$0x76325410]  ;;  %v2184_v46 = vld [vmem:[%s2606_s1 + $0x1e8] sm:$0xff]   ;;  %v2190_v10 = vld [vmem:[%s2606_s1 + $0x1f8] sm:$0xff]  }
  0x20   : > { %2032 = vmatpush3.bf16.msra.mxu1 %v2140_v21  ;;  %v803_v18 = vrot.slane %v1808_v12, %v2360_v38  ;;  %v1711_v19 = vld.sshfl [vmem:[%s2336_s9 + $0x20] sm:$0x3 pattern:$0x76325410]  ;;  %v1807_v20 = vcombine.low %v1707_v14, %v1709_v17  ;;  %v2187_v50 = vld [vmem:[%s2606_s1 + $0x1f0] sm:$0xff]   ;;  %vm2562_vm7 = vmor %vm2548_vm6, %vm1128_vm4 }
  0x21   : > { %1939 = vmatpush3.bf16.msra.mxu0 %v2141_v22  ;;  %2033 = vmatprep.subr.bf16.mxu1 %v2217_v1  ;;  %v1713_v21 = vld.sshfl [vmem:[%s2336_s9 + $0x2c] sm:$0x3 pattern:$0x76325410]  ;;  %v2168_v22 = vld [vmem:[%s2606_s1 + $0x38] sm:$0xff]  }
  0x22   : > { %1940 = vmatprep.subr.bf16.mxu0 %v2142_v23  ;;  %v812_v23 = vcombine.high %v789_v13, %v803_v18  ;;  %v1809_v24 = vcombine.low %v1711_v19, %v1713_v21  ;;  %v796_v25 = vrot.slane %v1807_v20, %v2360_v38  ;;  %v811_v29 = vcombine.low %v789_v13, %v803_v18  ;;  %v1834_v47 = vld.sshfl [vmem:[%s2336_s9] sm:$0x5f pattern:$0x76325410] }
  0x23   : > { %v1841_v7 = vld.sshfl [vmem:[%s2336_s9 + $0x2c] sm:$0x13 pattern:$0x76325410] }
  0x24   : > { %2034 = vmatpush3.bf16.msra.mxu1 %v2143_v26  ;;  %v2169_v26 = vld [vmem:[%s2606_s1 + $0x1c0] sm:$0xff]   ;;  %v810_v28 = vrot.slane %v1809_v24, %v2360_v38 }
  0x25   : > { %1941 = vmatpush3.bf16.msra.mxu0 %v2144_v31  ;;  %2039 = vmatprep.subr.bf16.mxu1 %v2217_v1 }
  0x26   : > { %1957 = vmatprep.subr.bf16.mxu0 %v2145_v35  ;;  %v813_v31 = vcombine.low %v796_v25, %v810_v28  ;;  %v2175_v35 = vld [vmem:[%s2606_s1 + $0x1d0] sm:$0xff]   ;;  %v2192_v25 = vld [vmem:[%s2606_s1 + $0x1b8] sm:$0xff]  }
  0x27   : > { %2036 = vmatmul.mubr.bf16.vlgmr.msra.gmra.mrb[0].mxu1 %v549_v53 }
  0x28   : > { %730 = vmatmul.mubr.bf16.vlgmr.msra.gmra.mrb[0].mxu0 %v547_v48  ;;  %2040 = vmatpush3.bf16.msra.mxu1 %v2146_v52  ;;  %v2186_v48 = vld [vmem:[%s2606_s1 + $0x1a8] sm:$0xff]  }
  0x29   : > { %1958 = vmatpush3.bf16.msra.mxu0 %v2147_v49  ;;  %2055 = vmatprep.mubr.msk.bf16.mxu1 %vm2218_vm0, %v2217_v1  ;;  %v1835_v49 = vld.sshfl [vmem:[%s2336_s9 + $0x8] sm:$0x13 pattern:$0x76325410] }
  0x2a   : > { %1959 = vmatprep.subr.bf16.mxu0 %v2148_v51  ;;  %2041 = vmatprep.subr.bf16.mxu1 %v2217_v1  ;;  %v1836_v51 = vld.sshfl [vmem:[%s2336_s9 + $0xc] sm:$0x5f pattern:$0x76325410]  ;;  %v1073_v52 = vcombine.low %v1834_v47, %v1835_v49  ;;  %v1074_v53 = vcombine.high %v1834_v47, %v1835_v49 }
  0x2b   : > { %993 = vmatprep.mubr.bf16.mxu0 %v812_v23 }
  0x2c   : > { %2042 = vmatpush3.bf16.msra.mxu1 %v2149_v56  ;;  %v1838_v56 = vld.sshfl [vmem:[%s2336_s9 + $0x18] sm:$0x5f pattern:$0x76325410] }
  0x2d   : > { %1960 = vmatpush3.bf16.msra.mxu0 %v2150_v54  ;;  %2043 = vmatprep.subr.bf16.mxu1 %v2217_v1  ;;  %v2185_v54 = vld [vmem:[%s2606_s1 + $0x228] sm:$0xff]  }
  0x2e   : > { %1961 = vmatprep.subr.bf16.mxu0 %v2151_v55  ;;  %v1837_v55 = vld.sshfl [vmem:[%s2336_s9 + $0x14] sm:$0x13 pattern:$0x76325410] }
  0x30   : > { %2044 = vmatpush3.bf16.msra.mxu1 %v2152_v59  ;;  %v1134_v59 = vshll.u32 %v1073_v52, 16 }
  0x31   : > { %1962 = vmatpush3.bf16.msra.mxu0 %v2153_v57  ;;  %2045 = vmatprep.subr.bf16.mxu1 %v2217_v1  ;;  %v1089_v57 = vcombine.low %v1836_v51, %v1837_v55 }
  0x32   : > { %1963 = vmatprep.subr.bf16.mxu0 %v2154_v58  ;;  %v1131_v58 = vshrl.u32 %v1073_v52, 16  ;;  %v1136_v6 = vrot.slane %v1134_v59, 7 }
  0x33   : > { %v1145_v9 = vshrl.u32 %v1089_v57, 16 }
  0x34   : > { %2046 = vmatpush3.bf16.msra.mxu1 %v2155_v62  ;;  %v1090_v62 = vcombine.high %v1836_v51, %v1837_v55 }
  0x35   : > { %1964 = vmatpush3.bf16.msra.mxu0 %v2156_v60  ;;  %2047 = vmatprep.subr.bf16.mxu1 %v2217_v1  ;;  %v2189_v60 = vld [vmem:[%s2606_s1 + $0x1b0] sm:$0xff]   ;;  %v1147_v17 = vrot.slane %v1145_v9, 6 }
  0x36   : > { %1965 = vmatprep.subr.bf16.mxu0 %v2157_v61  ;;  %v1839_v61 = vld.sshfl [vmem:[%s2336_s9 + $0x20] sm:$0x13 pattern:$0x76325410]  ;;  %v1154_v18 = vshll.u32 %v1090_v62, 16 }
  0x38   : > { %2048 = vmatpush3.bf16.msra.mxu1 %v2158_v2  ;;  %v1840_v2 = vld.sshfl [vmem:[%s2336_s9 + $0x24] sm:$0x5f pattern:$0x76325410] }
  0x39   : > { %1966 = vmatpush3.bf16.msra.mxu0 %v2159_v63  ;;  %2049 = vmatprep.subr.bf16.mxu1 %v2217_v1  ;;  %v1121_v11 = vcombine.low %v1840_v2, %v1841_v7  ;;  %v1122_v12 = vcombine.high %v1840_v2, %v1841_v7 }
  0x3a   : > { %1967 = vmatprep.subr.bf16.mxu0 %v2160_v0  ;;  %v1140_v0 = vshll.u32 %v1074_v53, 16 }
  0x3b   : > { %v1173_v24 = vshrl.u32 %v1121_v11, 16 }
  0x3c   : > { %2050 = vmatpush3.bf16.msra.mxu1 %v2161_v3  ;;  %v1105_v3 = vcombine.low %v1838_v56, %v1839_v61 }
  0x3d   : > { %1968 = vmatpush3.bf16.msra.mxu0 %v2162_v4  ;;  %2051 = vmatprep.subr.bf16.mxu1 %v2217_v1  ;;  %v1106_v4 = vcombine.high %v1838_v56, %v1839_v61 }
  0x3e   : > { %1969 = vmatprep.subr.bf16.mxu0 %v2163_v5  ;;  %v1133_v5 = vrot.slane %v1131_v58, 6  ;;  %v1159_v19 = vshrl.u32 %v1105_v3, 16  ;;  %v1162_v20 = vshll.u32 %v1105_v3, 16 }
  0x3f   : > { %v1168_v23 = vshll.u32 %v1106_v4, 16 }
  0x40   : > { %2052 = vmatpush3.bf16.msra.mxu1 %v2164_v15  ;;  %v1137_v14 = vor.u32 %v1136_v6, %v1133_v5  ;;  %v1148_v15 = vshll.u32 %v1089_v57, 16  ;;  %v1164_v28 = vrot.slane %v1162_v20, 7 }
  0x41   : > { %1970 = vmatpush3.bf16.msra.mxu0 %v2165_v8  ;;  %2053 = vmatprep.subr.bf16.mxu1 %v2217_v1  ;;  %v1142_v8 = vrot.slane %v1140_v0, 7 }
  0x42   : > { %1971 = vmatprep.subr.bf16.mxu0 %v2166_v16  ;;  %v2188_v16 = vld [vmem:[%s2606_s1 + $0x230] sm:$0xff]   ;;  %v1138_v21 = vrot.slane %v1137_v14, 2 }
  0x44   : > { %2054 = vmatpush3.bf16.msra.mxu1 %v2167_v27  ;;  %v1161_v27 = vrot.slane %v1159_v19, 6 }
  0x45   : > { %1972 = vmatpush3.bf16.msra.mxu0 %v2168_v22  ;;  %2059 = vmatprep.subr.bf16.mxu1 %v2217_v1  ;;  %v1150_v22 = vrot.slane %v1148_v15, 7 }
  0x46   : > { %1988 = vmatprep.subr.bf16.mxu0 %v2169_v26 }
  0x47   : > { %2056 = vmatmul.mubr.bf16.vlgmr.msra.gmra.mrb[0].mxu1 %v813_v31  ;;  %v1156_v31 = vrot.slane %v1154_v18, 7 }
  0x48   : > { %994 = vmatmul.mubr.bf16.vlgmr.msra.gmra.mrb[4].mxu0 %v811_v29  ;;  %2060 = vmatpush3.bf16.msra.mxu1 %v2170_v33  ;;  %v1176_v29 = vshll.u32 %v1121_v11, 16  ;;  %v2191_v33 = vld [vmem:[%s2606_s1 + $0x238] sm:$0xff]  }
  0x49   : > { %1989 = vmatpush3.bf16.msra.mxu0 %v2171_v30  ;;  %2075 = vmatprep.mubr.msk.bf16.mxu1 %vm2218_vm0, %v2217_v1  ;;  %v1151_v30 = vor.u32 %v1150_v22, %v1147_v17 }
  0x4a   : > { %1990 = vmatprep.subr.bf16.mxu0 %v2172_v32  ;;  %2061 = vmatprep.subr.bf16.mxu1 %v2217_v1  ;;  %v1175_v32 = vrot.slane %v1173_v24, 6 }
  0x4c   : > { %2062 = vmatpush3.bf16.msra.mxu1 %v2173_v36  ;;  %v1178_v36 = vrot.slane %v1176_v29, 7 }
  0x4d   : > { %1991 = vmatpush3.bf16.msra.mxu0 %v2174_v34  ;;  %2063 = vmatprep.subr.bf16.mxu1 %v2217_v1  ;;  %v1165_v34 = vor.u32 %v1164_v28, %v1161_v27 }
  0x4e   : > { %1992 = vmatprep.subr.bf16.mxu0 %v2175_v35  ;;  %v1170_v35 = vrot.slane %v1168_v23, 7 }
  0x50   : > { %2064 = vmatpush3.bf16.msra.mxu1 %v2176_v40  ;;  %v1152_v40 = vrot.slane %v1151_v30, 2 }
  0x51   : > { %1993 = vmatpush3.bf16.msra.mxu0 %v2177_v37  ;;  %2065 = vmatprep.subr.bf16.mxu1 %v2217_v1  ;;  %v1182_v37 = vshll.u32 %v1122_v12, 16 }
  0x52   : > { %1994 = vmatprep.subr.bf16.mxu0 %v2178_v39  ;;  %v1143_v39 = vsel %vm2562_vm7, %v1138_v21, %v1142_v8 }
  0x54   : > { %2066 = vmatpush3.bf16.msra.mxu1 %v2179_v43  ;;  %v1184_v43 = vrot.slane %v1182_v37, 7  ;;  %v1516_v37 = vld [vmem:[%s2586_s5] sm:$0x3] }
  0x55   : > { %1995 = vmatpush3.bf16.msra.mxu0 %v2180_v41  ;;  %2067 = vmatprep.subr.bf16.mxu1 %v2217_v1  ;;  %v1166_v41 = vrot.slane %v1165_v34, 2 }
  0x56   : > { %1996 = vmatprep.subr.bf16.mxu0 %v2181_v42  ;;  %v1179_v42 = vor.u32 %v1178_v36, %v1175_v32 }
  0x58   : > { %2068 = vmatpush3.bf16.msra.mxu1 %v2182_v45  ;;  %v1171_v45 = vsel %vm2562_vm7, %v1166_v41, %v1170_v35 }
  0x59   : > { %1997 = vmatpush3.bf16.msra.mxu0 %v2183_v44  ;;  %2069 = vmatprep.subr.bf16.mxu1 %v2217_v1  ;;  %v1157_v44 = vsel %vm2562_vm7, %v1152_v40, %v1156_v31 }
  0x5a   : > { %1998 = vmatprep.subr.bf16.mxu0 %v2184_v46  ;;  %v1180_v46 = vrot.slane %v1179_v42, 2  ;;  %v1235_v47 = vcombine.low %v1143_v39, %v1157_v44 }
  0x5c   : > { %2070 = vmatpush3.bf16.msra.mxu1 %v2185_v54  ;;  %v1185_v49 = vsel %vm2562_vm7, %v1180_v46, %v1184_v43  ;;  %v1245_v52 = vrot.slane %v1235_v47, %v2360_v38 }
  0x5d   : > { %1999 = vmatpush3.bf16.msra.mxu0 %v2186_v48  ;;  %2071 = vmatprep.subr.bf16.mxu1 %v2217_v1  ;;  %v1236_v48 = vcombine.high %v1143_v39, %v1157_v44  ;;  %v1238_v51 = vcombine.high %v1171_v45, %v1185_v49 }
  0x5e   : > { %2000 = vmatprep.subr.bf16.mxu0 %v2187_v50  ;;  %v1237_v50 = vcombine.low %v1171_v45, %v1185_v49 }
  0x5f   : > { %v1252_v53 = vrot.slane %v1236_v48, %v2360_v38  ;;  %v1266_v55 = vrot.slane %v1238_v51, %v2360_v38 }
  0x60   : > { %2072 = vmatpush3.bf16.msra.mxu1 %v2188_v16  ;;  %v1259_v54 = vrot.slane %v1237_v50, %v2360_v38 }
  0x61   : > { %2001 = vmatpush3.bf16.msra.mxu0 %v2189_v60  ;;  %2073 = vmatprep.subr.bf16.mxu1 %v2217_v1  ;;  %v1269_v57 = vcombine.low %v1252_v53, %v1266_v55 }
  0x62   : > { %2002 = vmatprep.subr.bf16.mxu0 %v2190_v10  ;;  %v1268_v56 = vcombine.high %v1245_v52, %v1259_v54  ;;  %v1267_v58 = vcombine.low %v1245_v52, %v1259_v54 }
  0x64   : > { %2074 = vmatpush3.bf16.msra.mxu1 %v2191_v33  ;;  %1449 = vmatprep.mubr.bf16.mxu0 %v1268_v56 }
  0x65   : > { %2003 = vmatpush3.bf16.msra.mxu0 %v2192_v25 }
  0x67   : > { %2076 = vmatmul.mubr.bf16.vlgmr.msra.gmra.mrb[0].mxu1 %v1269_v57 }
  0x68   : > { %1450 = vmatmul.mubr.bf16.vlgmr.msra.gmra.mrb[8].mxu0 %v1267_v58 }
  0xfb   : > { %v1942_v59 = vpop.f32.mrb[0].mxu0 }
  0xfc   : > { %v1943_v60 = vpop.f32.mrb[1].mxu0 }
  0xfd   : > { %v1944_v61 = vadd.f32 %v1943_v60, %v1942_v59  ;;  %v1945_v62 = vpop.f32.mrb[2].mxu0 }
  0xfe   : > { %v1946_v38 = vpop.f32.mrb[3].mxu0 }
  0xff   : > { %v1947_v63 = vadd.f32 %v1946_v38, %v1945_v62 }
 0x11b   : > { %v1973_v0 = vpop.f32.mrb[4].mxu0 }
 0x11c   : > { %v1974_v2 = vpop.f32.mrb[5].mxu0 }
 0x11d   : > { %v1975_v3 = vadd.f32 %v1974_v2, %v1973_v0  ;;  %v1976_v4 = vpop.f32.mrb[6].mxu0 }
 0x11e   : > { %v1977_v5 = vpop.f32.mrb[7].mxu0 }
 0x11f   : > { %v2079_v6 = vadd.f32 %v1975_v3, %v1944_v61  ;;  %v1978_v7 = vadd.f32 %v1977_v5, %v1976_v4 }
 0x121   : > { %v2082_v8 = vadd.f32 %v1978_v7, %v1947_v63 }
 0x13a   : > { %v1492_v9 = vpop.f32.mrb[0].mxu1 }
 0x13b   : > { %v2004_v10 = vpop.f32.mrb[8].mxu0  ;;  %v2077_v11 = vpop.f32.mrb[1].mxu1 }
 0x13c   : > { %v2005_v12 = vpop.f32.mrb[9].mxu0  ;;  %v1495_v1 = vpop.f32.mrb[2].mxu1 }
 0x13d   : > { %v2006_v13 = vadd.f32 %v2005_v12, %v2004_v10  ;;  %v2007_v14 = vpop.f32.mrb[10].mxu0  ;;  %v2078_v15 = vpop.f32.mrb[3].mxu1 }
 0x13e   : > { %v2008_v16 = vpop.f32.mrb[11].mxu0 }
 0x13f   : > { %v2080_v17 = vadd.f32 %v2079_v6, %v2006_v13  ;;  %v2009_v18 = vadd.f32 %v2008_v16, %v2007_v14 }
 0x141   : > { %v2081_v19 = vadd.f32 %v2080_v17, %v1492_v9  ;;  %v2083_v20 = vadd.f32 %v2082_v8, %v2009_v18 }
 0x143   : > { %v2084_v21 = vadd.f32 %v2083_v20, %v1495_v1  ;;  %v1524_v22 = vmul.f32 %v2081_v19, %v2081_v19 }
 0x145   : > { %v1924_v23 = vpack.c.bf16 %v2084_v21, %v2081_v19  ;;  %v1517_v24 = vadd.f32 %v2084_v21, %v2081_v19  ;;  %v1525_v25 = vmul.f32 %v2084_v21, %v2084_v21 }
 0x147   : > { %1925 = vst [vmem:[%s255_s10] sm:$0xff] %v1924_v23   ;;  %v1518_v26 = vrot.slane %v1517_v24, 4  ;;  %v1526_v27 = vadd.f32 %v1525_v25, %v1524_v22 }
 0x149   : > { %v1519_v28 = vadd.f32 %v1518_v26, %v1517_v24  ;;  %v1527_v29 = vrot.slane %v1526_v27, 4 }
 0x14b   : > { %v1520_v30 = vrot.slane %v1519_v28, 2  ;;  %v1528_v31 = vadd.f32 %v1527_v29, %v1526_v27 }
 0x14d   : > { %v1521_v32 = vadd.f32 %v1520_v30, %v1519_v28  ;;  %v1529_v33 = vrot.slane %v1528_v31, 2 }
 0x14f   : > { %v1522_v34 = vrot.slane %v1521_v32, 1  ;;  %v1530_v35 = vadd.f32 %v1529_v33, %v1528_v31 }
 0x151   : > { %v1531_v36 = vrot.slane %v1530_v35, 1  ;;  %v1523_v39 = vadd.f32 %v1522_v34, %v1521_v32 }
 0x153   : > { %v1532_v40 = vadd.f32 %v1531_v36, %v1530_v35 }
 0x155   : > { %v1534_v41 = vsel %vm1533_vm8, %v1523_v39, %v1532_v40 }
 0x156   : > { %v1535_v42 = vadd.f32 %v1534_v41, %v1516_v37 }
 0x158   : > { %1536 = vst [vmem:[%s2586_s5] sm:$0x3] %v1535_v42 }
 0x159 PF: > { %s14_s14 = sadd.s32 1, %s2215_s14   ;;  %s2615_s12 = smov %s2211_s13 }
 0x15a   : > { %p11_p5 = scmp.ge.s32.totalorder %s14_s14, 4   ;;  %s2616_s13 = smov %s2618_s15 }
 0x15c   :  { %13 = sbr.rel (!%p11_p5) target bundleno = 2 (0x2), region = 80 }

</bundles_post_ra>
